<compile_context>
chip_gen: v7x
topology: tpu7x:2x2x1
jax: 0.10.0
libtpu: 0.0.40
codegen_flags: <defaults>
</compile_context>

<pallas_src>
import functools
import math

import jax
import jax.numpy as jnp
from jax.experimental import pallas as pl
from jax.experimental.pallas import tpu as pltpu

# ---------------- config (small synthetic shapes) ----------------
B = 2
IMG_C, IMG_HW = 3, 32          # pixel_values: [B, 3, 32, 32]
LAT_C, LAT_HW = 4, 8           # latents:      [B, 4, 8, 8]
VAE_HID = 16
VOCAB, SEQ, TXT_D, TXT_FF = 1000, 8, 32, 128
UNET_C = 32
TIME_D = 32
NUM_TRAIN_TIMESTEPS = 1000
SCALING_FACTOR = 0.18215

DP = 128                                  # lane-padded feature width (real dims <= 32)
LAT_FLAT = LAT_C * LAT_HW * LAT_HW        # 256 flattened NHWC latent elems / batch


# =====================================================================================
# Fused linear:  out = act( LN(x) @ W + b (+ residual) )   --  bf16 MXU, f32 accumulate
#   grid = (M-tiles ["parallel", shards across v7x's 2 TCs], K-tiles ["arbitrary"])
#   with a VMEM f32 accumulator (K tiling degenerates to 1 step at these shapes but the
#   pattern is what real SD shapes need on v7x's 64 MiB VMEM).
# =====================================================================================
def _fused_linear_kernel(*refs, activation, ln_dim, has_residual):
    it = iter(refs)
    x_ref = next(it)
    r_ref = next(it) if has_residual else None
    w_ref = next(it)
    b_ref = next(it)
    if ln_dim is not None:
        g_ref = next(it)
        beta_ref = next(it)
    o_ref = next(it)
    acc_ref = next(it)

    @pl.when(pl.program_id(1) == 0)
    def _init():
        acc_ref[...] = jnp.zeros_like(acc_ref)

    x = x_ref[...]
    if ln_dim is not None:
        # padded lanes of x are exactly zero -> sums over 128 lanes / ln_dim give true stats
        mean = jnp.sum(x, axis=-1, keepdims=True) / ln_dim
        ex2 = jnp.sum(x * x, axis=-1, keepdims=True) / ln_dim
        var = ex2 - mean * mean
        x = (x - mean) * jax.lax.rsqrt(var + 1e-5) * g_ref[...] + beta_ref[...]

    acc_ref[...] += jnp.dot(x.astype(jnp.bfloat16),
                            w_ref[...].astype(jnp.bfloat16),
                            preferred_element_type=jnp.float32)

    @pl.when(pl.program_id(1) == pl.num_programs(1) - 1)
    def _finalize():
        out = acc_ref[...] + b_ref[...]
        if has_residual:
            out = out + r_ref[...]
        if activation == "silu":
            out = out * jax.nn.sigmoid(out)           # epilogue math stays f32 (v5e)
        elif activation == "gelu":
            out = jax.nn.gelu(out)
        o_ref[...] = out


def fused_linear(x, w, b, *, ln=None, ln_dim=None, residual=None, activation=None):
    M, K = x.shape
    Kw, N = w.shape
    assert K == Kw
    b2 = b.reshape(1, N)

    if M >= 128 and M % 64 == 0:
        tm, nm = 64, M // 64          # >=2 parallel grid steps -> megacore on v7x
    else:
        tm, nm = M, 1
    TK = 512
    if K > TK:
        assert K % TK == 0 and ln is None
        tk, nk = TK, K // TK
    else:
        tk, nk = K, 1

    inputs = [x]
    in_specs = [pl.BlockSpec((tm, tk), lambda i, k: (i, k))]
    if residual is not None:
        inputs.append(residual)
        in_specs.append(pl.BlockSpec((tm, N), lambda i, k: (i, 0)))
    inputs += [w, b2]
    in_specs += [pl.BlockSpec((tk, N), lambda i, k: (k, 0)),
                 pl.BlockSpec((1, N), lambda i, k: (0, 0))]
    if ln is not None:
        g, beta = ln
        inputs += [g.reshape(1, K), beta.reshape(1, K)]
        in_specs += [pl.BlockSpec((1, tk), lambda i, k: (0, k)),
                     pl.BlockSpec((1, tk), lambda i, k: (0, k))]

    kernel = functools.partial(_fused_linear_kernel, activation=activation,
                               ln_dim=(ln_dim if ln is not None else None),
                               has_residual=residual is not None)
    return pl.pallas_call(
        kernel,
        out_shape=jax.ShapeDtypeStruct((M, N), jnp.float32),
        grid=(nm, nk),
        in_specs=in_specs,
        out_specs=pl.BlockSpec((tm, N), lambda i, k: (i, 0)),
        scratch_shapes=[pltpu.VMEM((tm, N), jnp.float32)],
        compiler_params=pltpu.CompilerParams(
            dimension_semantics=("parallel", "arbitrary")),
    )(*inputs)


# =====================================================================================
# Fused attention:  softmax( (q*scale) k^T ) v   -- bf16 MXU inputs, EUP reciprocal
# =====================================================================================
def _dot_nt(a, b):  # a:(M,D) b:(N,D) contracted on D (no explicit transpose)
    return jax.lax.dot_general(a.astype(jnp.bfloat16), b.astype(jnp.bfloat16),
                               (((1,), (1,)), ((), ())),
                               preferred_element_type=jnp.float32)


def _attn_body(q, k, v, o_ref, causal, scale):
    q = q * scale                           # fold scale into q (small side)
    s = _dot_nt(q, k)                       # (Lq, Lk) f32
    if causal:
        Lq, Lk = s.shape
        qi = jax.lax.broadcasted_iota(jnp.int32, (Lq, Lk), 0)
        ki = jax.lax.broadcasted_iota(jnp.int32, (Lq, Lk), 1)
        s = jnp.where(ki <= qi, s, -1e9)
    m = jnp.max(s, axis=-1, keepdims=True)
    p = jnp.exp(s - m)
    l = jnp.sum(p, axis=-1, keepdims=True)
    p = p * pl.reciprocal(l, approx=True)   # EUP slot, frees VALU
    o_ref[0] = jnp.dot(p.astype(jnp.bfloat16), v.astype(jnp.bfloat16),
                       preferred_element_type=jnp.float32)


def _self_attn_kernel(qkv_ref, o_ref, *, causal, scale, dp):
    qkv = qkv_ref[0]                        # (S, 3*dp), slices are 128-aligned
    _attn_body(qkv[:, 0:dp], qkv[:, dp:2 * dp], qkv[:, 2 * dp:3 * dp],
               o_ref, causal, scale)


def _cross_attn_kernel(q_ref, kv_ref, o_ref, *, scale, dp):
    q = q_ref[0]
    kv = kv_ref[0]
    _attn_body(q, kv[:, 0:dp], kv[:, dp:2 * dp], o_ref, False, scale)


def self_attention(qkv, *, causal, scale, dp=DP):
    Bq, S, threeD = qkv.shape
    return pl.pallas_call(
        functools.partial(_self_attn_kernel, causal=causal, scale=scale, dp=dp),
        out_shape=jax.ShapeDtypeStruct((Bq, S, dp), jnp.float32),
        grid=(Bq,),
        in_specs=[pl.BlockSpec((1, S, threeD), lambda b: (b, 0, 0))],
        out_specs=pl.BlockSpec((1, S, dp), lambda b: (b, 0, 0)),
        compiler_params=pltpu.CompilerParams(dimension_semantics=("parallel",)),
    )(qkv)


def cross_attention(q, kv, *, scale, dp=DP):
    Bq, Lq, _ = q.shape
    _, Lk, twoD = kv.shape
    return pl.pallas_call(
        functools.partial(_cross_attn_kernel, scale=scale, dp=dp),
        out_shape=jax.ShapeDtypeStruct((Bq, Lq, dp), jnp.float32),
        grid=(Bq,),
        in_specs=[pl.BlockSpec((1, Lq, dp), lambda b: (b, 0, 0)),
                  pl.BlockSpec((1, Lk, twoD), lambda b: (b, 0, 0))],
        out_specs=pl.BlockSpec((1, Lq, dp), lambda b: (b, 0, 0)),
        compiler_params=pltpu.CompilerParams(dimension_semantics=("parallel",)),
    )(q, kv)


# =====================================================================================
# 3x3 conv (padding=1) fully inside Pallas: 9 shifted-slice matmuls, no im2col in HBM.
# Optional fused per-batch time-embedding bias and SiLU epilogue.
# =====================================================================================
def _conv3x3_kernel(x_ref, w_ref, b_ref, *rest, H, W, use_temb, activation):
    if use_temb:
        temb_ref, o_ref = rest
    else:
        (o_ref,) = rest
    Cp = x_ref.shape[-1]
    Co = w_ref.shape[-1]
    acc = jnp.zeros((H * W, Co), jnp.float32)
    for dy in range(3):
        for dx in range(3):
            xs = x_ref[0, dy:dy + H, dx:dx + W, :].reshape(H * W, Cp)
            acc = acc + jnp.dot(xs.astype(jnp.bfloat16),
                                w_ref[dy * 3 + dx].astype(jnp.bfloat16),
                                preferred_element_type=jnp.float32)
    acc = acc + b_ref[...]
    if use_temb:
        acc = acc + temb_ref[0]
    if activation == "silu":
        acc = acc * jax.nn.sigmoid(acc)
    o_ref[0] = acc


def conv3x3(x_pad_nhwc, w9, b, temb=None, activation=None):
    Bx, Hp, Wp, Cp = x_pad_nhwc.shape
    H, W = Hp - 2, Wp - 2
    Co = w9.shape[-1]
    inputs = [x_pad_nhwc, w9, b.reshape(1, Co)]
    in_specs = [pl.BlockSpec((1, Hp, Wp, Cp), lambda bi: (bi, 0, 0, 0)),
                pl.BlockSpec((9, Cp, Co), lambda bi: (0, 0, 0)),
                pl.BlockSpec((1, Co), lambda bi: (0, 0))]
    if temb is not None:
        inputs.append(temb.reshape(Bx, 1, Co))
        in_specs.append(pl.BlockSpec((1, 1, Co), lambda bi: (bi, 0, 0)))
    return pl.pallas_call(
        functools.partial(_conv3x3_kernel, H=H, W=W,
                          use_temb=temb is not None, activation=activation),
        out_shape=jax.ShapeDtypeStruct((Bx, H * W, Co), jnp.float32),
        grid=(Bx,),
        in_specs=in_specs,
        out_specs=pl.BlockSpec((1, H * W, Co), lambda bi: (bi, 0, 0)),
        compiler_params=pltpu.CompilerParams(dimension_semantics=("parallel",)),
    )(*inputs)


# =====================================================================================
# Fused time-embedding MLP (two matmuls + SiLU in one launch)
# =====================================================================================
def _time_mlp_kernel(t_ref, w1_ref, b1_ref, w2_ref, b2_ref, o_ref):
    h = jnp.dot(t_ref[...].astype(jnp.bfloat16), w1_ref[...].astype(jnp.bfloat16),
                preferred_element_type=jnp.float32) + b1_ref[...]
    h = h * jax.nn.sigmoid(h)
    o_ref[...] = jnp.dot(h.astype(jnp.bfloat16), w2_ref[...].astype(jnp.bfloat16),
                         preferred_element_type=jnp.float32) + b2_ref[...]


def time_mlp(temb, w1, b1, w2, b2):
    Bt = temb.shape[0]
    N = w2.shape[-1]
    return pl.pallas_call(
        _time_mlp_kernel,
        out_shape=jax.ShapeDtypeStruct((Bt, N), jnp.float32),
    )(temb, w1, b1.reshape(1, -1), w2, b2.reshape(1, -1))


# =====================================================================================
# Fused VAE sample + 0.18215 scale + DDPM add_noise (one elementwise launch)
# =====================================================================================
def _sample_add_noise_kernel(mean_ref, logvar_ref, eps_ref, noise_ref, a_ref, b_ref, o_ref):
    lv = jnp.clip(logvar_ref[...], -30.0, 20.0)
    std = jnp.exp(0.5 * lv)
    latents = (mean_ref[...] + std * eps_ref[...]) * SCALING_FACTOR
    o_ref[...] = a_ref[...] * latents + b_ref[...] * noise_ref[...]


def sample_and_add_noise(mean, logvar, eps, noise, sqrt_acp, sqrt_1macp):
    Bm, Nf = mean.shape
    return pl.pallas_call(
        _sample_add_noise_kernel,
        out_shape=jax.ShapeDtypeStruct((Bm, Nf), jnp.float32),
    )(mean, logvar, eps, noise,
      sqrt_acp.reshape(Bm, 1).astype(jnp.float32),
      sqrt_1macp.reshape(Bm, 1).astype(jnp.float32))


# =====================================================================================
# MSE reduction with SMEM scalar output, mean folded into the kernel
# =====================================================================================
def _mse_kernel(p_ref, n_ref, o_ref, *, inv_count):
    d = p_ref[...] - n_ref[...]
    o_ref[0, 0] = jnp.sum(d * d) * inv_count


def mse_loss(pred_flat, noise_flat):
    Bp, Nf = pred_flat.shape
    out = pl.pallas_call(
        functools.partial(_mse_kernel, inv_count=1.0 / (Bp * Nf)),
        out_shape=jax.ShapeDtypeStruct((1, 1), jnp.float32),
        out_specs=pl.BlockSpec(memory_space=pltpu.MemorySpace.SMEM),
    )(pred_flat, noise_flat)
    return out[0, 0]


# ---------------- sub-models (synthetic, structurally faithful) ----------------
def text_encoder(p, input_ids):
    # TODO(synk): real CLIPTextModel has 12 multi-head layers; this is 1 single-head block.
    Bi, S = input_ids.shape
    x = p["tok_emb"][input_ids] + p["pos_emb"][None]             # gather stays in XLA glue
    x2 = x.reshape(Bi * S, DP)
    # LN1 + fused QKV projection (one kernel, N = 3*128)
    qkv = fused_linear(x2, p["wqkv"], p["bqkv"], ln=(p["ln1_g"], p["ln1_b"]), ln_dim=TXT_D)
    attn = self_attention(qkv.reshape(Bi, S, 3 * DP), causal=True,
                          scale=1.0 / math.sqrt(TXT_D))
    # out-proj + residual (one kernel)
    x2 = fused_linear(attn.reshape(Bi * S, DP), p["wo"], p["bo"], residual=x2)
    # LN2 + FFN-1 + gelu (one kernel)
    hf = fused_linear(x2, p["w1"], p["b1"], ln=(p["ln2_g"], p["ln2_b"]),
                      ln_dim=TXT_D, activation="gelu")
    # FFN-2 + residual (one kernel)
    x2 = fused_linear(hf, p["w2"], p["b2"], residual=x2)
    # final LayerNorm (lnf) is fused into the UNet KV projection (its only consumer)
    return x2.reshape(Bi, S, DP)


def sinusoidal_timestep_embedding(t, dim):
    half = dim // 2
    freqs = jnp.exp(-math.log(10000.0) * jnp.arange(half, dtype=jnp.float32) / half)
    args = t.astype(jnp.float32)[:, None] * freqs[None, :]
    return jnp.concatenate([jnp.sin(args), jnp.cos(args)], axis=-1)


def unet(p, lnf, noisy_flat, timesteps, ehs_pre_ln):
    # TODO(synk): real UNet2DConditionModel has down/mid/up blocks, GroupNorm, multi-head attn.
    Bn = noisy_flat.shape[0]
    HW = LAT_HW * LAT_HW

    # time embedding MLP: both layers fused into one kernel
    temb = sinusoidal_timestep_embedding(timesteps, TIME_D)
    temb = jnp.pad(temb, ((0, 0), (0, DP - TIME_D)))
    temb = time_mlp(temb, p["t1_w"], p["t1_b"], p["t2_w"], p["t2_b"])        # (B, 128)

    # conv_in (3x3, pad=1) + temb add + silu, fused inside one Pallas kernel
    x_nhwc = noisy_flat.reshape(Bn, LAT_HW, LAT_HW, LAT_C)
    x_pad = jnp.pad(x_nhwc, ((0, 0), (1, 1), (1, 1), (0, DP - LAT_C)))
    h_tok = conv3x3(x_pad, p["conv_in_w9"], p["conv_in_b"], temb=temb,
                    activation="silu")                                        # (B, HW, 128)

    h2 = h_tok.reshape(Bn * HW, DP)
    q = fused_linear(h2, p["q_w"], p["q_b"]).reshape(Bn, HW, DP)
    # text final LN fused into the (fused) KV projection
    kv = fused_linear(ehs_pre_ln.reshape(Bn * SEQ, DP), p["kv_w"], p["kv_b"],
                      ln=lnf, ln_dim=TXT_D).reshape(Bn, SEQ, 2 * DP)
    attn = cross_attention(q, kv, scale=1.0 / math.sqrt(UNET_C))              # (B, HW, 128)
    # out-proj + residual + silu (one kernel)
    h3 = fused_linear(attn.reshape(Bn * HW, DP), p["o_w"], p["o_b"],
                      residual=h2, activation="silu")

    # conv_out (3x3, pad=1)
    h3_pad = jnp.pad(h3.reshape(Bn, LAT_HW, LAT_HW, DP), ((0, 0), (1, 1), (1, 1), (0, 0)))
    return conv3x3(h3_pad, p["conv_out_w9"], p["conv_out_b"])                 # (B, HW, 128)


def vae_encode_moments(p, pixel_values):
    # TODO(synk): real AutoencoderKL has multiple resnet/downsample blocks + GroupNorm.
    Bx = pixel_values.shape[0]
    # 4x4 stride-4 valid conv == space-to-depth reshape + matmul (no im2col materialization)
    patches = pixel_values.reshape(Bx, IMG_C, LAT_HW, 4, LAT_HW, 4)
    patches = patches.transpose(0, 2, 4, 1, 3, 5).reshape(Bx * LAT_HW * LAT_HW, IMG_C * 16)
    h = fused_linear(patches, p["conv1_w"], p["conv1_b"], activation="silu")  # (B*64, 128)
    # 1x1 conv == plain channel matmul
    moments = fused_linear(h, p["conv2_w"], p["conv2_b"])                      # (B*64, 128)
    mom = moments.reshape(Bx, LAT_HW * LAT_HW, DP)
    mean_flat = mom[:, :, 0:LAT_C].reshape(Bx, LAT_FLAT)
    logvar_flat = mom[:, :, LAT_C:2 * LAT_C].reshape(Bx, LAT_FLAT)
    return mean_flat, logvar_flat


def make_alphas_cumprod(num_steps=NUM_TRAIN_TIMESTEPS, beta_start=0.00085, beta_end=0.012):
    # DDPMScheduler with scaled_linear betas (Stable Diffusion defaults).
    betas = jnp.linspace(beta_start ** 0.5, beta_end ** 0.5, num_steps, dtype=jnp.float32) ** 2
    return jnp.cumprod(1.0 - betas)


# ---------------- pipeline forward (mirrors AzuremlStableDiffusionPipeline.forward) ----------------
def forward(params, input_ids, pixel_values, rng):
    k_eps, k_noise, k_t = jax.random.split(rng, 3)
    Bn = pixel_values.shape[0]

    # 1) latents = vae.encode(pixels).latent_dist.sample(); latents *= 0.18215
    mean_flat, logvar_flat = vae_encode_moments(params["vae"], pixel_values.astype(jnp.float32))
    eps = jax.random.normal(k_eps, mean_flat.shape, jnp.float32)
    # 2) noise, timesteps, add_noise   (sampling + scaling + add_noise fused in one kernel)
    noise_flat = jax.random.normal(k_noise, mean_flat.shape, jnp.float32)
    timesteps = jax.random.randint(k_t, (Bn,), 0, NUM_TRAIN_TIMESTEPS)
    acp = params["scheduler_alphas_cumprod"][timesteps]
    noisy_flat = sample_and_add_noise(mean_flat, logvar_flat, eps, noise_flat,
                                      jnp.sqrt(acp), jnp.sqrt(1.0 - acp))
    # 3) encoder_hidden_states = text_encoder(input_ids)[0]  (final LN fused into UNet KV proj)
    ehs_pre_ln = text_encoder(params["text"], input_ids)
    # 4) model_pred = unet(noisy_latents, timesteps, encoder_hidden_states).sample
    lnf = (params["text"]["lnf_g"], params["text"]["lnf_b"])
    pred_tok = unet(params["unet"], lnf, noisy_flat, timesteps, ehs_pre_ln)   # (B, HW, 128)
    pred_flat = pred_tok[:, :, 0:LAT_C].reshape(Bn, LAT_FLAT)
    # 5) loss = mse(model_pred, noise)
    loss = mse_loss(pred_flat, noise_flat)
    model_pred = pred_flat.reshape(Bn, LAT_HW, LAT_HW, LAT_C).transpose(0, 3, 1, 2)  # NCHW
    return loss, model_pred


# ---------------- deterministic parameter init (weights pre-padded, stored bf16) ----------------
def init_params(key):
    keys = iter(jax.random.split(key, 32))

    def nrm(shape, scale=0.02):
        return scale * jax.random.normal(next(keys), shape, jnp.float32)

    def padmat(m, rows=DP, cols=DP):
        return jnp.pad(m, ((0, rows - m.shape[0]), (0, cols - m.shape[1])))

    def bf16(m):
        return m.astype(jnp.bfloat16)

    def zeros(n):
        return jnp.zeros((n,), jnp.float32)

    def ln_gamma(d, dp=DP):
        return jnp.pad(jnp.ones((d,), jnp.float32), (0, dp - d))

    def conv9(w_oihw):
        O, I, KH, KW = w_oihw.shape
        w9 = w_oihw.transpose(2, 3, 1, 0).reshape(KH * KW, I, O)
        return bf16(jnp.pad(w9, ((0, 0), (0, DP - I), (0, DP - O))))

    vae = dict(
        conv1_w=bf16(jnp.pad(
            nrm((VAE_HID, IMG_C, 4, 4), 0.1).transpose(1, 2, 3, 0).reshape(IMG_C * 16, VAE_HID),
            ((0, 0), (0, DP - VAE_HID)))),
        conv1_b=zeros(DP),
        conv2_w=bf16(padmat(nrm((2 * LAT_C, VAE_HID, 1, 1), 0.1).reshape(2 * LAT_C, VAE_HID).T)),
        conv2_b=zeros(DP),
    )
    text = dict(
        tok_emb=jnp.pad(nrm((VOCAB, TXT_D)), ((0, 0), (0, DP - TXT_D))),
        pos_emb=jnp.pad(nrm((SEQ, TXT_D)), ((0, 0), (0, DP - TXT_D))),
        ln1_g=ln_gamma(TXT_D), ln1_b=zeros(DP),
        wqkv=bf16(jnp.concatenate([padmat(nrm((TXT_D, TXT_D))) for _ in range(3)], axis=1)),
        bqkv=zeros(3 * DP),
        wo=bf16(padmat(nrm((TXT_D, TXT_D)))), bo=zeros(DP),
        ln2_g=ln_gamma(TXT_D), ln2_b=zeros(DP),
        w1=bf16(jnp.pad(nrm((TXT_D, TXT_FF)), ((0, DP - TXT_D), (0, 0)))), b1=zeros(TXT_FF),
        w2=bf16(jnp.pad(nrm((TXT_FF, TXT_D)), ((0, 0), (0, DP - TXT_D)))), b2=zeros(DP),
        lnf_g=ln_gamma(TXT_D), lnf_b=zeros(DP),
    )
    unet_p = dict(
        t1_w=bf16(padmat(nrm((TIME_D, UNET_C)))), t1_b=zeros(DP),
        t2_w=bf16(padmat(nrm((UNET_C, UNET_C)))), t2_b=zeros(DP),
        conv_in_w9=conv9(nrm((UNET_C, LAT_C, 3, 3), 0.1)), conv_in_b=zeros(DP),
        q_w=bf16(padmat(nrm((UNET_C, UNET_C)))), q_b=zeros(DP),
        kv_w=bf16(jnp.concatenate([padmat(nrm((TXT_D, UNET_C))),
                                   padmat(nrm((TXT_D, UNET_C)))], axis=1)),
        kv_b=zeros(2 * DP),
        o_w=bf16(padmat(nrm((UNET_C, UNET_C)))), o_b=zeros(DP),
        conv_out_w9=conv9(nrm((LAT_C, UNET_C, 3, 3), 0.1)), conv_out_b=zeros(DP),
    )
    return dict(vae=vae, text=text, unet=unet_p,
                scheduler_alphas_cumprod=make_alphas_cumprod())


if __name__ == "__main__":
    key = jax.random.PRNGKey(0)
    k_px, k_ids, k_fwd = jax.random.split(key, 3)
    pixel_values = jax.random.normal(k_px, (B, IMG_C, IMG_HW, IMG_HW), jnp.float32)
    input_ids = jax.random.randint(k_ids, (B, SEQ), 0, VOCAB)
    params = init_params(jax.random.PRNGKey(42))

    loss, model_pred = jax.jit(forward)(params, input_ids, pixel_values, k_fwd)
    jax.block_until_ready((loss, model_pred))

    assert model_pred.shape == (B, LAT_C, LAT_HW, LAT_HW)
    assert bool(jnp.isfinite(loss))
    print("KERNEL_OK")
</pallas_src>

<mosaic_0001>
module attributes {stable_mosaic.version = 11 : i64} {
  func.func @_fused_linear_kernel(%arg0: i32, %arg1: i32, %arg2: memref<64x48xf32, #tpu.memory_space<vmem>>, %arg3: memref<48x128xbf16, #tpu.memory_space<vmem>>, %arg4: memref<1x128xf32, #tpu.memory_space<vmem>>, %arg5: memref<64x128xf32, #tpu.memory_space<vmem>>, %arg6: memref<64x128xf32, #tpu.memory_space<vmem>>) attributes {dimension_semantics = [#tpu.dimension_semantics<parallel>, #tpu.dimension_semantics<arbitrary>], iteration_bounds = array<i64: 2, 1>, scalar_prefetch = 0 : i64, scratch_operands = 1 : i64, tpu.core_type = #tpu.core_type<tc>, window_params = [{transform_indices = @transform_0, window_bounds = array<i64: 64, 48>}, {transform_indices = @transform_1, window_bounds = array<i64: 48, 128>}, {pipeline_mode = #tpu.pipeline_mode<synchronous>, transform_indices = @transform_2, window_bounds = array<i64: 1, 128>}, {transform_indices = @transform_3, window_bounds = array<i64: 64, 128>}]} {
    %c0_i32 = arith.constant 0 : i32
    %0 = arith.cmpi eq, %arg1, %c0_i32 : i32
    %1 = arith.extui %0 : i1 to i32
    %c0_i32_0 = arith.constant 0 : i32
    %2 = arith.cmpi ne, %1, %c0_i32_0 : i32
    scf.if %2 {
      %cst_10 = arith.constant 0.000000e+00 : f32
      %13 = vector.broadcast %cst_10 : f32 to vector<64x128xf32>
      %c0_11 = arith.constant 0 : index
      %c0_12 = arith.constant 0 : index
      %14 = vector.load %arg6[%c0_11, %c0_12] : memref<64x128xf32, #tpu.memory_space<vmem>>, vector<64x128xf32>
      tpu.vector_store %arg6[%c0_11, %c0_12], %13 {strides = array<i32>} : memref<64x128xf32, #tpu.memory_space<vmem>>, vector<64x128xf32>,
    } else {
    }
    %c0 = arith.constant 0 : index
    %c0_1 = arith.constant 0 : index
    %3 = vector.load %arg2[%c0, %c0_1] : memref<64x48xf32, #tpu.memory_space<vmem>>, vector<64x48xf32>
    %c0_2 = arith.constant 0 : index
    %c0_3 = arith.constant 0 : index
    %4 = vector.load %arg6[%c0_2, %c0_3] : memref<64x128xf32, #tpu.memory_space<vmem>>, vector<64x128xf32>
    %5 = arith.truncf %3 : vector<64x48xf32> to vector<64x48xbf16>
    %c0_4 = arith.constant 0 : index
    %c0_5 = arith.constant 0 : index
    %6 = vector.load %arg3[%c0_4, %c0_5] : memref<48x128xbf16, #tpu.memory_space<vmem>>, vector<48x128xbf16>
    %cst = arith.constant dense<0.000000e+00> : vector<64x128xf32>
    %7 = tpu.matmul %5, %6, %cst {dimension_numbers = #tpu.dot_dimension_numbers<[1], [0], [0], [1], [0, 0, 1, 1], [], []>} : vector<64x48xbf16>, vector<48x128xbf16>, vector<64x128xf32> -> vector<64x128xf32>
    %8 = arith.addf %4, %7 : vector<64x128xf32>
    %c0_6 = arith.constant 0 : index
    %c0_7 = arith.constant 0 : index
    %9 = vector.load %arg6[%c0_6, %c0_7] : memref<64x128xf32, #tpu.memory_space<vmem>>, vector<64x128xf32>
    tpu.vector_store %arg6[%c0_6, %c0_7], %8 {strides = array<i32>} : memref<64x128xf32, #tpu.memory_space<vmem>>, vector<64x128xf32>,
    %c0_i32_8 = arith.constant 0 : i32
    %10 = arith.cmpi eq, %arg1, %c0_i32_8 : i32
    %11 = arith.extui %10 : i1 to i32
    %c0_i32_9 = arith.constant 0 : i32
    %12 = arith.cmpi ne, %11, %c0_i32_9 : i32
    scf.if %12 {
      %c0_10 = arith.constant 0 : index
      %c0_11 = arith.constant 0 : index
      %13 = vector.load %arg6[%c0_10, %c0_11] : memref<64x128xf32, #tpu.memory_space<vmem>>, vector<64x128xf32>
      %c0_12 = arith.constant 0 : index
      %c0_13 = arith.constant 0 : index
      %14 = vector.load %arg4[%c0_12, %c0_13] : memref<1x128xf32, #tpu.memory_space<vmem>>, vector<1x128xf32>
      %15 = vector.broadcast %14 : vector<1x128xf32> to vector<64x128xf32>
      %16 = arith.addf %13, %15 : vector<64x128xf32>
      %17 = arith.negf %16 : vector<64x128xf32>
      %18 = math.exp %17 : vector<64x128xf32>
      %cst_14 = arith.constant 1.000000e+00 : f32
      %19 = vector.broadcast %cst_14 : f32 to vector<64x128xf32>
      %20 = arith.addf %19, %18 : vector<64x128xf32>
      %21 = arith.divf %19, %20 : vector<64x128xf32>
      %22 = arith.mulf %16, %21 : vector<64x128xf32>
      %c0_15 = arith.constant 0 : index
      %c0_16 = arith.constant 0 : index
      %23 = vector.load %arg5[%c0_15, %c0_16] : memref<64x128xf32, #tpu.memory_space<vmem>>, vector<64x128xf32>
      tpu.vector_store %arg5[%c0_15, %c0_16], %22 {strides = array<i32>} : memref<64x128xf32, #tpu.memory_space<vmem>>, vector<64x128xf32>,
    } else {
    }
    return
  }
  func.func @transform_0(%arg0: i32, %arg1: i32) -> (i32, i32) {
    %c0_i32 = arith.constant 0 : i32
    return %arg0, %arg1 : i32, i32
  }
  func.func @transform_1(%arg0: i32, %arg1: i32) -> (i32, i32) {
    %c0_i32 = arith.constant 0 : i32
    %c0_i32_0 = arith.constant 0 : i32
    return %arg1, %c0_i32 : i32, i32
  }
  func.func @transform_2(%arg0: i32, %arg1: i32) -> (i32, i32) {
    %c0_i32 = arith.constant 0 : i32
    %c0_i32_0 = arith.constant 0 : i32
    %c0_i32_1 = arith.constant 0 : i32
    return %c0_i32, %c0_i32_0 : i32, i32
  }
  func.func @transform_3(%arg0: i32, %arg1: i32) -> (i32, i32) {
    %c0_i32 = arith.constant 0 : i32
    %c0_i32_0 = arith.constant 0 : i32
    return %arg0, %c0_i32 : i32, i32
  }
}

module attributes {stable_mosaic.version = 11 : i64} {
  func.func @_fused_linear_kernel(%arg0: i32, %arg1: i32, %arg2: memref<64x128xf32, #tpu.memory_space<vmem>>, %arg3: memref<128x128xbf16, #tpu.memory_space<vmem>>, %arg4: memref<1x128xf32, #tpu.memory_space<vmem>>, %arg5: memref<64x128xf32, #tpu.memory_space<vmem>>, %arg6: memref<64x128xf32, #tpu.memory_space<vmem>>) attributes {dimension_semantics = [#tpu.dimension_semantics<parallel>, #tpu.dimension_semantics<arbitrary>], iteration_bounds = array<i64: 2, 1>, scalar_prefetch = 0 : i64, scratch_operands = 1 : i64, tpu.core_type = #tpu.core_type<tc>, window_params = [{transform_indices = @transform_0, window_bounds = array<i64: 64, 128>}, {transform_indices = @transform_1, window_bounds = array<i64: 128, 128>}, {pipeline_mode = #tpu.pipeline_mode<synchronous>, transform_indices = @transform_2, window_bounds = array<i64: 1, 128>}, {transform_indices = @transform_3, window_bounds = array<i64: 64, 128>}]} {
    %c0_i32 = arith.constant 0 : i32
    %0 = arith.cmpi eq, %arg1, %c0_i32 : i32
    %1 = arith.extui %0 : i1 to i32
    %c0_i32_0 = arith.constant 0 : i32
    %2 = arith.cmpi ne, %1, %c0_i32_0 : i32
    scf.if %2 {
      %cst_10 = arith.constant 0.000000e+00 : f32
      %13 = vector.broadcast %cst_10 : f32 to vector<64x128xf32>
      %c0_11 = arith.constant 0 : index
      %c0_12 = arith.constant 0 : index
      %14 = vector.load %arg6[%c0_11, %c0_12] : memref<64x128xf32, #tpu.memory_space<vmem>>, vector<64x128xf32>
      tpu.vector_store %arg6[%c0_11, %c0_12], %13 {strides = array<i32>} : memref<64x128xf32, #tpu.memory_space<vmem>>, vector<64x128xf32>,
    } else {
    }
    %c0 = arith.constant 0 : index
    %c0_1 = arith.constant 0 : index
    %3 = vector.load %arg2[%c0, %c0_1] : memref<64x128xf32, #tpu.memory_space<vmem>>, vector<64x128xf32>
    %c0_2 = arith.constant 0 : index
    %c0_3 = arith.constant 0 : index
    %4 = vector.load %arg6[%c0_2, %c0_3] : memref<64x128xf32, #tpu.memory_space<vmem>>, vector<64x128xf32>
    %5 = arith.truncf %3 : vector<64x128xf32> to vector<64x128xbf16>
    %c0_4 = arith.constant 0 : index
    %c0_5 = arith.constant 0 : index
    %6 = vector.load %arg3[%c0_4, %c0_5] : memref<128x128xbf16, #tpu.memory_space<vmem>>, vector<128x128xbf16>
    %cst = arith.constant dense<0.000000e+00> : vector<64x128xf32>
    %7 = tpu.matmul %5, %6, %cst {dimension_numbers = #tpu.dot_dimension_numbers<[1], [0], [0], [1], [0, 0, 1, 1], [], []>} : vector<64x128xbf16>, vector<128x128xbf16>, vector<64x128xf32> -> vector<64x128xf32>
    %8 = arith.addf %4, %7 : vector<64x128xf32>
    %c0_6 = arith.constant 0 : index
    %c0_7 = arith.constant 0 : index
    %9 = vector.load %arg6[%c0_6, %c0_7] : memref<64x128xf32, #tpu.memory_space<vmem>>, vector<64x128xf32>
    tpu.vector_store %arg6[%c0_6, %c0_7], %8 {strides = array<i32>} : memref<64x128xf32, #tpu.memory_space<vmem>>, vector<64x128xf32>,
    %c0_i32_8 = arith.constant 0 : i32
    %10 = arith.cmpi eq, %arg1, %c0_i32_8 : i32
    %11 = arith.extui %10 : i1 to i32
    %c0_i32_9 = arith.constant 0 : i32
    %12 = arith.cmpi ne, %11, %c0_i32_9 : i32
    scf.if %12 {
      %c0_10 = arith.constant 0 : index
      %c0_11 = arith.constant 0 : index
      %13 = vector.load %arg6[%c0_10, %c0_11] : memref<64x128xf32, #tpu.memory_space<vmem>>, vector<64x128xf32>
      %c0_12 = arith.constant 0 : index
      %c0_13 = arith.constant 0 : index
      %14 = vector.load %arg4[%c0_12, %c0_13] : memref<1x128xf32, #tpu.memory_space<vmem>>, vector<1x128xf32>
      %15 = vector.broadcast %14 : vector<1x128xf32> to vector<64x128xf32>
      %16 = arith.addf %13, %15 : vector<64x128xf32>
      %c0_14 = arith.constant 0 : index
      %c0_15 = arith.constant 0 : index
      %17 = vector.load %arg5[%c0_14, %c0_15] : memref<64x128xf32, #tpu.memory_space<vmem>>, vector<64x128xf32>
      tpu.vector_store %arg5[%c0_14, %c0_15], %16 {strides = array<i32>} : memref<64x128xf32, #tpu.memory_space<vmem>>, vector<64x128xf32>,
    } else {
    }
    return
  }
  func.func @transform_0(%arg0: i32, %arg1: i32) -> (i32, i32) {
    %c0_i32 = arith.constant 0 : i32
    return %arg0, %arg1 : i32, i32
  }
  func.func @transform_1(%arg0: i32, %arg1: i32) -> (i32, i32) {
    %c0_i32 = arith.constant 0 : i32
    %c0_i32_0 = arith.constant 0 : i32
    return %arg1, %c0_i32 : i32, i32
  }
  func.func @transform_2(%arg0: i32, %arg1: i32) -> (i32, i32) {
    %c0_i32 = arith.constant 0 : i32
    %c0_i32_0 = arith.constant 0 : i32
    %c0_i32_1 = arith.constant 0 : i32
    return %c0_i32, %c0_i32_0 : i32, i32
  }
  func.func @transform_3(%arg0: i32, %arg1: i32) -> (i32, i32) {
    %c0_i32 = arith.constant 0 : i32
    %c0_i32_0 = arith.constant 0 : i32
    return %arg0, %c0_i32 : i32, i32
  }
}

module attributes {stable_mosaic.version = 11 : i64} {
  func.func @_time_mlp_kernel(%arg0: memref<2x128xf32, #tpu.memory_space<vmem>>, %arg1: memref<128x128xbf16, #tpu.memory_space<vmem>>, %arg2: memref<1x128xf32, #tpu.memory_space<vmem>>, %arg3: memref<128x128xbf16, #tpu.memory_space<vmem>>, %arg4: memref<1x128xf32, #tpu.memory_space<vmem>>, %arg5: memref<2x128xf32, #tpu.memory_space<vmem>>) attributes {dimension_semantics = [], scalar_prefetch = 0 : i64, scratch_operands = 0 : i64, tpu.core_type = #tpu.core_type<tc>} {
    %c0 = arith.constant 0 : index
    %c0_0 = arith.constant 0 : index
    %0 = vector.load %arg0[%c0, %c0_0] : memref<2x128xf32, #tpu.memory_space<vmem>>, vector<2x128xf32>
    %1 = arith.truncf %0 : vector<2x128xf32> to vector<2x128xbf16>
    %c0_1 = arith.constant 0 : index
    %c0_2 = arith.constant 0 : index
    %2 = vector.load %arg1[%c0_1, %c0_2] : memref<128x128xbf16, #tpu.memory_space<vmem>>, vector<128x128xbf16>
    %cst = arith.constant dense<0.000000e+00> : vector<2x128xf32>
    %3 = tpu.matmul %1, %2, %cst {dimension_numbers = #tpu.dot_dimension_numbers<[1], [0], [0], [1], [0, 0, 1, 1], [], []>} : vector<2x128xbf16>, vector<128x128xbf16>, vector<2x128xf32> -> vector<2x128xf32>
    %c0_3 = arith.constant 0 : index
    %c0_4 = arith.constant 0 : index
    %4 = vector.load %arg2[%c0_3, %c0_4] : memref<1x128xf32, #tpu.memory_space<vmem>>, vector<1x128xf32>
    %5 = vector.broadcast %4 : vector<1x128xf32> to vector<2x128xf32>
    %6 = arith.addf %3, %5 : vector<2x128xf32>
    %7 = arith.negf %6 : vector<2x128xf32>
    %8 = math.exp %7 : vector<2x128xf32>
    %cst_5 = arith.constant 1.000000e+00 : f32
    %9 = vector.broadcast %cst_5 : f32 to vector<2x128xf32>
    %10 = arith.addf %9, %8 : vector<2x128xf32>
    %11 = arith.divf %9, %10 : vector<2x128xf32>
    %12 = arith.mulf %6, %11 : vector<2x128xf32>
    %13 = arith.truncf %12 : vector<2x128xf32> to vector<2x128xbf16>
    %c0_6 = arith.constant 0 : index
    %c0_7 = arith.constant 0 : index
    %14 = vector.load %arg3[%c0_6, %c0_7] : memref<128x128xbf16, #tpu.memory_space<vmem>>, vector<128x128xbf16>
    %cst_8 = arith.constant dense<0.000000e+00> : vector<2x128xf32>
    %15 = tpu.matmul %13, %14, %cst_8 {dimension_numbers = #tpu.dot_dimension_numbers<[1], [0], [0], [1], [0, 0, 1, 1], [], []>} : vector<2x128xbf16>, vector<128x128xbf16>, vector<2x128xf32> -> vector<2x128xf32>
    %c0_9 = arith.constant 0 : index
    %c0_10 = arith.constant 0 : index
    %16 = vector.load %arg4[%c0_9, %c0_10] : memref<1x128xf32, #tpu.memory_space<vmem>>, vector<1x128xf32>
    %17 = vector.broadcast %16 : vector<1x128xf32> to vector<2x128xf32>
    %18 = arith.addf %15, %17 : vector<2x128xf32>
    %c0_11 = arith.constant 0 : index
    %c0_12 = arith.constant 0 : index
    %19 = vector.load %arg5[%c0_11, %c0_12] : memref<2x128xf32, #tpu.memory_space<vmem>>, vector<2x128xf32>
    tpu.vector_store %arg5[%c0_11, %c0_12], %18 {strides = array<i32>} : memref<2x128xf32, #tpu.memory_space<vmem>>, vector<2x128xf32>,
    return
  }
}

module attributes {stable_mosaic.version = 11 : i64} {
  func.func @_sample_add_noise_kernel(%arg0: memref<2x256xf32, #tpu.memory_space<vmem>>, %arg1: memref<2x256xf32, #tpu.memory_space<vmem>>, %arg2: memref<2x256xf32, #tpu.memory_space<vmem>>, %arg3: memref<2x256xf32, #tpu.memory_space<vmem>>, %arg4: memref<2x1xf32, #tpu.memory_space<vmem>>, %arg5: memref<2x1xf32, #tpu.memory_space<vmem>>, %arg6: memref<2x256xf32, #tpu.memory_space<vmem>>) attributes {dimension_semantics = [], scalar_prefetch = 0 : i64, scratch_operands = 0 : i64, tpu.core_type = #tpu.core_type<tc>} {
    %c0 = arith.constant 0 : index
    %c0_0 = arith.constant 0 : index
    %0 = vector.load %arg1[%c0, %c0_0] : memref<2x256xf32, #tpu.memory_space<vmem>>, vector<2x256xf32>
    %cst = arith.constant -3.000000e+01 : f32
    %cst_1 = arith.constant 2.000000e+01 : f32
    %1 = vector.broadcast %cst : f32 to vector<2x256xf32>
    %2 = arith.maximumf %1, %0 : vector<2x256xf32>
    %3 = vector.broadcast %cst_1 : f32 to vector<2x256xf32>
    %4 = arith.minimumf %3, %2 : vector<2x256xf32>
    %cst_2 = arith.constant 5.000000e-01 : f32
    %5 = vector.broadcast %cst_2 : f32 to vector<2x256xf32>
    %6 = arith.mulf %5, %4 : vector<2x256xf32>
    %7 = math.exp %6 : vector<2x256xf32>
    %c0_3 = arith.constant 0 : index
    %c0_4 = arith.constant 0 : index
    %8 = vector.load %arg0[%c0_3, %c0_4] : memref<2x256xf32, #tpu.memory_space<vmem>>, vector<2x256xf32>
    %c0_5 = arith.constant 0 : index
    %c0_6 = arith.constant 0 : index
    %9 = vector.load %arg2[%c0_5, %c0_6] : memref<2x256xf32, #tpu.memory_space<vmem>>, vector<2x256xf32>
    %10 = arith.mulf %7, %9 : vector<2x256xf32>
    %11 = arith.addf %8, %10 : vector<2x256xf32>
    %cst_7 = arith.constant 1.821500e-01 : f32
    %12 = vector.broadcast %cst_7 : f32 to vector<2x256xf32>
    %13 = arith.mulf %11, %12 : vector<2x256xf32>
    %c0_8 = arith.constant 0 : index
    %c0_9 = arith.constant 0 : index
    %14 = vector.load %arg4[%c0_8, %c0_9] : memref<2x1xf32, #tpu.memory_space<vmem>>, vector<2x1xf32>
    %15 = vector.broadcast %14 : vector<2x1xf32> to vector<2x256xf32>
    %16 = arith.mulf %15, %13 : vector<2x256xf32>
    %c0_10 = arith.constant 0 : index
    %c0_11 = arith.constant 0 : index
    %17 = vector.load %arg5[%c0_10, %c0_11] : memref<2x1xf32, #tpu.memory_space<vmem>>, vector<2x1xf32>
    %c0_12 = arith.constant 0 : index
    %c0_13 = arith.constant 0 : index
    %18 = vector.load %arg3[%c0_12, %c0_13] : memref<2x256xf32, #tpu.memory_space<vmem>>, vector<2x256xf32>
    %19 = vector.broadcast %17 : vector<2x1xf32> to vector<2x256xf32>
    %20 = arith.mulf %19, %18 : vector<2x256xf32>
    %21 = arith.addf %16, %20 : vector<2x256xf32>
    %c0_14 = arith.constant 0 : index
    %c0_15 = arith.constant 0 : index
    %22 = vector.load %arg6[%c0_14, %c0_15] : memref<2x256xf32, #tpu.memory_space<vmem>>, vector<2x256xf32>
    tpu.vector_store %arg6[%c0_14, %c0_15], %21 {strides = array<i32>} : memref<2x256xf32, #tpu.memory_space<vmem>>, vector<2x256xf32>,
    return
  }
}

module attributes {stable_mosaic.version = 11 : i64} {
  func.func @_conv3x3_kernel(%arg0: i32, %arg1: memref<1x10x10x128xf32, #tpu.memory_space<vmem>>, %arg2: memref<9x128x128xbf16, #tpu.memory_space<vmem>>, %arg3: memref<1x128xf32, #tpu.memory_space<vmem>>, %arg4: memref<1x1x128xf32, #tpu.memory_space<vmem>>, %arg5: memref<1x64x128xf32, #tpu.memory_space<vmem>>) attributes {dimension_semantics = [#tpu.dimension_semantics<parallel>], iteration_bounds = array<i64: 2>, scalar_prefetch = 0 : i64, scratch_operands = 0 : i64, tpu.core_type = #tpu.core_type<tc>, window_params = [{transform_indices = @transform_0, window_bounds = array<i64: 1, 10, 10, 128>}, {pipeline_mode = #tpu.pipeline_mode<synchronous>, transform_indices = @transform_1, window_bounds = array<i64: 9, 128, 128>}, {pipeline_mode = #tpu.pipeline_mode<synchronous>, transform_indices = @transform_2, window_bounds = array<i64: 1, 128>}, {transform_indices = @transform_3, window_bounds = array<i64: 1, 1, 128>}, {transform_indices = @transform_4, window_bounds = array<i64: 1, 64, 128>}]} {
    %cst = arith.constant 0.000000e+00 : f32
    %0 = vector.broadcast %cst : f32 to vector<64x128xf32>
    %c0 = arith.constant 0 : index
    %c0_0 = arith.constant 0 : index
    %c0_1 = arith.constant 0 : index
    %c0_2 = arith.constant 0 : index
    %1 = vector.load %arg1[%c0, %c0_0, %c0_1, %c0_2] : memref<1x10x10x128xf32, #tpu.memory_space<vmem>>, vector<1x8x8x128xf32>
    %2 = vector.shape_cast %1 : vector<1x8x8x128xf32> to vector<8x8x128xf32>
    %3 = vector.shape_cast %2 : vector<8x8x128xf32> to vector<64x128xf32>
    %4 = arith.truncf %3 : vector<64x128xf32> to vector<64x128xbf16>
    %c0_3 = arith.constant 0 : index
    %c0_4 = arith.constant 0 : index
    %c0_5 = arith.constant 0 : index
    %5 = vector.load %arg2[%c0_3, %c0_4, %c0_5] : memref<9x128x128xbf16, #tpu.memory_space<vmem>>, vector<1x128x128xbf16>
    %6 = vector.shape_cast %5 : vector<1x128x128xbf16> to vector<128x128xbf16>
    %cst_6 = arith.constant dense<0.000000e+00> : vector<64x128xf32>
    %7 = tpu.matmul %4, %6, %cst_6 {dimension_numbers = #tpu.dot_dimension_numbers<[1], [0], [0], [1], [0, 0, 1, 1], [], []>} : vector<64x128xbf16>, vector<128x128xbf16>, vector<64x128xf32> -> vector<64x128xf32>
    %8 = arith.addf %0, %7 : vector<64x128xf32>
    %c0_7 = arith.constant 0 : index
    %c0_8 = arith.constant 0 : index
    %c1 = arith.constant 1 : index
    %c0_9 = arith.constant 0 : index
    %9 = vector.load %arg1[%c0_7, %c0_8, %c1, %c0_9] : memref<1x10x10x128xf32, #tpu.memory_space<vmem>>, vector<1x8x8x128xf32>
    %10 = vector.shape_cast %9 : vector<1x8x8x128xf32> to vector<8x8x128xf32>
    %11 = vector.shape_cast %10 : vector<8x8x128xf32> to vector<64x128xf32>
    %12 = arith.truncf %11 : vector<64x128xf32> to vector<64x128xbf16>
    %c1_10 = arith.constant 1 : index
    %c0_11 = arith.constant 0 : index
    %c0_12 = arith.constant 0 : index
    %13 = vector.load %arg2[%c1_10, %c0_11, %c0_12] : memref<9x128x128xbf16, #tpu.memory_space<vmem>>, vector<1x128x128xbf16>
    %14 = vector.shape_cast %13 : vector<1x128x128xbf16> to vector<128x128xbf16>
    %cst_13 = arith.constant dense<0.000000e+00> : vector<64x128xf32>
    %15 = tpu.matmul %12, %14, %cst_13 {dimension_numbers = #tpu.dot_dimension_numbers<[1], [0], [0], [1], [0, 0, 1, 1], [], []>} : vector<64x128xbf16>, vector<128x128xbf16>, vector<64x128xf32> -> vector<64x128xf32>
    %16 = arith.addf %8, %15 : vector<64x128xf32>
    %c0_14 = arith.constant 0 : index
    %c0_15 = arith.constant 0 : index
    %c2 = arith.constant 2 : index
    %c0_16 = arith.constant 0 : index
    %17 = vector.load %arg1[%c0_14, %c0_15, %c2, %c0_16] : memref<1x10x10x128xf32, #tpu.memory_space<vmem>>, vector<1x8x8x128xf32>
    %18 = vector.shape_cast %17 : vector<1x8x8x128xf32> to vector<8x8x128xf32>
    %19 = vector.shape_cast %18 : vector<8x8x128xf32> to vector<64x128xf32>
    %20 = arith.truncf %19 : vector<64x128xf32> to vector<64x128xbf16>
    %c2_17 = arith.constant 2 : index
    %c0_18 = arith.constant 0 : index
    %c0_19 = arith.constant 0 : index
    %21 = vector.load %arg2[%c2_17, %c0_18, %c0_19] : memref<9x128x128xbf16, #tpu.memory_space<vmem>>, vector<1x128x128xbf16>
    %22 = vector.shape_cast %21 : vector<1x128x128xbf16> to vector<128x128xbf16>
    %cst_20 = arith.constant dense<0.000000e+00> : vector<64x128xf32>
    %23 = tpu.matmul %20, %22, %cst_20 {dimension_numbers = #tpu.dot_dimension_numbers<[1], [0], [0], [1], [0, 0, 1, 1], [], []>} : vector<64x128xbf16>, vector<128x128xbf16>, vector<64x128xf32> -> vector<64x128xf32>
    %24 = arith.addf %16, %23 : vector<64x128xf32>
    %c0_21 = arith.constant 0 : index
    %c1_22 = arith.constant 1 : index
    %c0_23 = arith.constant 0 : index
    %c0_24 = arith.constant 0 : index
    %25 = vector.load %arg1[%c0_21, %c1_22, %c0_23, %c0_24] : memref<1x10x10x128xf32, #tpu.memory_space<vmem>>, vector<1x8x8x128xf32>
    %26 = vector.shape_cast %25 : vector<1x8x8x128xf32> to vector<8x8x128xf32>
    %27 = vector.shape_cast %26 : vector<8x8x128xf32> to vector<64x128xf32>
    %28 = arith.truncf %27 : vector<64x128xf32> to vector<64x128xbf16>
    %c3 = arith.constant 3 : index
    %c0_25 = arith.constant 0 : index
    %c0_26 = arith.constant 0 : index
    %29 = vector.load %arg2[%c3, %c0_25, %c0_26] : memref<9x128x128xbf16, #tpu.memory_space<vmem>>, vector<1x128x128xbf16>
    %30 = vector.shape_cast %29 : vector<1x128x128xbf16> to vector<128x128xbf16>
    %cst_27 = arith.constant dense<0.000000e+00> : vector<64x128xf32>
    %31 = tpu.matmul %28, %30, %cst_27 {dimension_numbers = #tpu.dot_dimension_numbers<[1], [0], [0], [1], [0, 0, 1, 1], [], []>} : vector<64x128xbf16>, vector<128x128xbf16>, vector<64x128xf32> -> vector<64x128xf32>
    %32 = arith.addf %24, %31 : vector<64x128xf32>
    %c0_28 = arith.constant 0 : index
    %c1_29 = arith.constant 1 : index
    %c1_30 = arith.constant 1 : index
    %c0_31 = arith.constant 0 : index
    %33 = vector.load %arg1[%c0_28, %c1_29, %c1_30, %c0_31] : memref<1x10x10x128xf32, #tpu.memory_space<vmem>>, vector<1x8x8x128xf32>
    %34 = vector.shape_cast %33 : vector<1x8x8x128xf32> to vector<8x8x128xf32>
    %35 = vector.shape_cast %34 : vector<8x8x128xf32> to vector<64x128xf32>
    %36 = arith.truncf %35 : vector<64x128xf32> to vector<64x128xbf16>
    %c4 = arith.constant 4 : index
    %c0_32 = arith.constant 0 : index
    %c0_33 = arith.constant 0 : index
    %37 = vector.load %arg2[%c4, %c0_32, %c0_33] : memref<9x128x128xbf16, #tpu.memory_space<vmem>>, vector<1x128x128xbf16>
    %38 = vector.shape_cast %37 : vector<1x128x128xbf16> to vector<128x128xbf16>
    %cst_34 = arith.constant dense<0.000000e+00> : vector<64x128xf32>
    %39 = tpu.matmul %36, %38, %cst_34 {dimension_numbers = #tpu.dot_dimension_numbers<[1], [0], [0], [1], [0, 0, 1, 1], [], []>} : vector<64x128xbf16>, vector<128x128xbf16>, vector<64x128xf32> -> vector<64x128xf32>
    %40 = arith.addf %32, %39 : vector<64x128xf32>
    %c0_35 = arith.constant 0 : index
    %c1_36 = arith.constant 1 : index
    %c2_37 = arith.constant 2 : index
    %c0_38 = arith.constant 0 : index
    %41 = vector.load %arg1[%c0_35, %c1_36, %c2_37, %c0_38] : memref<1x10x10x128xf32, #tpu.memory_space<vmem>>, vector<1x8x8x128xf32>
    %42 = vector.shape_cast %41 : vector<1x8x8x128xf32> to vector<8x8x128xf32>
    %43 = vector.shape_cast %42 : vector<8x8x128xf32> to vector<64x128xf32>
    %44 = arith.truncf %43 : vector<64x128xf32> to vector<64x128xbf16>
    %c5 = arith.constant 5 : index
    %c0_39 = arith.constant 0 : index
    %c0_40 = arith.constant 0 : index
    %45 = vector.load %arg2[%c5, %c0_39, %c0_40] : memref<9x128x128xbf16, #tpu.memory_space<vmem>>, vector<1x128x128xbf16>
    %46 = vector.shape_cast %45 : vector<1x128x128xbf16> to vector<128x128xbf16>
    %cst_41 = arith.constant dense<0.000000e+00> : vector<64x128xf32>
    %47 = tpu.matmul %44, %46, %cst_41 {dimension_numbers = #tpu.dot_dimension_numbers<[1], [0], [0], [1], [0, 0, 1, 1], [], []>} : vector<64x128xbf16>, vector<128x128xbf16>, vector<64x128xf32> -> vector<64x128xf32>
    %48 = arith.addf %40, %47 : vector<64x128xf32>
    %c0_42 = arith.constant 0 : index
    %c2_43 = arith.constant 2 : index
    %c0_44 = arith.constant 0 : index
    %c0_45 = arith.constant 0 : index
    %49 = vector.load %arg1[%c0_42, %c2_43, %c0_44, %c0_45] : memref<1x10x10x128xf32, #tpu.memory_space<vmem>>, vector<1x8x8x128xf32>
    %50 = vector.shape_cast %49 : vector<1x8x8x128xf32> to vector<8x8x128xf32>
    %51 = vector.shape_cast %50 : vector<8x8x128xf32> to vector<64x128xf32>
    %52 = arith.truncf %51 : vector<64x128xf32> to vector<64x128xbf16>
    %c6 = arith.constant 6 : index
    %c0_46 = arith.constant 0 : index
    %c0_47 = arith.constant 0 : index
    %53 = vector.load %arg2[%c6, %c0_46, %c0_47] : memref<9x128x128xbf16, #tpu.memory_space<vmem>>, vector<1x128x128xbf16>
    %54 = vector.shape_cast %53 : vector<1x128x128xbf16> to vector<128x128xbf16>
    %cst_48 = arith.constant dense<0.000000e+00> : vector<64x128xf32>
    %55 = tpu.matmul %52, %54, %cst_48 {dimension_numbers = #tpu.dot_dimension_numbers<[1], [0], [0], [1], [0, 0, 1, 1], [], []>} : vector<64x128xbf16>, vector<128x128xbf16>, vector<64x128xf32> -> vector<64x128xf32>
    %56 = arith.addf %48, %55 : vector<64x128xf32>
    %c0_49 = arith.constant 0 : index
    %c2_50 = arith.constant 2 : index
    %c1_51 = arith.constant 1 : index
    %c0_52 = arith.constant 0 : index
    %57 = vector.load %arg1[%c0_49, %c2_50, %c1_51, %c0_52] : memref<1x10x10x128xf32, #tpu.memory_space<vmem>>, vector<1x8x8x128xf32>
    %58 = vector.shape_cast %57 : vector<1x8x8x128xf32> to vector<8x8x128xf32>
    %59 = vector.shape_cast %58 : vector<8x8x128xf32> to vector<64x128xf32>
    %60 = arith.truncf %59 : vector<64x128xf32> to vector<64x128xbf16>
    %c7 = arith.constant 7 : index
    %c0_53 = arith.constant 0 : index
    %c0_54 = arith.constant 0 : index
    %61 = vector.load %arg2[%c7, %c0_53, %c0_54] : memref<9x128x128xbf16, #tpu.memory_space<vmem>>, vector<1x128x128xbf16>
    %62 = vector.shape_cast %61 : vector<1x128x128xbf16> to vector<128x128xbf16>
    %cst_55 = arith.constant dense<0.000000e+00> : vector<64x128xf32>
    %63 = tpu.matmul %60, %62, %cst_55 {dimension_numbers = #tpu.dot_dimension_numbers<[1], [0], [0], [1], [0, 0, 1, 1], [], []>} : vector<64x128xbf16>, vector<128x128xbf16>, vector<64x128xf32> -> vector<64x128xf32>
    %64 = arith.addf %56, %63 : vector<64x128xf32>
    %c0_56 = arith.constant 0 : index
    %c2_57 = arith.constant 2 : index
    %c2_58 = arith.constant 2 : index
    %c0_59 = arith.constant 0 : index
    %65 = vector.load %arg1[%c0_56, %c2_57, %c2_58, %c0_59] : memref<1x10x10x128xf32, #tpu.memory_space<vmem>>, vector<1x8x8x128xf32>
    %66 = vector.shape_cast %65 : vector<1x8x8x128xf32> to vector<8x8x128xf32>
    %67 = vector.shape_cast %66 : vector<8x8x128xf32> to vector<64x128xf32>
    %68 = arith.truncf %67 : vector<64x128xf32> to vector<64x128xbf16>
    %c8 = arith.constant 8 : index
    %c0_60 = arith.constant 0 : index
    %c0_61 = arith.constant 0 : index
    %69 = vector.load %arg2[%c8, %c0_60, %c0_61] : memref<9x128x128xbf16, #tpu.memory_space<vmem>>, vector<1x128x128xbf16>
    %70 = vector.shape_cast %69 : vector<1x128x128xbf16> to vector<128x128xbf16>
    %cst_62 = arith.constant dense<0.000000e+00> : vector<64x128xf32>
    %71 = tpu.matmul %68, %70, %cst_62 {dimension_numbers = #tpu.dot_dimension_numbers<[1], [0], [0], [1], [0, 0, 1, 1], [], []>} : vector<64x128xbf16>, vector<128x128xbf16>, vector<64x128xf32> -> vector<64x128xf32>
    %72 = arith.addf %64, %71 : vector<64x128xf32>
    %c0_63 = arith.constant 0 : index
    %c0_64 = arith.constant 0 : index
    %73 = vector.load %arg3[%c0_63, %c0_64] : memref<1x128xf32, #tpu.memory_space<vmem>>, vector<1x128xf32>
    %74 = vector.broadcast %73 : vector<1x128xf32> to vector<64x128xf32>
    %75 = arith.addf %72, %74 : vector<64x128xf32>
    %c0_65 = arith.constant 0 : index
    %c0_66 = arith.constant 0 : index
    %c0_67 = arith.constant 0 : index
    %76 = vector.load %arg4[%c0_65, %c0_66, %c0_67] : memref<1x1x128xf32, #tpu.memory_space<vmem>>, vector<1x1x128xf32>
    %77 = vector.shape_cast %76 : vector<1x1x128xf32> to vector<1x128xf32>
    %78 = vector.broadcast %77 : vector<1x128xf32> to vector<64x128xf32>
    %79 = arith.addf %75, %78 : vector<64x128xf32>
    %80 = arith.negf %79 : vector<64x128xf32>
    %81 = math.exp %80 : vector<64x128xf32>
    %cst_68 = arith.constant 1.000000e+00 : f32
    %82 = vector.broadcast %cst_68 : f32 to vector<64x128xf32>
    %83 = arith.addf %82, %81 : vector<64x128xf32>
    %84 = arith.divf %82, %83 : vector<64x128xf32>
    %85 = arith.mulf %79, %84 : vector<64x128xf32>
    %c0_69 = arith.constant 0 : index
    %c0_70 = arith.constant 0 : index
    %c0_71 = arith.constant 0 : index
    %86 = vector.load %arg5[%c0_69, %c0_70, %c0_71] : memref<1x64x128xf32, #tpu.memory_space<vmem>>, vector<1x64x128xf32>
    %87 = vector.shape_cast %86 : vector<1x64x128xf32> to vector<64x128xf32>
    %88 = vector.shape_cast %85 : vector<64x128xf32> to vector<1x64x128xf32>
    tpu.vector_store %arg5[%c0_69, %c0_70, %c0_71], %88 {strides = array<i32>} : memref<1x64x128xf32, #tpu.memory_space<vmem>>, vector<1x64x128xf32>,
    return
  }
  func.func @transform_0(%arg0: i32) -> (i32, i32, i32, i32) {
    %c0_i32 = arith.constant 0 : i32
    %c0_i32_0 = arith.constant 0 : i32
    %c0_i32_1 = arith.constant 0 : i32
    %c0_i32_2 = arith.constant 0 : i32
    return %arg0, %c0_i32, %c0_i32_0, %c0_i32_1 : i32, i32, i32, i32
  }
  func.func @transform_1(%arg0: i32) -> (i32, i32, i32) {
    %c0_i32 = arith.constant 0 : i32
    %c0_i32_0 = arith.constant 0 : i32
    %c0_i32_1 = arith.constant 0 : i32
    %c0_i32_2 = arith.constant 0 : i32
    return %c0_i32, %c0_i32_0, %c0_i32_1 : i32, i32, i32
  }
  func.func @transform_2(%arg0: i32) -> (i32, i32) {
    %c0_i32 = arith.constant 0 : i32
    %c0_i32_0 = arith.constant 0 : i32
    %c0_i32_1 = arith.constant 0 : i32
    return %c0_i32, %c0_i32_0 : i32, i32
  }
  func.func @transform_3(%arg0: i32) -> (i32, i32, i32) {
    %c0_i32 = arith.constant 0 : i32
    %c0_i32_0 = arith.constant 0 : i32
    %c0_i32_1 = arith.constant 0 : i32
    return %arg0, %c0_i32, %c0_i32_0 : i32, i32, i32
  }
  func.func @transform_4(%arg0: i32) -> (i32, i32, i32) {
    %c0_i32 = arith.constant 0 : i32
    %c0_i32_0 = arith.constant 0 : i32
    %c0_i32_1 = arith.constant 0 : i32
    return %arg0, %c0_i32, %c0_i32_0 : i32, i32, i32
  }
}

module attributes {stable_mosaic.version = 11 : i64} {
  func.func @_fused_linear_kernel(%arg0: i32, %arg1: i32, %arg2: memref<16x128xf32, #tpu.memory_space<vmem>>, %arg3: memref<128x384xbf16, #tpu.memory_space<vmem>>, %arg4: memref<1x384xf32, #tpu.memory_space<vmem>>, %arg5: memref<1x128xf32, #tpu.memory_space<vmem>>, %arg6: memref<1x128xf32, #tpu.memory_space<vmem>>, %arg7: memref<16x384xf32, #tpu.memory_space<vmem>>, %arg8: memref<16x384xf32, #tpu.memory_space<vmem>>) attributes {dimension_semantics = [#tpu.dimension_semantics<parallel>, #tpu.dimension_semantics<arbitrary>], iteration_bounds = array<i64: 1, 1>, scalar_prefetch = 0 : i64, scratch_operands = 1 : i64, tpu.core_type = #tpu.core_type<tc>, window_params = [{transform_indices = @transform_0, window_bounds = array<i64: 16, 128>}, {transform_indices = @transform_1, window_bounds = array<i64: 128, 384>}, {pipeline_mode = #tpu.pipeline_mode<synchronous>, transform_indices = @transform_2, window_bounds = array<i64: 1, 384>}, {transform_indices = @transform_3, window_bounds = array<i64: 1, 128>}, {transform_indices = @transform_4, window_bounds = array<i64: 1, 128>}, {transform_indices = @transform_5, window_bounds = array<i64: 16, 384>}]} {
    %c0_i32 = arith.constant 0 : i32
    %0 = arith.cmpi eq, %arg1, %c0_i32 : i32
    %1 = arith.extui %0 : i1 to i32
    %c0_i32_0 = arith.constant 0 : i32
    %2 = arith.cmpi ne, %1, %c0_i32_0 : i32
    scf.if %2 {
      %cst_19 = arith.constant 0.000000e+00 : f32
      %37 = vector.broadcast %cst_19 : f32 to vector<16x384xf32>
      %c0_20 = arith.constant 0 : index
      %c0_21 = arith.constant 0 : index
      %38 = vector.load %arg8[%c0_20, %c0_21] : memref<16x384xf32, #tpu.memory_space<vmem>>, vector<16x384xf32>
      tpu.vector_store %arg8[%c0_20, %c0_21], %37 {strides = array<i32>} : memref<16x384xf32, #tpu.memory_space<vmem>>, vector<16x384xf32>,
    } else {
    }
    %c0 = arith.constant 0 : index
    %c0_1 = arith.constant 0 : index
    %3 = vector.load %arg2[%c0, %c0_1] : memref<16x128xf32, #tpu.memory_space<vmem>>, vector<16x128xf32>
    %cst = arith.constant dense<0.000000e+00> : vector<16xf32>
    %4 = vector.multi_reduction <add>, %3, %cst [1] : vector<16x128xf32> to vector<16xf32>
    %5 = vector.shape_cast %4 : vector<16xf32> to vector<16x1xf32>
    %cst_2 = arith.constant 3.200000e+01 : f32
    %6 = vector.broadcast %cst_2 : f32 to vector<16x1xf32>
    %7 = arith.divf %5, %6 : vector<16x1xf32>
    %8 = arith.mulf %3, %3 : vector<16x128xf32>
    %cst_3 = arith.constant dense<0.000000e+00> : vector<16xf32>
    %9 = vector.multi_reduction <add>, %8, %cst_3 [1] : vector<16x128xf32> to vector<16xf32>
    %10 = vector.shape_cast %9 : vector<16xf32> to vector<16x1xf32>
    %cst_4 = arith.constant 3.200000e+01 : f32
    %11 = vector.broadcast %cst_4 : f32 to vector<16x1xf32>
    %12 = arith.divf %10, %11 : vector<16x1xf32>
    %13 = arith.mulf %7, %7 : vector<16x1xf32>
    %14 = arith.subf %12, %13 : vector<16x1xf32>
    %15 = vector.broadcast %7 : vector<16x1xf32> to vector<16x128xf32>
    %16 = arith.subf %3, %15 : vector<16x128xf32>
    %cst_5 = arith.constant 9.99999974E-6 : f32
    %17 = vector.broadcast %cst_5 : f32 to vector<16x1xf32>
    %18 = arith.addf %14, %17 : vector<16x1xf32>
    %19 = math.rsqrt %18 : vector<16x1xf32>
    %20 = vector.broadcast %19 : vector<16x1xf32> to vector<16x128xf32>
    %21 = arith.mulf %16, %20 : vector<16x128xf32>
    %c0_6 = arith.constant 0 : index
    %c0_7 = arith.constant 0 : index
    %22 = vector.load %arg5[%c0_6, %c0_7] : memref<1x128xf32, #tpu.memory_space<vmem>>, vector<1x128xf32>
    %23 = vector.broadcast %22 : vector<1x128xf32> to vector<16x128xf32>
    %24 = arith.mulf %21, %23 : vector<16x128xf32>
    %c0_8 = arith.constant 0 : index
    %c0_9 = arith.constant 0 : index
    %25 = vector.load %arg6[%c0_8, %c0_9] : memref<1x128xf32, #tpu.memory_space<vmem>>, vector<1x128xf32>
    %26 = vector.broadcast %25 : vector<1x128xf32> to vector<16x128xf32>
    %27 = arith.addf %24, %26 : vector<16x128xf32>
    %c0_10 = arith.constant 0 : index
    %c0_11 = arith.constant 0 : index
    %28 = vector.load %arg8[%c0_10, %c0_11] : memref<16x384xf32, #tpu.memory_space<vmem>>, vector<16x384xf32>
    %29 = arith.truncf %27 : vector<16x128xf32> to vector<16x128xbf16>
    %c0_12 = arith.constant 0 : index
    %c0_13 = arith.constant 0 : index
    %30 = vector.load %arg3[%c0_12, %c0_13] : memref<128x384xbf16, #tpu.memory_space<vmem>>, vector<128x384xbf16>
    %cst_14 = arith.constant dense<0.000000e+00> : vector<16x384xf32>
    %31 = tpu.matmul %29, %30, %cst_14 {dimension_numbers = #tpu.dot_dimension_numbers<[1], [0], [0], [1], [0, 0, 1, 1], [], []>} : vector<16x128xbf16>, vector<128x384xbf16>, vector<16x384xf32> -> vector<16x384xf32>
    %32 = arith.addf %28, %31 : vector<16x384xf32>
    %c0_15 = arith.constant 0 : index
    %c0_16 = arith.constant 0 : index
    %33 = vector.load %arg8[%c0_15, %c0_16] : memref<16x384xf32, #tpu.memory_space<vmem>>, vector<16x384xf32>
    tpu.vector_store %arg8[%c0_15, %c0_16], %32 {strides = array<i32>} : memref<16x384xf32, #tpu.memory_space<vmem>>, vector<16x384xf32>,
    %c0_i32_17 = arith.constant 0 : i32
    %34 = arith.cmpi eq, %arg1, %c0_i32_17 : i32
    %35 = arith.extui %34 : i1 to i32
    %c0_i32_18 = arith.constant 0 : i32
    %36 = arith.cmpi ne, %35, %c0_i32_18 : i32
    scf.if %36 {
      %c0_19 = arith.constant 0 : index
      %c0_20 = arith.constant 0 : index
      %37 = vector.load %arg8[%c0_19, %c0_20] : memref<16x384xf32, #tpu.memory_space<vmem>>, vector<16x384xf32>
      %c0_21 = arith.constant 0 : index
      %c0_22 = arith.constant 0 : index
      %38 = vector.load %arg4[%c0_21, %c0_22] : memref<1x384xf32, #tpu.memory_space<vmem>>, vector<1x384xf32>
      %39 = vector.broadcast %38 : vector<1x384xf32> to vector<16x384xf32>
      %40 = arith.addf %37, %39 : vector<16x384xf32>
      %c0_23 = arith.constant 0 : index
      %c0_24 = arith.constant 0 : index
      %41 = vector.load %arg7[%c0_23, %c0_24] : memref<16x384xf32, #tpu.memory_space<vmem>>, vector<16x384xf32>
      tpu.vector_store %arg7[%c0_23, %c0_24], %40 {strides = array<i32>} : memref<16x384xf32, #tpu.memory_space<vmem>>, vector<16x384xf32>,
    } else {
    }
    return
  }
  func.func @transform_0(%arg0: i32, %arg1: i32) -> (i32, i32) {
    %c0_i32 = arith.constant 0 : i32
    return %arg0, %arg1 : i32, i32
  }
  func.func @transform_1(%arg0: i32, %arg1: i32) -> (i32, i32) {
    %c0_i32 = arith.constant 0 : i32
    %c0_i32_0 = arith.constant 0 : i32
    return %arg1, %c0_i32 : i32, i32
  }
  func.func @transform_2(%arg0: i32, %arg1: i32) -> (i32, i32) {
    %c0_i32 = arith.constant 0 : i32
    %c0_i32_0 = arith.constant 0 : i32
    %c0_i32_1 = arith.constant 0 : i32
    return %c0_i32, %c0_i32_0 : i32, i32
  }
  func.func @transform_3(%arg0: i32, %arg1: i32) -> (i32, i32) {
    %c0_i32 = arith.constant 0 : i32
    %c0_i32_0 = arith.constant 0 : i32
    return %c0_i32, %arg1 : i32, i32
  }
  func.func @transform_4(%arg0: i32, %arg1: i32) -> (i32, i32) {
    %c0_i32 = arith.constant 0 : i32
    %c0_i32_0 = arith.constant 0 : i32
    return %c0_i32, %arg1 : i32, i32
  }
  func.func @transform_5(%arg0: i32, %arg1: i32) -> (i32, i32) {
    %c0_i32 = arith.constant 0 : i32
    %c0_i32_0 = arith.constant 0 : i32
    return %arg0, %c0_i32 : i32, i32
  }
}

module attributes {stable_mosaic.version = 11 : i64} {
  func.func @_self_attn_kernel(%arg0: i32, %arg1: memref<1x8x384xf32, #tpu.memory_space<vmem>>, %arg2: memref<1x8x128xf32, #tpu.memory_space<vmem>>) attributes {dimension_semantics = [#tpu.dimension_semantics<parallel>], iteration_bounds = array<i64: 2>, scalar_prefetch = 0 : i64, scratch_operands = 0 : i64, tpu.core_type = #tpu.core_type<tc>, window_params = [{transform_indices = @transform_0, window_bounds = array<i64: 1, 8, 384>}, {transform_indices = @transform_1, window_bounds = array<i64: 1, 8, 128>}]} {
    %c0 = arith.constant 0 : index
    %c0_0 = arith.constant 0 : index
    %c0_1 = arith.constant 0 : index
    %0 = vector.load %arg1[%c0, %c0_0, %c0_1] : memref<1x8x384xf32, #tpu.memory_space<vmem>>, vector<1x8x384xf32>
    %1 = vector.shape_cast %0 : vector<1x8x384xf32> to vector<8x384xf32>
    %2 = vector.extract_strided_slice %1 {offsets = [0, 0], sizes = [8, 128], strides = [1, 1]} : vector<8x384xf32> to vector<8x128xf32>
    %3 = vector.extract_strided_slice %1 {offsets = [0, 128], sizes = [8, 128], strides = [1, 1]} : vector<8x384xf32> to vector<8x128xf32>
    %4 = vector.extract_strided_slice %1 {offsets = [0, 256], sizes = [8, 128], strides = [1, 1]} : vector<8x384xf32> to vector<8x128xf32>
    %cst = arith.constant 0.176776692 : f32
    %5 = vector.broadcast %cst : f32 to vector<8x128xf32>
    %6 = arith.mulf %2, %5 : vector<8x128xf32>
    %7 = arith.truncf %6 : vector<8x128xf32> to vector<8x128xbf16>
    %8 = arith.truncf %3 : vector<8x128xf32> to vector<8x128xbf16>
    %cst_2 = arith.constant dense<0.000000e+00> : vector<8x8xf32>
    %9 = tpu.matmul %7, %8, %cst_2 {dimension_numbers = #tpu.dot_dimension_numbers<[1], [1], [0], [0], [0, 0, 1, 0], [], []>} : vector<8x128xbf16>, vector<8x128xbf16>, vector<8x8xf32> -> vector<8x8xf32>
    %10 = tpu.iota {dimensions = array<i32: 0>} : vector<8x8xi32>
    %11 = tpu.iota {dimensions = array<i32: 1>} : vector<8x8xi32>
    %12 = arith.cmpi sle, %11, %10 : vector<8x8xi32>
    %cst_3 = arith.constant -1.000000e+09 : f32
    %13 = vector.broadcast %cst_3 : f32 to vector<8x8xf32>
    %14 = arith.select %12, %9, %13 : vector<8x8xi1>, vector<8x8xf32>
    %cst_4 = arith.constant dense<0xFF800000> : vector<8xf32>
    %15 = vector.multi_reduction <maximumf>, %14, %cst_4 [1] : vector<8x8xf32> to vector<8xf32>
    %16 = vector.shape_cast %15 : vector<8xf32> to vector<8x1xf32>
    %17 = vector.broadcast %16 : vector<8x1xf32> to vector<8x8xf32>
    %18 = arith.subf %14, %17 : vector<8x8xf32>
    %19 = math.exp %18 : vector<8x8xf32>
    %cst_5 = arith.constant dense<0.000000e+00> : vector<8xf32>
    %20 = vector.multi_reduction <add>, %19, %cst_5 [1] : vector<8x8xf32> to vector<8xf32>
    %21 = vector.shape_cast %20 : vector<8xf32> to vector<8x1xf32>
    %22 = tpu.reciprocal %21 {approx = true} : vector<8x1xf32> -> vector<8x1xf32>
    %23 = vector.broadcast %22 : vector<8x1xf32> to vector<8x8xf32>
    %24 = arith.mulf %19, %23 : vector<8x8xf32>
    %25 = arith.truncf %24 : vector<8x8xf32> to vector<8x8xbf16>
    %26 = arith.truncf %4 : vector<8x128xf32> to vector<8x128xbf16>
    %cst_6 = arith.constant dense<0.000000e+00> : vector<8x128xf32>
    %27 = tpu.matmul %25, %26, %cst_6 {dimension_numbers = #tpu.dot_dimension_numbers<[1], [0], [0], [1], [0, 0, 1, 1], [], []>} : vector<8x8xbf16>, vector<8x128xbf16>, vector<8x128xf32> -> vector<8x128xf32>
    %c0_7 = arith.constant 0 : index
    %c0_8 = arith.constant 0 : index
    %c0_9 = arith.constant 0 : index
    %28 = vector.load %arg2[%c0_7, %c0_8, %c0_9] : memref<1x8x128xf32, #tpu.memory_space<vmem>>, vector<1x8x128xf32>
    %29 = vector.shape_cast %28 : vector<1x8x128xf32> to vector<8x128xf32>
    %30 = vector.shape_cast %27 : vector<8x128xf32> to vector<1x8x128xf32>
    tpu.vector_store %arg2[%c0_7, %c0_8, %c0_9], %30 {strides = array<i32>} : memref<1x8x128xf32, #tpu.memory_space<vmem>>, vector<1x8x128xf32>,
    return
  }
  func.func @transform_0(%arg0: i32) -> (i32, i32, i32) {
    %c0_i32 = arith.constant 0 : i32
    %c0_i32_0 = arith.constant 0 : i32
    %c0_i32_1 = arith.constant 0 : i32
    return %arg0, %c0_i32, %c0_i32_0 : i32, i32, i32
  }
  func.func @transform_1(%arg0: i32) -> (i32, i32, i32) {
    %c0_i32 = arith.constant 0 : i32
    %c0_i32_0 = arith.constant 0 : i32
    %c0_i32_1 = arith.constant 0 : i32
    return %arg0, %c0_i32, %c0_i32_0 : i32, i32, i32
  }
}

module attributes {stable_mosaic.version = 11 : i64} {
  func.func @_fused_linear_kernel(%arg0: i32, %arg1: i32, %arg2: memref<16x128xf32, #tpu.memory_space<vmem>>, %arg3: memref<16x128xf32, #tpu.memory_space<vmem>>, %arg4: memref<128x128xbf16, #tpu.memory_space<vmem>>, %arg5: memref<1x128xf32, #tpu.memory_space<vmem>>, %arg6: memref<16x128xf32, #tpu.memory_space<vmem>>, %arg7: memref<16x128xf32, #tpu.memory_space<vmem>>) attributes {dimension_semantics = [#tpu.dimension_semantics<parallel>, #tpu.dimension_semantics<arbitrary>], iteration_bounds = array<i64: 1, 1>, scalar_prefetch = 0 : i64, scratch_operands = 1 : i64, tpu.core_type = #tpu.core_type<tc>, window_params = [{transform_indices = @transform_0, window_bounds = array<i64: 16, 128>}, {transform_indices = @transform_1, window_bounds = array<i64: 16, 128>}, {transform_indices = @transform_2, window_bounds = array<i64: 128, 128>}, {pipeline_mode = #tpu.pipeline_mode<synchronous>, transform_indices = @transform_3, window_bounds = array<i64: 1, 128>}, {transform_indices = @transform_4, window_bounds = array<i64: 16, 128>}]} {
    %c0_i32 = arith.constant 0 : i32
    %0 = arith.cmpi eq, %arg1, %c0_i32 : i32
    %1 = arith.extui %0 : i1 to i32
    %c0_i32_0 = arith.constant 0 : i32
    %2 = arith.cmpi ne, %1, %c0_i32_0 : i32
    scf.if %2 {
      %cst_10 = arith.constant 0.000000e+00 : f32
      %13 = vector.broadcast %cst_10 : f32 to vector<16x128xf32>
      %c0_11 = arith.constant 0 : index
      %c0_12 = arith.constant 0 : index
      %14 = vector.load %arg7[%c0_11, %c0_12] : memref<16x128xf32, #tpu.memory_space<vmem>>, vector<16x128xf32>
      tpu.vector_store %arg7[%c0_11, %c0_12], %13 {strides = array<i32>} : memref<16x128xf32, #tpu.memory_space<vmem>>, vector<16x128xf32>,
    } else {
    }
    %c0 = arith.constant 0 : index
    %c0_1 = arith.constant 0 : index
    %3 = vector.load %arg2[%c0, %c0_1] : memref<16x128xf32, #tpu.memory_space<vmem>>, vector<16x128xf32>
    %c0_2 = arith.constant 0 : index
    %c0_3 = arith.constant 0 : index
    %4 = vector.load %arg7[%c0_2, %c0_3] : memref<16x128xf32, #tpu.memory_space<vmem>>, vector<16x128xf32>
    %5 = arith.truncf %3 : vector<16x128xf32> to vector<16x128xbf16>
    %c0_4 = arith.constant 0 : index
    %c0_5 = arith.constant 0 : index
    %6 = vector.load %arg4[%c0_4, %c0_5] : memref<128x128xbf16, #tpu.memory_space<vmem>>, vector<128x128xbf16>
    %cst = arith.constant dense<0.000000e+00> : vector<16x128xf32>
    %7 = tpu.matmul %5, %6, %cst {dimension_numbers = #tpu.dot_dimension_numbers<[1], [0], [0], [1], [0, 0, 1, 1], [], []>} : vector<16x128xbf16>, vector<128x128xbf16>, vector<16x128xf32> -> vector<16x128xf32>
    %8 = arith.addf %4, %7 : vector<16x128xf32>
    %c0_6 = arith.constant 0 : index
    %c0_7 = arith.constant 0 : index
    %9 = vector.load %arg7[%c0_6, %c0_7] : memref<16x128xf32, #tpu.memory_space<vmem>>, vector<16x128xf32>
    tpu.vector_store %arg7[%c0_6, %c0_7], %8 {strides = array<i32>} : memref<16x128xf32, #tpu.memory_space<vmem>>, vector<16x128xf32>,
    %c0_i32_8 = arith.constant 0 : i32
    %10 = arith.cmpi eq, %arg1, %c0_i32_8 : i32
    %11 = arith.extui %10 : i1 to i32
    %c0_i32_9 = arith.constant 0 : i32
    %12 = arith.cmpi ne, %11, %c0_i32_9 : i32
    scf.if %12 {
      %c0_10 = arith.constant 0 : index
      %c0_11 = arith.constant 0 : index
      %13 = vector.load %arg7[%c0_10, %c0_11] : memref<16x128xf32, #tpu.memory_space<vmem>>, vector<16x128xf32>
      %c0_12 = arith.constant 0 : index
      %c0_13 = arith.constant 0 : index
      %14 = vector.load %arg5[%c0_12, %c0_13] : memref<1x128xf32, #tpu.memory_space<vmem>>, vector<1x128xf32>
      %15 = vector.broadcast %14 : vector<1x128xf32> to vector<16x128xf32>
      %16 = arith.addf %13, %15 : vector<16x128xf32>
      %c0_14 = arith.constant 0 : index
      %c0_15 = arith.constant 0 : index
      %17 = vector.load %arg3[%c0_14, %c0_15] : memref<16x128xf32, #tpu.memory_space<vmem>>, vector<16x128xf32>
      %18 = arith.addf %16, %17 : vector<16x128xf32>
      %c0_16 = arith.constant 0 : index
      %c0_17 = arith.constant 0 : index
      %19 = vector.load %arg6[%c0_16, %c0_17] : memref<16x128xf32, #tpu.memory_space<vmem>>, vector<16x128xf32>
      tpu.vector_store %arg6[%c0_16, %c0_17], %18 {strides = array<i32>} : memref<16x128xf32, #tpu.memory_space<vmem>>, vector<16x128xf32>,
    } else {
    }
    return
  }
  func.func @transform_0(%arg0: i32, %arg1: i32) -> (i32, i32) {
    %c0_i32 = arith.constant 0 : i32
    return %arg0, %arg1 : i32, i32
  }
  func.func @transform_1(%arg0: i32, %arg1: i32) -> (i32, i32) {
    %c0_i32 = arith.constant 0 : i32
    %c0_i32_0 = arith.constant 0 : i32
    return %arg0, %c0_i32 : i32, i32
  }
  func.func @transform_2(%arg0: i32, %arg1: i32) -> (i32, i32) {
    %c0_i32 = arith.constant 0 : i32
    %c0_i32_0 = arith.constant 0 : i32
    return %arg1, %c0_i32 : i32, i32
  }
  func.func @transform_3(%arg0: i32, %arg1: i32) -> (i32, i32) {
    %c0_i32 = arith.constant 0 : i32
    %c0_i32_0 = arith.constant 0 : i32
    %c0_i32_1 = arith.constant 0 : i32
    return %c0_i32, %c0_i32_0 : i32, i32
  }
  func.func @transform_4(%arg0: i32, %arg1: i32) -> (i32, i32) {
    %c0_i32 = arith.constant 0 : i32
    %c0_i32_0 = arith.constant 0 : i32
    return %arg0, %c0_i32 : i32, i32
  }
}

module attributes {stable_mosaic.version = 11 : i64} {
  func.func @_fused_linear_kernel(%arg0: i32, %arg1: i32, %arg2: memref<16x128xf32, #tpu.memory_space<vmem>>, %arg3: memref<128x256xbf16, #tpu.memory_space<vmem>>, %arg4: memref<1x256xf32, #tpu.memory_space<vmem>>, %arg5: memref<1x128xf32, #tpu.memory_space<vmem>>, %arg6: memref<1x128xf32, #tpu.memory_space<vmem>>, %arg7: memref<16x256xf32, #tpu.memory_space<vmem>>, %arg8: memref<16x256xf32, #tpu.memory_space<vmem>>) attributes {dimension_semantics = [#tpu.dimension_semantics<parallel>, #tpu.dimension_semantics<arbitrary>], iteration_bounds = array<i64: 1, 1>, scalar_prefetch = 0 : i64, scratch_operands = 1 : i64, tpu.core_type = #tpu.core_type<tc>, window_params = [{transform_indices = @transform_0, window_bounds = array<i64: 16, 128>}, {transform_indices = @transform_1, window_bounds = array<i64: 128, 256>}, {pipeline_mode = #tpu.pipeline_mode<synchronous>, transform_indices = @transform_2, window_bounds = array<i64: 1, 256>}, {transform_indices = @transform_3, window_bounds = array<i64: 1, 128>}, {transform_indices = @transform_4, window_bounds = array<i64: 1, 128>}, {transform_indices = @transform_5, window_bounds = array<i64: 16, 256>}]} {
    %c0_i32 = arith.constant 0 : i32
    %0 = arith.cmpi eq, %arg1, %c0_i32 : i32
    %1 = arith.extui %0 : i1 to i32
    %c0_i32_0 = arith.constant 0 : i32
    %2 = arith.cmpi ne, %1, %c0_i32_0 : i32
    scf.if %2 {
      %cst_19 = arith.constant 0.000000e+00 : f32
      %37 = vector.broadcast %cst_19 : f32 to vector<16x256xf32>
      %c0_20 = arith.constant 0 : index
      %c0_21 = arith.constant 0 : index
      %38 = vector.load %arg8[%c0_20, %c0_21] : memref<16x256xf32, #tpu.memory_space<vmem>>, vector<16x256xf32>
      tpu.vector_store %arg8[%c0_20, %c0_21], %37 {strides = array<i32>} : memref<16x256xf32, #tpu.memory_space<vmem>>, vector<16x256xf32>,
    } else {
    }
    %c0 = arith.constant 0 : index
    %c0_1 = arith.constant 0 : index
    %3 = vector.load %arg2[%c0, %c0_1] : memref<16x128xf32, #tpu.memory_space<vmem>>, vector<16x128xf32>
    %cst = arith.constant dense<0.000000e+00> : vector<16xf32>
    %4 = vector.multi_reduction <add>, %3, %cst [1] : vector<16x128xf32> to vector<16xf32>
    %5 = vector.shape_cast %4 : vector<16xf32> to vector<16x1xf32>
    %cst_2 = arith.constant 3.200000e+01 : f32
    %6 = vector.broadcast %cst_2 : f32 to vector<16x1xf32>
    %7 = arith.divf %5, %6 : vector<16x1xf32>
    %8 = arith.mulf %3, %3 : vector<16x128xf32>
    %cst_3 = arith.constant dense<0.000000e+00> : vector<16xf32>
    %9 = vector.multi_reduction <add>, %8, %cst_3 [1] : vector<16x128xf32> to vector<16xf32>
    %10 = vector.shape_cast %9 : vector<16xf32> to vector<16x1xf32>
    %cst_4 = arith.constant 3.200000e+01 : f32
    %11 = vector.broadcast %cst_4 : f32 to vector<16x1xf32>
    %12 = arith.divf %10, %11 : vector<16x1xf32>
    %13 = arith.mulf %7, %7 : vector<16x1xf32>
    %14 = arith.subf %12, %13 : vector<16x1xf32>
    %15 = vector.broadcast %7 : vector<16x1xf32> to vector<16x128xf32>
    %16 = arith.subf %3, %15 : vector<16x128xf32>
    %cst_5 = arith.constant 9.99999974E-6 : f32
    %17 = vector.broadcast %cst_5 : f32 to vector<16x1xf32>
    %18 = arith.addf %14, %17 : vector<16x1xf32>
    %19 = math.rsqrt %18 : vector<16x1xf32>
    %20 = vector.broadcast %19 : vector<16x1xf32> to vector<16x128xf32>
    %21 = arith.mulf %16, %20 : vector<16x128xf32>
    %c0_6 = arith.constant 0 : index
    %c0_7 = arith.constant 0 : index
    %22 = vector.load %arg5[%c0_6, %c0_7] : memref<1x128xf32, #tpu.memory_space<vmem>>, vector<1x128xf32>
    %23 = vector.broadcast %22 : vector<1x128xf32> to vector<16x128xf32>
    %24 = arith.mulf %21, %23 : vector<16x128xf32>
    %c0_8 = arith.constant 0 : index
    %c0_9 = arith.constant 0 : index
    %25 = vector.load %arg6[%c0_8, %c0_9] : memref<1x128xf32, #tpu.memory_space<vmem>>, vector<1x128xf32>
    %26 = vector.broadcast %25 : vector<1x128xf32> to vector<16x128xf32>
    %27 = arith.addf %24, %26 : vector<16x128xf32>
    %c0_10 = arith.constant 0 : index
    %c0_11 = arith.constant 0 : index
    %28 = vector.load %arg8[%c0_10, %c0_11] : memref<16x256xf32, #tpu.memory_space<vmem>>, vector<16x256xf32>
    %29 = arith.truncf %27 : vector<16x128xf32> to vector<16x128xbf16>
    %c0_12 = arith.constant 0 : index
    %c0_13 = arith.constant 0 : index
    %30 = vector.load %arg3[%c0_12, %c0_13] : memref<128x256xbf16, #tpu.memory_space<vmem>>, vector<128x256xbf16>
    %cst_14 = arith.constant dense<0.000000e+00> : vector<16x256xf32>
    %31 = tpu.matmul %29, %30, %cst_14 {dimension_numbers = #tpu.dot_dimension_numbers<[1], [0], [0], [1], [0, 0, 1, 1], [], []>} : vector<16x128xbf16>, vector<128x256xbf16>, vector<16x256xf32> -> vector<16x256xf32>
    %32 = arith.addf %28, %31 : vector<16x256xf32>
    %c0_15 = arith.constant 0 : index
    %c0_16 = arith.constant 0 : index
    %33 = vector.load %arg8[%c0_15, %c0_16] : memref<16x256xf32, #tpu.memory_space<vmem>>, vector<16x256xf32>
    tpu.vector_store %arg8[%c0_15, %c0_16], %32 {strides = array<i32>} : memref<16x256xf32, #tpu.memory_space<vmem>>, vector<16x256xf32>,
    %c0_i32_17 = arith.constant 0 : i32
    %34 = arith.cmpi eq, %arg1, %c0_i32_17 : i32
    %35 = arith.extui %34 : i1 to i32
    %c0_i32_18 = arith.constant 0 : i32
    %36 = arith.cmpi ne, %35, %c0_i32_18 : i32
    scf.if %36 {
      %c0_19 = arith.constant 0 : index
      %c0_20 = arith.constant 0 : index
      %37 = vector.load %arg8[%c0_19, %c0_20] : memref<16x256xf32, #tpu.memory_space<vmem>>, vector<16x256xf32>
      %c0_21 = arith.constant 0 : index
      %c0_22 = arith.constant 0 : index
      %38 = vector.load %arg4[%c0_21, %c0_22] : memref<1x256xf32, #tpu.memory_space<vmem>>, vector<1x256xf32>
      %39 = vector.broadcast %38 : vector<1x256xf32> to vector<16x256xf32>
      %40 = arith.addf %37, %39 : vector<16x256xf32>
      %c0_23 = arith.constant 0 : index
      %c0_24 = arith.constant 0 : index
      %41 = vector.load %arg7[%c0_23, %c0_24] : memref<16x256xf32, #tpu.memory_space<vmem>>, vector<16x256xf32>
      tpu.vector_store %arg7[%c0_23, %c0_24], %40 {strides = array<i32>} : memref<16x256xf32, #tpu.memory_space<vmem>>, vector<16x256xf32>,
    } else {
    }
    return
  }
  func.func @transform_0(%arg0: i32, %arg1: i32) -> (i32, i32) {
    %c0_i32 = arith.constant 0 : i32
    return %arg0, %arg1 : i32, i32
  }
  func.func @transform_1(%arg0: i32, %arg1: i32) -> (i32, i32) {
    %c0_i32 = arith.constant 0 : i32
    %c0_i32_0 = arith.constant 0 : i32
    return %arg1, %c0_i32 : i32, i32
  }
  func.func @transform_2(%arg0: i32, %arg1: i32) -> (i32, i32) {
    %c0_i32 = arith.constant 0 : i32
    %c0_i32_0 = arith.constant 0 : i32
    %c0_i32_1 = arith.constant 0 : i32
    return %c0_i32, %c0_i32_0 : i32, i32
  }
  func.func @transform_3(%arg0: i32, %arg1: i32) -> (i32, i32) {
    %c0_i32 = arith.constant 0 : i32
    %c0_i32_0 = arith.constant 0 : i32
    return %c0_i32, %arg1 : i32, i32
  }
  func.func @transform_4(%arg0: i32, %arg1: i32) -> (i32, i32) {
    %c0_i32 = arith.constant 0 : i32
    %c0_i32_0 = arith.constant 0 : i32
    return %c0_i32, %arg1 : i32, i32
  }
  func.func @transform_5(%arg0: i32, %arg1: i32) -> (i32, i32) {
    %c0_i32 = arith.constant 0 : i32
    %c0_i32_0 = arith.constant 0 : i32
    return %arg0, %c0_i32 : i32, i32
  }
}

module attributes {stable_mosaic.version = 11 : i64} {
  func.func @_fused_linear_kernel(%arg0: i32, %arg1: i32, %arg2: memref<16x128xf32, #tpu.memory_space<vmem>>, %arg3: memref<128x128xbf16, #tpu.memory_space<vmem>>, %arg4: memref<1x128xf32, #tpu.memory_space<vmem>>, %arg5: memref<1x128xf32, #tpu.memory_space<vmem>>, %arg6: memref<1x128xf32, #tpu.memory_space<vmem>>, %arg7: memref<16x128xf32, #tpu.memory_space<vmem>>, %arg8: memref<16x128xf32, #tpu.memory_space<vmem>>) attributes {dimension_semantics = [#tpu.dimension_semantics<parallel>, #tpu.dimension_semantics<arbitrary>], iteration_bounds = array<i64: 1, 1>, scalar_prefetch = 0 : i64, scratch_operands = 1 : i64, tpu.core_type = #tpu.core_type<tc>, window_params = [{transform_indices = @transform_0, window_bounds = array<i64: 16, 128>}, {transform_indices = @transform_1, window_bounds = array<i64: 128, 128>}, {pipeline_mode = #tpu.pipeline_mode<synchronous>, transform_indices = @transform_2, window_bounds = array<i64: 1, 128>}, {transform_indices = @transform_3, window_bounds = array<i64: 1, 128>}, {transform_indices = @transform_4, window_bounds = array<i64: 1, 128>}, {transform_indices = @transform_5, window_bounds = array<i64: 16, 128>}]} {
    %c0_i32 = arith.constant 0 : i32
    %0 = arith.cmpi eq, %arg1, %c0_i32 : i32
    %1 = arith.extui %0 : i1 to i32
    %c0_i32_0 = arith.constant 0 : i32
    %2 = arith.cmpi ne, %1, %c0_i32_0 : i32
    scf.if %2 {
      %cst_19 = arith.constant 0.000000e+00 : f32
      %37 = vector.broadcast %cst_19 : f32 to vector<16x128xf32>
      %c0_20 = arith.constant 0 : index
      %c0_21 = arith.constant 0 : index
      %38 = vector.load %arg8[%c0_20, %c0_21] : memref<16x128xf32, #tpu.memory_space<vmem>>, vector<16x128xf32>
      tpu.vector_store %arg8[%c0_20, %c0_21], %37 {strides = array<i32>} : memref<16x128xf32, #tpu.memory_space<vmem>>, vector<16x128xf32>,
    } else {
    }
    %c0 = arith.constant 0 : index
    %c0_1 = arith.constant 0 : index
    %3 = vector.load %arg2[%c0, %c0_1] : memref<16x128xf32, #tpu.memory_space<vmem>>, vector<16x128xf32>
    %cst = arith.constant dense<0.000000e+00> : vector<16xf32>
    %4 = vector.multi_reduction <add>, %3, %cst [1] : vector<16x128xf32> to vector<16xf32>
    %5 = vector.shape_cast %4 : vector<16xf32> to vector<16x1xf32>
    %cst_2 = arith.constant 3.200000e+01 : f32
    %6 = vector.broadcast %cst_2 : f32 to vector<16x1xf32>
    %7 = arith.divf %5, %6 : vector<16x1xf32>
    %8 = arith.mulf %3, %3 : vector<16x128xf32>
    %cst_3 = arith.constant dense<0.000000e+00> : vector<16xf32>
    %9 = vector.multi_reduction <add>, %8, %cst_3 [1] : vector<16x128xf32> to vector<16xf32>
    %10 = vector.shape_cast %9 : vector<16xf32> to vector<16x1xf32>
    %cst_4 = arith.constant 3.200000e+01 : f32
    %11 = vector.broadcast %cst_4 : f32 to vector<16x1xf32>
    %12 = arith.divf %10, %11 : vector<16x1xf32>
    %13 = arith.mulf %7, %7 : vector<16x1xf32>
    %14 = arith.subf %12, %13 : vector<16x1xf32>
    %15 = vector.broadcast %7 : vector<16x1xf32> to vector<16x128xf32>
    %16 = arith.subf %3, %15 : vector<16x128xf32>
    %cst_5 = arith.constant 9.99999974E-6 : f32
    %17 = vector.broadcast %cst_5 : f32 to vector<16x1xf32>
    %18 = arith.addf %14, %17 : vector<16x1xf32>
    %19 = math.rsqrt %18 : vector<16x1xf32>
    %20 = vector.broadcast %19 : vector<16x1xf32> to vector<16x128xf32>
    %21 = arith.mulf %16, %20 : vector<16x128xf32>
    %c0_6 = arith.constant 0 : index
    %c0_7 = arith.constant 0 : index
    %22 = vector.load %arg5[%c0_6, %c0_7] : memref<1x128xf32, #tpu.memory_space<vmem>>, vector<1x128xf32>
    %23 = vector.broadcast %22 : vector<1x128xf32> to vector<16x128xf32>
    %24 = arith.mulf %21, %23 : vector<16x128xf32>
    %c0_8 = arith.constant 0 : index
    %c0_9 = arith.constant 0 : index
    %25 = vector.load %arg6[%c0_8, %c0_9] : memref<1x128xf32, #tpu.memory_space<vmem>>, vector<1x128xf32>
    %26 = vector.broadcast %25 : vector<1x128xf32> to vector<16x128xf32>
    %27 = arith.addf %24, %26 : vector<16x128xf32>
    %c0_10 = arith.constant 0 : index
    %c0_11 = arith.constant 0 : index
    %28 = vector.load %arg8[%c0_10, %c0_11] : memref<16x128xf32, #tpu.memory_space<vmem>>, vector<16x128xf32>
    %29 = arith.truncf %27 : vector<16x128xf32> to vector<16x128xbf16>
    %c0_12 = arith.constant 0 : index
    %c0_13 = arith.constant 0 : index
    %30 = vector.load %arg3[%c0_12, %c0_13] : memref<128x128xbf16, #tpu.memory_space<vmem>>, vector<128x128xbf16>
    %cst_14 = arith.constant dense<0.000000e+00> : vector<16x128xf32>
    %31 = tpu.matmul %29, %30, %cst_14 {dimension_numbers = #tpu.dot_dimension_numbers<[1], [0], [0], [1], [0, 0, 1, 1], [], []>} : vector<16x128xbf16>, vector<128x128xbf16>, vector<16x128xf32> -> vector<16x128xf32>
    %32 = arith.addf %28, %31 : vector<16x128xf32>
    %c0_15 = arith.constant 0 : index
    %c0_16 = arith.constant 0 : index
    %33 = vector.load %arg8[%c0_15, %c0_16] : memref<16x128xf32, #tpu.memory_space<vmem>>, vector<16x128xf32>
    tpu.vector_store %arg8[%c0_15, %c0_16], %32 {strides = array<i32>} : memref<16x128xf32, #tpu.memory_space<vmem>>, vector<16x128xf32>,
    %c0_i32_17 = arith.constant 0 : i32
    %34 = arith.cmpi eq, %arg1, %c0_i32_17 : i32
    %35 = arith.extui %34 : i1 to i32
    %c0_i32_18 = arith.constant 0 : i32
    %36 = arith.cmpi ne, %35, %c0_i32_18 : i32
    scf.if %36 {
      %c0_19 = arith.constant 0 : index
      %c0_20 = arith.constant 0 : index
      %37 = vector.load %arg8[%c0_19, %c0_20] : memref<16x128xf32, #tpu.memory_space<vmem>>, vector<16x128xf32>
      %c0_21 = arith.constant 0 : index
      %c0_22 = arith.constant 0 : index
      %38 = vector.load %arg4[%c0_21, %c0_22] : memref<1x128xf32, #tpu.memory_space<vmem>>, vector<1x128xf32>
      %39 = vector.broadcast %38 : vector<1x128xf32> to vector<16x128xf32>
      %40 = arith.addf %37, %39 : vector<16x128xf32>
      %41 = arith.mulf %40, %40 : vector<16x128xf32>
      %42 = arith.mulf %40, %41 : vector<16x128xf32>
      %cst_23 = arith.constant 4.471500e-02 : f32
      %43 = vector.broadcast %cst_23 : f32 to vector<16x128xf32>
      %44 = arith.mulf %43, %42 : vector<16x128xf32>
      %45 = arith.addf %40, %44 : vector<16x128xf32>
      %cst_24 = arith.constant 0.797884583 : f32
      %46 = vector.broadcast %cst_24 : f32 to vector<16x128xf32>
      %47 = arith.mulf %46, %45 : vector<16x128xf32>
      %48 = math.tanh %47 : vector<16x128xf32>
      %cst_25 = arith.constant 1.000000e+00 : f32
      %49 = vector.broadcast %cst_25 : f32 to vector<16x128xf32>
      %50 = arith.addf %49, %48 : vector<16x128xf32>
      %cst_26 = arith.constant 5.000000e-01 : f32
      %51 = vector.broadcast %cst_26 : f32 to vector<16x128xf32>
      %52 = arith.mulf %51, %50 : vector<16x128xf32>
      %53 = arith.mulf %40, %52 : vector<16x128xf32>
      %c0_27 = arith.constant 0 : index
      %c0_28 = arith.constant 0 : index
      %54 = vector.load %arg7[%c0_27, %c0_28] : memref<16x128xf32, #tpu.memory_space<vmem>>, vector<16x128xf32>
      tpu.vector_store %arg7[%c0_27, %c0_28], %53 {strides = array<i32>} : memref<16x128xf32, #tpu.memory_space<vmem>>, vector<16x128xf32>,
    } else {
    }
    return
  }
  func.func @transform_0(%arg0: i32, %arg1: i32) -> (i32, i32) {
    %c0_i32 = arith.constant 0 : i32
    return %arg0, %arg1 : i32, i32
  }
  func.func @transform_1(%arg0: i32, %arg1: i32) -> (i32, i32) {
    %c0_i32 = arith.constant 0 : i32
    %c0_i32_0 = arith.constant 0 : i32
    return %arg1, %c0_i32 : i32, i32
  }
  func.func @transform_2(%arg0: i32, %arg1: i32) -> (i32, i32) {
    %c0_i32 = arith.constant 0 : i32
    %c0_i32_0 = arith.constant 0 : i32
    %c0_i32_1 = arith.constant 0 : i32
    return %c0_i32, %c0_i32_0 : i32, i32
  }
  func.func @transform_3(%arg0: i32, %arg1: i32) -> (i32, i32) {
    %c0_i32 = arith.constant 0 : i32
    %c0_i32_0 = arith.constant 0 : i32
    return %c0_i32, %arg1 : i32, i32
  }
  func.func @transform_4(%arg0: i32, %arg1: i32) -> (i32, i32) {
    %c0_i32 = arith.constant 0 : i32
    %c0_i32_0 = arith.constant 0 : i32
    return %c0_i32, %arg1 : i32, i32
  }
  func.func @transform_5(%arg0: i32, %arg1: i32) -> (i32, i32) {
    %c0_i32 = arith.constant 0 : i32
    %c0_i32_0 = arith.constant 0 : i32
    return %arg0, %c0_i32 : i32, i32
  }
}

module attributes {stable_mosaic.version = 11 : i64} {
  func.func @_cross_attn_kernel(%arg0: i32, %arg1: memref<1x64x128xf32, #tpu.memory_space<vmem>>, %arg2: memref<1x8x256xf32, #tpu.memory_space<vmem>>, %arg3: memref<1x64x128xf32, #tpu.memory_space<vmem>>) attributes {dimension_semantics = [#tpu.dimension_semantics<parallel>], iteration_bounds = array<i64: 2>, scalar_prefetch = 0 : i64, scratch_operands = 0 : i64, tpu.core_type = #tpu.core_type<tc>, window_params = [{transform_indices = @transform_0, window_bounds = array<i64: 1, 64, 128>}, {transform_indices = @transform_1, window_bounds = array<i64: 1, 8, 256>}, {transform_indices = @transform_2, window_bounds = array<i64: 1, 64, 128>}]} {
    %c0 = arith.constant 0 : index
    %c0_0 = arith.constant 0 : index
    %c0_1 = arith.constant 0 : index
    %0 = vector.load %arg1[%c0, %c0_0, %c0_1] : memref<1x64x128xf32, #tpu.memory_space<vmem>>, vector<1x64x128xf32>
    %1 = vector.shape_cast %0 : vector<1x64x128xf32> to vector<64x128xf32>
    %c0_2 = arith.constant 0 : index
    %c0_3 = arith.constant 0 : index
    %c0_4 = arith.constant 0 : index
    %2 = vector.load %arg2[%c0_2, %c0_3, %c0_4] : memref<1x8x256xf32, #tpu.memory_space<vmem>>, vector<1x8x256xf32>
    %3 = vector.shape_cast %2 : vector<1x8x256xf32> to vector<8x256xf32>
    %4 = vector.extract_strided_slice %3 {offsets = [0, 0], sizes = [8, 128], strides = [1, 1]} : vector<8x256xf32> to vector<8x128xf32>
    %5 = vector.extract_strided_slice %3 {offsets = [0, 128], sizes = [8, 128], strides = [1, 1]} : vector<8x256xf32> to vector<8x128xf32>
    %cst = arith.constant 0.176776692 : f32
    %6 = vector.broadcast %cst : f32 to vector<64x128xf32>
    %7 = arith.mulf %1, %6 : vector<64x128xf32>
    %8 = arith.truncf %7 : vector<64x128xf32> to vector<64x128xbf16>
    %9 = arith.truncf %4 : vector<8x128xf32> to vector<8x128xbf16>
    %cst_5 = arith.constant dense<0.000000e+00> : vector<64x8xf32>
    %10 = tpu.matmul %8, %9, %cst_5 {dimension_numbers = #tpu.dot_dimension_numbers<[1], [1], [0], [0], [0, 0, 1, 0], [], []>} : vector<64x128xbf16>, vector<8x128xbf16>, vector<64x8xf32> -> vector<64x8xf32>
    %cst_6 = arith.constant dense<0xFF800000> : vector<64xf32>
    %11 = vector.multi_reduction <maximumf>, %10, %cst_6 [1] : vector<64x8xf32> to vector<64xf32>
    %12 = vector.shape_cast %11 : vector<64xf32> to vector<64x1xf32>
    %13 = vector.broadcast %12 : vector<64x1xf32> to vector<64x8xf32>
    %14 = arith.subf %10, %13 : vector<64x8xf32>
    %15 = math.exp %14 : vector<64x8xf32>
    %cst_7 = arith.constant dense<0.000000e+00> : vector<64xf32>
    %16 = vector.multi_reduction <add>, %15, %cst_7 [1] : vector<64x8xf32> to vector<64xf32>
    %17 = vector.shape_cast %16 : vector<64xf32> to vector<64x1xf32>
    %18 = tpu.reciprocal %17 {approx = true} : vector<64x1xf32> -> vector<64x1xf32>
    %19 = vector.broadcast %18 : vector<64x1xf32> to vector<64x8xf32>
    %20 = arith.mulf %15, %19 : vector<64x8xf32>
    %21 = arith.truncf %20 : vector<64x8xf32> to vector<64x8xbf16>
    %22 = arith.truncf %5 : vector<8x128xf32> to vector<8x128xbf16>
    %cst_8 = arith.constant dense<0.000000e+00> : vector<64x128xf32>
    %23 = tpu.matmul %21, %22, %cst_8 {dimension_numbers = #tpu.dot_dimension_numbers<[1], [0], [0], [1], [0, 0, 1, 1], [], []>} : vector<64x8xbf16>, vector<8x128xbf16>, vector<64x128xf32> -> vector<64x128xf32>
    %c0_9 = arith.constant 0 : index
    %c0_10 = arith.constant 0 : index
    %c0_11 = arith.constant 0 : index
    %24 = vector.load %arg3[%c0_9, %c0_10, %c0_11] : memref<1x64x128xf32, #tpu.memory_space<vmem>>, vector<1x64x128xf32>
    %25 = vector.shape_cast %24 : vector<1x64x128xf32> to vector<64x128xf32>
    %26 = vector.shape_cast %23 : vector<64x128xf32> to vector<1x64x128xf32>
    tpu.vector_store %arg3[%c0_9, %c0_10, %c0_11], %26 {strides = array<i32>} : memref<1x64x128xf32, #tpu.memory_space<vmem>>, vector<1x64x128xf32>,
    return
  }
  func.func @transform_0(%arg0: i32) -> (i32, i32, i32) {
    %c0_i32 = arith.constant 0 : i32
    %c0_i32_0 = arith.constant 0 : i32
    %c0_i32_1 = arith.constant 0 : i32
    return %arg0, %c0_i32, %c0_i32_0 : i32, i32, i32
  }
  func.func @transform_1(%arg0: i32) -> (i32, i32, i32) {
    %c0_i32 = arith.constant 0 : i32
    %c0_i32_0 = arith.constant 0 : i32
    %c0_i32_1 = arith.constant 0 : i32
    return %arg0, %c0_i32, %c0_i32_0 : i32, i32, i32
  }
  func.func @transform_2(%arg0: i32) -> (i32, i32, i32) {
    %c0_i32 = arith.constant 0 : i32
    %c0_i32_0 = arith.constant 0 : i32
    %c0_i32_1 = arith.constant 0 : i32
    return %arg0, %c0_i32, %c0_i32_0 : i32, i32, i32
  }
}

module attributes {stable_mosaic.version = 11 : i64} {
  func.func @_fused_linear_kernel(%arg0: i32, %arg1: i32, %arg2: memref<64x128xf32, #tpu.memory_space<vmem>>, %arg3: memref<64x128xf32, #tpu.memory_space<vmem>>, %arg4: memref<128x128xbf16, #tpu.memory_space<vmem>>, %arg5: memref<1x128xf32, #tpu.memory_space<vmem>>, %arg6: memref<64x128xf32, #tpu.memory_space<vmem>>, %arg7: memref<64x128xf32, #tpu.memory_space<vmem>>) attributes {dimension_semantics = [#tpu.dimension_semantics<parallel>, #tpu.dimension_semantics<arbitrary>], iteration_bounds = array<i64: 2, 1>, scalar_prefetch = 0 : i64, scratch_operands = 1 : i64, tpu.core_type = #tpu.core_type<tc>, window_params = [{transform_indices = @transform_0, window_bounds = array<i64: 64, 128>}, {transform_indices = @transform_1, window_bounds = array<i64: 64, 128>}, {transform_indices = @transform_2, window_bounds = array<i64: 128, 128>}, {pipeline_mode = #tpu.pipeline_mode<synchronous>, transform_indices = @transform_3, window_bounds = array<i64: 1, 128>}, {transform_indices = @transform_4, window_bounds = array<i64: 64, 128>}]} {
    %c0_i32 = arith.constant 0 : i32
    %0 = arith.cmpi eq, %arg1, %c0_i32 : i32
    %1 = arith.extui %0 : i1 to i32
    %c0_i32_0 = arith.constant 0 : i32
    %2 = arith.cmpi ne, %1, %c0_i32_0 : i32
    scf.if %2 {
      %cst_10 = arith.constant 0.000000e+00 : f32
      %13 = vector.broadcast %cst_10 : f32 to vector<64x128xf32>
      %c0_11 = arith.constant 0 : index
      %c0_12 = arith.constant 0 : index
      %14 = vector.load %arg7[%c0_11, %c0_12] : memref<64x128xf32, #tpu.memory_space<vmem>>, vector<64x128xf32>
      tpu.vector_store %arg7[%c0_11, %c0_12], %13 {strides = array<i32>} : memref<64x128xf32, #tpu.memory_space<vmem>>, vector<64x128xf32>,
    } else {
    }
    %c0 = arith.constant 0 : index
    %c0_1 = arith.constant 0 : index
    %3 = vector.load %arg2[%c0, %c0_1] : memref<64x128xf32, #tpu.memory_space<vmem>>, vector<64x128xf32>
    %c0_2 = arith.constant 0 : index
    %c0_3 = arith.constant 0 : index
    %4 = vector.load %arg7[%c0_2, %c0_3] : memref<64x128xf32, #tpu.memory_space<vmem>>, vector<64x128xf32>
    %5 = arith.truncf %3 : vector<64x128xf32> to vector<64x128xbf16>
    %c0_4 = arith.constant 0 : index
    %c0_5 = arith.constant 0 : index
    %6 = vector.load %arg4[%c0_4, %c0_5] : memref<128x128xbf16, #tpu.memory_space<vmem>>, vector<128x128xbf16>
    %cst = arith.constant dense<0.000000e+00> : vector<64x128xf32>
    %7 = tpu.matmul %5, %6, %cst {dimension_numbers = #tpu.dot_dimension_numbers<[1], [0], [0], [1], [0, 0, 1, 1], [], []>} : vector<64x128xbf16>, vector<128x128xbf16>, vector<64x128xf32> -> vector<64x128xf32>
    %8 = arith.addf %4, %7 : vector<64x128xf32>
    %c0_6 = arith.constant 0 : index
    %c0_7 = arith.constant 0 : index
    %9 = vector.load %arg7[%c0_6, %c0_7] : memref<64x128xf32, #tpu.memory_space<vmem>>, vector<64x128xf32>
    tpu.vector_store %arg7[%c0_6, %c0_7], %8 {strides = array<i32>} : memref<64x128xf32, #tpu.memory_space<vmem>>, vector<64x128xf32>,
    %c0_i32_8 = arith.constant 0 : i32
    %10 = arith.cmpi eq, %arg1, %c0_i32_8 : i32
    %11 = arith.extui %10 : i1 to i32
    %c0_i32_9 = arith.constant 0 : i32
    %12 = arith.cmpi ne, %11, %c0_i32_9 : i32
    scf.if %12 {
      %c0_10 = arith.constant 0 : index
      %c0_11 = arith.constant 0 : index
      %13 = vector.load %arg7[%c0_10, %c0_11] : memref<64x128xf32, #tpu.memory_space<vmem>>, vector<64x128xf32>
      %c0_12 = arith.constant 0 : index
      %c0_13 = arith.constant 0 : index
      %14 = vector.load %arg5[%c0_12, %c0_13] : memref<1x128xf32, #tpu.memory_space<vmem>>, vector<1x128xf32>
      %15 = vector.broadcast %14 : vector<1x128xf32> to vector<64x128xf32>
      %16 = arith.addf %13, %15 : vector<64x128xf32>
      %c0_14 = arith.constant 0 : index
      %c0_15 = arith.constant 0 : index
      %17 = vector.load %arg3[%c0_14, %c0_15] : memref<64x128xf32, #tpu.memory_space<vmem>>, vector<64x128xf32>
      %18 = arith.addf %16, %17 : vector<64x128xf32>
      %19 = arith.negf %18 : vector<64x128xf32>
      %20 = math.exp %19 : vector<64x128xf32>
      %cst_16 = arith.constant 1.000000e+00 : f32
      %21 = vector.broadcast %cst_16 : f32 to vector<64x128xf32>
      %22 = arith.addf %21, %20 : vector<64x128xf32>
      %23 = arith.divf %21, %22 : vector<64x128xf32>
      %24 = arith.mulf %18, %23 : vector<64x128xf32>
      %c0_17 = arith.constant 0 : index
      %c0_18 = arith.constant 0 : index
      %25 = vector.load %arg6[%c0_17, %c0_18] : memref<64x128xf32, #tpu.memory_space<vmem>>, vector<64x128xf32>
      tpu.vector_store %arg6[%c0_17, %c0_18], %24 {strides = array<i32>} : memref<64x128xf32, #tpu.memory_space<vmem>>, vector<64x128xf32>,
    } else {
    }
    return
  }
  func.func @transform_0(%arg0: i32, %arg1: i32) -> (i32, i32) {
    %c0_i32 = arith.constant 0 : i32
    return %arg0, %arg1 : i32, i32
  }
  func.func @transform_1(%arg0: i32, %arg1: i32) -> (i32, i32) {
    %c0_i32 = arith.constant 0 : i32
    %c0_i32_0 = arith.constant 0 : i32
    return %arg0, %c0_i32 : i32, i32
  }
  func.func @transform_2(%arg0: i32, %arg1: i32) -> (i32, i32) {
    %c0_i32 = arith.constant 0 : i32
    %c0_i32_0 = arith.constant 0 : i32
    return %arg1, %c0_i32 : i32, i32
  }
  func.func @transform_3(%arg0: i32, %arg1: i32) -> (i32, i32) {
    %c0_i32 = arith.constant 0 : i32
    %c0_i32_0 = arith.constant 0 : i32
    %c0_i32_1 = arith.constant 0 : i32
    return %c0_i32, %c0_i32_0 : i32, i32
  }
  func.func @transform_4(%arg0: i32, %arg1: i32) -> (i32, i32) {
    %c0_i32 = arith.constant 0 : i32
    %c0_i32_0 = arith.constant 0 : i32
    return %arg0, %c0_i32 : i32, i32
  }
}

module attributes {stable_mosaic.version = 11 : i64} {
  func.func @_mse_kernel(%arg0: memref<2x256xf32, #tpu.memory_space<vmem>>, %arg1: memref<2x256xf32, #tpu.memory_space<vmem>>, %arg2: memref<1x1xf32, #tpu.memory_space<smem>>) attributes {dimension_semantics = [], scalar_prefetch = 0 : i64, scratch_operands = 0 : i64, tpu.core_type = #tpu.core_type<tc>} {
    %c0 = arith.constant 0 : index
    %c0_0 = arith.constant 0 : index
    %0 = vector.load %arg0[%c0, %c0_0] : memref<2x256xf32, #tpu.memory_space<vmem>>, vector<2x256xf32>
    %c0_1 = arith.constant 0 : index
    %c0_2 = arith.constant 0 : index
    %1 = vector.load %arg1[%c0_1, %c0_2] : memref<2x256xf32, #tpu.memory_space<vmem>>, vector<2x256xf32>
    %2 = arith.subf %0, %1 : vector<2x256xf32>
    %3 = arith.mulf %2, %2 : vector<2x256xf32>
    %4 = vector.shape_cast %3 : vector<2x256xf32> to vector<1x2x256xf32>
    %cst = arith.constant dense<0.000000e+00> : vector<1xf32>
    %5 = vector.multi_reduction <add>, %4, %cst [1, 2] : vector<1x2x256xf32> to vector<1xf32>
    %6 = vector.shape_cast %5 : vector<1xf32> to vector<1x1x1xf32>
    %7 = vector.extract %6[0, 0, 0] : f32 from vector<1x1x1xf32>
    %cst_3 = arith.constant 0.001953125 : f32
    %8 = arith.mulf %7, %cst_3 : f32
    %c0_4 = arith.constant 0 : index
    %c0_5 = arith.constant 0 : index
    %9 = memref.load %arg2[%c0_4, %c0_5] : memref<1x1xf32, #tpu.memory_space<smem>>
    memref.store %8, %arg2[%c0_4, %c0_5] : memref<1x1xf32, #tpu.memory_space<smem>>
    return
  }
}

module attributes {stable_mosaic.version = 11 : i64} {
  func.func @_conv3x3_kernel(%arg0: i32, %arg1: memref<1x10x10x128xf32, #tpu.memory_space<vmem>>, %arg2: memref<9x128x128xbf16, #tpu.memory_space<vmem>>, %arg3: memref<1x128xf32, #tpu.memory_space<vmem>>, %arg4: memref<1x64x128xf32, #tpu.memory_space<vmem>>) attributes {dimension_semantics = [#tpu.dimension_semantics<parallel>], iteration_bounds = array<i64: 2>, scalar_prefetch = 0 : i64, scratch_operands = 0 : i64, tpu.core_type = #tpu.core_type<tc>, window_params = [{transform_indices = @transform_0, window_bounds = array<i64: 1, 10, 10, 128>}, {pipeline_mode = #tpu.pipeline_mode<synchronous>, transform_indices = @transform_1, window_bounds = array<i64: 9, 128, 128>}, {pipeline_mode = #tpu.pipeline_mode<synchronous>, transform_indices = @transform_2, window_bounds = array<i64: 1, 128>}, {transform_indices = @transform_3, window_bounds = array<i64: 1, 64, 128>}]} {
    %cst = arith.constant 0.000000e+00 : f32
    %0 = vector.broadcast %cst : f32 to vector<64x128xf32>
    %c0 = arith.constant 0 : index
    %c0_0 = arith.constant 0 : index
    %c0_1 = arith.constant 0 : index
    %c0_2 = arith.constant 0 : index
    %1 = vector.load %arg1[%c0, %c0_0, %c0_1, %c0_2] : memref<1x10x10x128xf32, #tpu.memory_space<vmem>>, vector<1x8x8x128xf32>
    %2 = vector.shape_cast %1 : vector<1x8x8x128xf32> to vector<8x8x128xf32>
    %3 = vector.shape_cast %2 : vector<8x8x128xf32> to vector<64x128xf32>
    %4 = arith.truncf %3 : vector<64x128xf32> to vector<64x128xbf16>
    %c0_3 = arith.constant 0 : index
    %c0_4 = arith.constant 0 : index
    %c0_5 = arith.constant 0 : index
    %5 = vector.load %arg2[%c0_3, %c0_4, %c0_5] : memref<9x128x128xbf16, #tpu.memory_space<vmem>>, vector<1x128x128xbf16>
    %6 = vector.shape_cast %5 : vector<1x128x128xbf16> to vector<128x128xbf16>
    %cst_6 = arith.constant dense<0.000000e+00> : vector<64x128xf32>
    %7 = tpu.matmul %4, %6, %cst_6 {dimension_numbers = #tpu.dot_dimension_numbers<[1], [0], [0], [1], [0, 0, 1, 1], [], []>} : vector<64x128xbf16>, vector<128x128xbf16>, vector<64x128xf32> -> vector<64x128xf32>
    %8 = arith.addf %0, %7 : vector<64x128xf32>
    %c0_7 = arith.constant 0 : index
    %c0_8 = arith.constant 0 : index
    %c1 = arith.constant 1 : index
    %c0_9 = arith.constant 0 : index
    %9 = vector.load %arg1[%c0_7, %c0_8, %c1, %c0_9] : memref<1x10x10x128xf32, #tpu.memory_space<vmem>>, vector<1x8x8x128xf32>
    %10 = vector.shape_cast %9 : vector<1x8x8x128xf32> to vector<8x8x128xf32>
    %11 = vector.shape_cast %10 : vector<8x8x128xf32> to vector<64x128xf32>
    %12 = arith.truncf %11 : vector<64x128xf32> to vector<64x128xbf16>
    %c1_10 = arith.constant 1 : index
    %c0_11 = arith.constant 0 : index
    %c0_12 = arith.constant 0 : index
    %13 = vector.load %arg2[%c1_10, %c0_11, %c0_12] : memref<9x128x128xbf16, #tpu.memory_space<vmem>>, vector<1x128x128xbf16>
    %14 = vector.shape_cast %13 : vector<1x128x128xbf16> to vector<128x128xbf16>
    %cst_13 = arith.constant dense<0.000000e+00> : vector<64x128xf32>
    %15 = tpu.matmul %12, %14, %cst_13 {dimension_numbers = #tpu.dot_dimension_numbers<[1], [0], [0], [1], [0, 0, 1, 1], [], []>} : vector<64x128xbf16>, vector<128x128xbf16>, vector<64x128xf32> -> vector<64x128xf32>
    %16 = arith.addf %8, %15 : vector<64x128xf32>
    %c0_14 = arith.constant 0 : index
    %c0_15 = arith.constant 0 : index
    %c2 = arith.constant 2 : index
    %c0_16 = arith.constant 0 : index
    %17 = vector.load %arg1[%c0_14, %c0_15, %c2, %c0_16] : memref<1x10x10x128xf32, #tpu.memory_space<vmem>>, vector<1x8x8x128xf32>
    %18 = vector.shape_cast %17 : vector<1x8x8x128xf32> to vector<8x8x128xf32>
    %19 = vector.shape_cast %18 : vector<8x8x128xf32> to vector<64x128xf32>
    %20 = arith.truncf %19 : vector<64x128xf32> to vector<64x128xbf16>
    %c2_17 = arith.constant 2 : index
    %c0_18 = arith.constant 0 : index
    %c0_19 = arith.constant 0 : index
    %21 = vector.load %arg2[%c2_17, %c0_18, %c0_19] : memref<9x128x128xbf16, #tpu.memory_space<vmem>>, vector<1x128x128xbf16>
    %22 = vector.shape_cast %21 : vector<1x128x128xbf16> to vector<128x128xbf16>
    %cst_20 = arith.constant dense<0.000000e+00> : vector<64x128xf32>
    %23 = tpu.matmul %20, %22, %cst_20 {dimension_numbers = #tpu.dot_dimension_numbers<[1], [0], [0], [1], [0, 0, 1, 1], [], []>} : vector<64x128xbf16>, vector<128x128xbf16>, vector<64x128xf32> -> vector<64x128xf32>
    %24 = arith.addf %16, %23 : vector<64x128xf32>
    %c0_21 = arith.constant 0 : index
    %c1_22 = arith.constant 1 : index
    %c0_23 = arith.constant 0 : index
    %c0_24 = arith.constant 0 : index
    %25 = vector.load %arg1[%c0_21, %c1_22, %c0_23, %c0_24] : memref<1x10x10x128xf32, #tpu.memory_space<vmem>>, vector<1x8x8x128xf32>
    %26 = vector.shape_cast %25 : vector<1x8x8x128xf32> to vector<8x8x128xf32>
    %27 = vector.shape_cast %26 : vector<8x8x128xf32> to vector<64x128xf32>
    %28 = arith.truncf %27 : vector<64x128xf32> to vector<64x128xbf16>
    %c3 = arith.constant 3 : index
    %c0_25 = arith.constant 0 : index
    %c0_26 = arith.constant 0 : index
    %29 = vector.load %arg2[%c3, %c0_25, %c0_26] : memref<9x128x128xbf16, #tpu.memory_space<vmem>>, vector<1x128x128xbf16>
    %30 = vector.shape_cast %29 : vector<1x128x128xbf16> to vector<128x128xbf16>
    %cst_27 = arith.constant dense<0.000000e+00> : vector<64x128xf32>
    %31 = tpu.matmul %28, %30, %cst_27 {dimension_numbers = #tpu.dot_dimension_numbers<[1], [0], [0], [1], [0, 0, 1, 1], [], []>} : vector<64x128xbf16>, vector<128x128xbf16>, vector<64x128xf32> -> vector<64x128xf32>
    %32 = arith.addf %24, %31 : vector<64x128xf32>
    %c0_28 = arith.constant 0 : index
    %c1_29 = arith.constant 1 : index
    %c1_30 = arith.constant 1 : index
    %c0_31 = arith.constant 0 : index
    %33 = vector.load %arg1[%c0_28, %c1_29, %c1_30, %c0_31] : memref<1x10x10x128xf32, #tpu.memory_space<vmem>>, vector<1x8x8x128xf32>
    %34 = vector.shape_cast %33 : vector<1x8x8x128xf32> to vector<8x8x128xf32>
    %35 = vector.shape_cast %34 : vector<8x8x128xf32> to vector<64x128xf32>
    %36 = arith.truncf %35 : vector<64x128xf32> to vector<64x128xbf16>
    %c4 = arith.constant 4 : index
    %c0_32 = arith.constant 0 : index
    %c0_33 = arith.constant 0 : index
    %37 = vector.load %arg2[%c4, %c0_32, %c0_33] : memref<9x128x128xbf16, #tpu.memory_space<vmem>>, vector<1x128x128xbf16>
    %38 = vector.shape_cast %37 : vector<1x128x128xbf16> to vector<128x128xbf16>
    %cst_34 = arith.constant dense<0.000000e+00> : vector<64x128xf32>
    %39 = tpu.matmul %36, %38, %cst_34 {dimension_numbers = #tpu.dot_dimension_numbers<[1], [0], [0], [1], [0, 0, 1, 1], [], []>} : vector<64x128xbf16>, vector<128x128xbf16>, vector<64x128xf32> -> vector<64x128xf32>
    %40 = arith.addf %32, %39 : vector<64x128xf32>
    %c0_35 = arith.constant 0 : index
    %c1_36 = arith.constant 1 : index
    %c2_37 = arith.constant 2 : index
    %c0_38 = arith.constant 0 : index
    %41 = vector.load %arg1[%c0_35, %c1_36, %c2_37, %c0_38] : memref<1x10x10x128xf32, #tpu.memory_space<vmem>>, vector<1x8x8x128xf32>
    %42 = vector.shape_cast %41 : vector<1x8x8x128xf32> to vector<8x8x128xf32>
    %43 = vector.shape_cast %42 : vector<8x8x128xf32> to vector<64x128xf32>
    %44 = arith.truncf %43 : vector<64x128xf32> to vector<64x128xbf16>
    %c5 = arith.constant 5 : index
    %c0_39 = arith.constant 0 : index
    %c0_40 = arith.constant 0 : index
    %45 = vector.load %arg2[%c5, %c0_39, %c0_40] : memref<9x128x128xbf16, #tpu.memory_space<vmem>>, vector<1x128x128xbf16>
    %46 = vector.shape_cast %45 : vector<1x128x128xbf16> to vector<128x128xbf16>
    %cst_41 = arith.constant dense<0.000000e+00> : vector<64x128xf32>
    %47 = tpu.matmul %44, %46, %cst_41 {dimension_numbers = #tpu.dot_dimension_numbers<[1], [0], [0], [1], [0, 0, 1, 1], [], []>} : vector<64x128xbf16>, vector<128x128xbf16>, vector<64x128xf32> -> vector<64x128xf32>
    %48 = arith.addf %40, %47 : vector<64x128xf32>
    %c0_42 = arith.constant 0 : index
    %c2_43 = arith.constant 2 : index
    %c0_44 = arith.constant 0 : index
    %c0_45 = arith.constant 0 : index
    %49 = vector.load %arg1[%c0_42, %c2_43, %c0_44, %c0_45] : memref<1x10x10x128xf32, #tpu.memory_space<vmem>>, vector<1x8x8x128xf32>
    %50 = vector.shape_cast %49 : vector<1x8x8x128xf32> to vector<8x8x128xf32>
    %51 = vector.shape_cast %50 : vector<8x8x128xf32> to vector<64x128xf32>
    %52 = arith.truncf %51 : vector<64x128xf32> to vector<64x128xbf16>
    %c6 = arith.constant 6 : index
    %c0_46 = arith.constant 0 : index
    %c0_47 = arith.constant 0 : index
    %53 = vector.load %arg2[%c6, %c0_46, %c0_47] : memref<9x128x128xbf16, #tpu.memory_space<vmem>>, vector<1x128x128xbf16>
    %54 = vector.shape_cast %53 : vector<1x128x128xbf16> to vector<128x128xbf16>
    %cst_48 = arith.constant dense<0.000000e+00> : vector<64x128xf32>
    %55 = tpu.matmul %52, %54, %cst_48 {dimension_numbers = #tpu.dot_dimension_numbers<[1], [0], [0], [1], [0, 0, 1, 1], [], []>} : vector<64x128xbf16>, vector<128x128xbf16>, vector<64x128xf32> -> vector<64x128xf32>
    %56 = arith.addf %48, %55 : vector<64x128xf32>
    %c0_49 = arith.constant 0 : index
    %c2_50 = arith.constant 2 : index
    %c1_51 = arith.constant 1 : index
    %c0_52 = arith.constant 0 : index
    %57 = vector.load %arg1[%c0_49, %c2_50, %c1_51, %c0_52] : memref<1x10x10x128xf32, #tpu.memory_space<vmem>>, vector<1x8x8x128xf32>
    %58 = vector.shape_cast %57 : vector<1x8x8x128xf32> to vector<8x8x128xf32>
    %59 = vector.shape_cast %58 : vector<8x8x128xf32> to vector<64x128xf32>
    %60 = arith.truncf %59 : vector<64x128xf32> to vector<64x128xbf16>
    %c7 = arith.constant 7 : index
    %c0_53 = arith.constant 0 : index
    %c0_54 = arith.constant 0 : index
    %61 = vector.load %arg2[%c7, %c0_53, %c0_54] : memref<9x128x128xbf16, #tpu.memory_space<vmem>>, vector<1x128x128xbf16>
    %62 = vector.shape_cast %61 : vector<1x128x128xbf16> to vector<128x128xbf16>
    %cst_55 = arith.constant dense<0.000000e+00> : vector<64x128xf32>
    %63 = tpu.matmul %60, %62, %cst_55 {dimension_numbers = #tpu.dot_dimension_numbers<[1], [0], [0], [1], [0, 0, 1, 1], [], []>} : vector<64x128xbf16>, vector<128x128xbf16>, vector<64x128xf32> -> vector<64x128xf32>
    %64 = arith.addf %56, %63 : vector<64x128xf32>
    %c0_56 = arith.constant 0 : index
    %c2_57 = arith.constant 2 : index
    %c2_58 = arith.constant 2 : index
    %c0_59 = arith.constant 0 : index
    %65 = vector.load %arg1[%c0_56, %c2_57, %c2_58, %c0_59] : memref<1x10x10x128xf32, #tpu.memory_space<vmem>>, vector<1x8x8x128xf32>
    %66 = vector.shape_cast %65 : vector<1x8x8x128xf32> to vector<8x8x128xf32>
    %67 = vector.shape_cast %66 : vector<8x8x128xf32> to vector<64x128xf32>
    %68 = arith.truncf %67 : vector<64x128xf32> to vector<64x128xbf16>
    %c8 = arith.constant 8 : index
    %c0_60 = arith.constant 0 : index
    %c0_61 = arith.constant 0 : index
    %69 = vector.load %arg2[%c8, %c0_60, %c0_61] : memref<9x128x128xbf16, #tpu.memory_space<vmem>>, vector<1x128x128xbf16>
    %70 = vector.shape_cast %69 : vector<1x128x128xbf16> to vector<128x128xbf16>
    %cst_62 = arith.constant dense<0.000000e+00> : vector<64x128xf32>
    %71 = tpu.matmul %68, %70, %cst_62 {dimension_numbers = #tpu.dot_dimension_numbers<[1], [0], [0], [1], [0, 0, 1, 1], [], []>} : vector<64x128xbf16>, vector<128x128xbf16>, vector<64x128xf32> -> vector<64x128xf32>
    %72 = arith.addf %64, %71 : vector<64x128xf32>
    %c0_63 = arith.constant 0 : index
    %c0_64 = arith.constant 0 : index
    %73 = vector.load %arg3[%c0_63, %c0_64] : memref<1x128xf32, #tpu.memory_space<vmem>>, vector<1x128xf32>
    %74 = vector.broadcast %73 : vector<1x128xf32> to vector<64x128xf32>
    %75 = arith.addf %72, %74 : vector<64x128xf32>
    %c0_65 = arith.constant 0 : index
    %c0_66 = arith.constant 0 : index
    %c0_67 = arith.constant 0 : index
    %76 = vector.load %arg4[%c0_65, %c0_66, %c0_67] : memref<1x64x128xf32, #tpu.memory_space<vmem>>, vector<1x64x128xf32>
    %77 = vector.shape_cast %76 : vector<1x64x128xf32> to vector<64x128xf32>
    %78 = vector.shape_cast %75 : vector<64x128xf32> to vector<1x64x128xf32>
    tpu.vector_store %arg4[%c0_65, %c0_66, %c0_67], %78 {strides = array<i32>} : memref<1x64x128xf32, #tpu.memory_space<vmem>>, vector<1x64x128xf32>,
    return
  }
  func.func @transform_0(%arg0: i32) -> (i32, i32, i32, i32) {
    %c0_i32 = arith.constant 0 : i32
    %c0_i32_0 = arith.constant 0 : i32
    %c0_i32_1 = arith.constant 0 : i32
    %c0_i32_2 = arith.constant 0 : i32
    return %arg0, %c0_i32, %c0_i32_0, %c0_i32_1 : i32, i32, i32, i32
  }
  func.func @transform_1(%arg0: i32) -> (i32, i32, i32) {
    %c0_i32 = arith.constant 0 : i32
    %c0_i32_0 = arith.constant 0 : i32
    %c0_i32_1 = arith.constant 0 : i32
    %c0_i32_2 = arith.constant 0 : i32
    return %c0_i32, %c0_i32_0, %c0_i32_1 : i32, i32, i32
  }
  func.func @transform_2(%arg0: i32) -> (i32, i32) {
    %c0_i32 = arith.constant 0 : i32
    %c0_i32_0 = arith.constant 0 : i32
    %c0_i32_1 = arith.constant 0 : i32
    return %c0_i32, %c0_i32_0 : i32, i32
  }
  func.func @transform_3(%arg0: i32) -> (i32, i32, i32) {
    %c0_i32 = arith.constant 0 : i32
    %c0_i32_0 = arith.constant 0 : i32
    %c0_i32_1 = arith.constant 0 : i32
    return %arg0, %c0_i32, %c0_i32_0 : i32, i32, i32
  }
}

</mosaic_0001>

<bundles_post_ra>
// kernel: forward.18
= control target key start
LH: loop header
LB: loop body
LE: loop exit
PB: predicated region body
PF: predicated region fallthrough
CT: control target
= control target key end

     0   :  { %s701_s12 = smov 0   ;;  %s703_s13 = smov 0   ;;  %s757_s0 = inlined_call_operand.vmem [shape: f32[128,48], index: 0, kind: input, shape index: {}]   ;;  %s758_s1 = inlined_call_operand.vmem [shape: bf16[48,128], index: 1, kind: input, shape index: {}]   ;;  %s759_s2 = inlined_call_operand.vmem [shape: f32[1,128], index: 2, kind: input, shape index: {}]   ;;  %s760_s3 = inlined_call_operand.vmem [shape: f32[128,128], index: 3, kind: output, shape index: {}]  }
   0x1   :  { %s705_s14 = smov 0  }
   0x2 LB: > { %s25_s15 = sadd.s32 1, %s675_s13  ;;  %p548_p0 = scmp.ge.s32.totalorder %s679_s14, 1  ;;  %s679_s14 = sphi %s705_s14, %s13_s14   ;;  %s675_s13 = sphi %s703_s13, %s762_s13   ;;  %s671_s12 = sphi %s701_s12, %s761_s12  }
   0x3   : > { %p27_p1 = scmp.ge.s32.totalorder %s25_s15, 2  ;;  %p166_p2 = scmp.lt.s32.totalorder %s679_s14, 3 }
   0x5   : > { %s764_s15 = smov (%p27_p1, %s25_s15), 0  ;;  %p167_p3 = pnand %p548_p0, %p166_p2 }
   0x6   : > { %v622_v0 = vld [vmem:[%s758_s1] sm:$0xff] (!%p167_p3)   ;;  %s549_s18 = sshll.u32 (!%p167_p3), %s671_s12, 3  ;;  %v623_v1 = vld [vmem:[%s758_s1 + $0x8] sm:$0xff] (!%p167_p3)   ;;  %v624_v2 = vld [vmem:[%s758_s1 + $0x10] sm:$0xff] (!%p167_p3)   ;;  %vm276_vm0 = vcmask (!%p167_p3), 392192  }
   0x7   : > { %170 = sbr.rel (%p167_p3) target bundleno = 271 (0x10f), region = 32  ;;  %p199_p4 = scmp.lt.s32.totalorder (!%p167_p3), %s549_s18, 15  ;;  %578 = vmatprep.subr.bf16.mxu0 (!%p167_p3), %v622_v0  ;;  %592 = vmatprep.subr.bf16.mxu1 (!%p167_p3), %v622_v0  ;;  %v560_v15 = vld [vmem:[%s759_s2] ss:$0 sm:$0xff] (!%p167_p3) }
   0x8   : > { %579 = vmatpush3.bf16.msra.mxu0 (!%p167_p3), %v622_v0  ;;  %595 = vmatpush3.bf16.msra.mxu1 (!%p167_p3), %v622_v0 }
   0x9   : > { %580 = vmatprep.subr.bf16.mxu0 (!%p167_p3), %v623_v1  ;;  %593 = vmatprep.subr.bf16.mxu1 (!%p167_p3), %v623_v1 }
   0xc   : > { %581 = vmatpush3.bf16.msra.mxu0 (!%p167_p3), %v623_v1  ;;  %596 = vmatpush3.bf16.msra.mxu1 (!%p167_p3), %v623_v1 }
   0xd   : > { %582 = vmatprep.subr.bf16.mxu0 (!%p167_p3), %v624_v2  ;;  %594 = vmatprep.subr.bf16.mxu1 (!%p167_p3), %v624_v2 }
   0xe   : > { %s766_s18 = smov (!%p199_p4, %s549_s18), 15 }
   0xf   : > { %s550_s23 = sshll.u32 %s766_s18, 3 }
  0x10   : > { %s205_s26 = scalar_lea.vmem %s757_s0, %s550_s23  ;;  %583 = vmatpush3.bf16.msra.mxu0 %v624_v2  ;;  %597 = vmatpush3.bf16.msra.mxu1 %v624_v2  ;;  %s217_s4 = scalar_lea.vmem %s760_s3, %s550_s23 }
  0x11   : > { %v232_v3 = vld [vmem:[%s205_s26] sm:$0xff]  ;;  %v233_v4 = vld [vmem:[%s205_s26 + $0x8] sm:$0xff]  ;;  %v234_v8 = vld [vmem:[%s205_s26 + $0x10] sm:$0xff] }
  0x12   : > { %v236_v5 = vld [vmem:[%s205_s26 + $0x20] sm:$0xff]  ;;  %v248_v6 = vpack.c.bf16 %v233_v4, %v232_v3  ;;  %v237_v7 = vld [vmem:[%s205_s26 + $0x28] sm:$0xff]  ;;  %v235_v9 = vld [vmem:[%s205_s26 + $0x18] sm:$0xff] }
  0x13   : > { %v250_v10 = vpack.c.bf16 %v237_v7, %v236_v5  ;;  %v238_v11 = vld [vmem:[%s205_s26 + $0x30] sm:$0xff]  ;;  %v239_v12 = vld [vmem:[%s205_s26 + $0x38] sm:$0xff]  ;;  %v249_v13 = vpack.c.bf16 %v235_v9, %v234_v8 }
  0x14   : > { %584 = vmatprep.mubr.msk.bf16.mxu0 %vm276_vm0, %v248_v6  ;;  %v251_v14 = vpack.c.bf16 %v239_v12, %v238_v11 }
  0x15   : > { %588 = vmatprep.mubr.msk.bf16.mxu1 %vm276_vm0, %v250_v10  ;;  %585 = vmatmul.mubr.msk.bf16.vlgmr.msra.gmra.mrb[0].mxu0 %vm276_vm0, %v249_v13 }
  0x16   : > { %589 = vmatmul.mubr.msk.bf16.vlgmr.msra.gmra.mrb[0].mxu1 %vm276_vm0, %v251_v14 }
  0xe8   : > { %v586_v16 = vpop.f32.mrb[0].mxu0 }
  0xe9   : > { %v590_v17 = vpop.f32.mrb[0].mxu1  ;;  %v390_v18 = vadd.f32 %v586_v16, %v560_v15  ;;  %v323_v20 = vpop.f32.mrb[1].mxu0 }
  0xea   : > { %v394_v19 = vadd.f32 %v590_v17, %v560_v15  ;;  %v339_v21 = vpop.f32.mrb[1].mxu1  ;;  %v388_v22 = vadd.f32 %v560_v15, %v323_v20  ;;  %v587_v24 = vpop.f32.mrb[2].mxu0 }
  0xeb   : > { %v392_v23 = vadd.f32 %v560_v15, %v339_v21  ;;  %v591_v25 = vpop.f32.mrb[2].mxu1  ;;  %v563_v26 = vmul.f32 -1.442695, %v390_v18  ;;  %v391_v28 = vadd.f32 %v587_v24, %v560_v15  ;;  %v326_v30 = vpop.f32.mrb[3].mxu0 }
  0xec   : > { %v567_v27 = vmul.f32 -1.442695, %v394_v19  ;;  %v395_v29 = vadd.f32 %v591_v25, %v560_v15  ;;  %v342_v31 = vpop.f32.mrb[3].mxu1  ;;  %v561_v32 = vmul.f32 -1.442695, %v388_v22  ;;  %v389_v34 = vadd.f32 %v560_v15, %v326_v30 }
  0xed   : > { %v565_v33 = vmul.f32 -1.442695, %v392_v23  ;;  %v393_v35 = vadd.f32 %v560_v15, %v342_v31  ;;  %625 = vpow2.f32 %v563_v26  ;;  %v564_v36 = vmul.f32 -1.442695, %v391_v28 }
  0xee   : > { %627 = vpow2.f32 %v567_v27  ;;  %v568_v37 = vmul.f32 -1.442695, %v395_v29  ;;  %v562_v38 = vmul.f32 -1.442695, %v389_v34 }
  0xef   : > { %629 = vpow2.f32 %v561_v32  ;;  %v566_v39 = vmul.f32 -1.442695, %v393_v35 }
  0xf0   : > { %631 = vpow2.f32 %v565_v33 }
  0xf1   : > { %633 = vpow2.f32 %v564_v36 }
  0xf2   : > { %635 = vpow2.f32 %v568_v37 }
  0xf3   : > { %637 = vpow2.f32 %v562_v38 }
  0xf4   : > { %639 = vpow2.f32 %v566_v39 }
  0xf7   : > { %v626_v40 = vpop.eup %625 }
  0xf8   : > { %v628_v41 = vpop.eup %627  ;;  %v422_v42 = vadd.f32 1.0, %v626_v40 }
  0xf9   : > { %v630_v43 = vpop.eup %629  ;;  %v426_v44 = vadd.f32 1.0, %v628_v41 }
  0xfa   : > { %v632_v45 = vpop.eup %631  ;;  %641 = vrcp.f32 %v422_v42  ;;  %v420_v46 = vadd.f32 1.0, %v630_v43 }
  0xfb   : > { %v634_v47 = vpop.eup %633  ;;  %643 = vrcp.f32 %v426_v44  ;;  %v424_v48 = vadd.f32 1.0, %v632_v45 }
  0xfc   : > { %v636_v49 = vpop.eup %635  ;;  %645 = vrcp.f32 %v420_v46  ;;  %v423_v50 = vadd.f32 1.0, %v634_v47 }
  0xfd   : > { %v638_v51 = vpop.eup %637  ;;  %647 = vrcp.f32 %v424_v48  ;;  %v427_v52 = vadd.f32 1.0, %v636_v49 }
  0xfe   : > { %v640_v53 = vpop.eup %639  ;;  %649 = vrcp.f32 %v423_v50  ;;  %v421_v54 = vadd.f32 1.0, %v638_v51 }
  0xff   : > { %651 = vrcp.f32 %v427_v52  ;;  %v425_v55 = vadd.f32 1.0, %v640_v53 }
 0x100   : > { %653 = vrcp.f32 %v421_v54 }
 0x101   : > { %655 = vrcp.f32 %v425_v55 }
 0x104   : > { %v642_v56 = vpop.eup %641 }
 0x105   : > { %v644_v57 = vpop.eup %643  ;;  %v446_v58 = vmul.f32 %v642_v56, %v390_v18 }
 0x106   : > { %v646_v59 = vpop.eup %645  ;;  %v450_v60 = vmul.f32 %v644_v57, %v394_v19 }
 0x107   : > { %v648_v61 = vpop.eup %647  ;;  %454 = vst [vmem:[%s217_s4 + $0x10] sm:$0xff] %v446_v58  ;;  %v444_v62 = vmul.f32 %v646_v59, %v388_v22 }
 0x108   : > { %v650_v63 = vpop.eup %649  ;;  %458 = vst [vmem:[%s217_s4 + $0x30] sm:$0xff] %v450_v60  ;;  %v448_v0 = vmul.f32 %v648_v61, %v392_v23 }
 0x109   : > { %v652_v1 = vpop.eup %651  ;;  %452 = vst [vmem:[%s217_s4] sm:$0xff] %v444_v62  ;;  %v447_v2 = vmul.f32 %v650_v63, %v391_v28 }
 0x10a   : > { %v654_v3 = vpop.eup %653  ;;  %456 = vst [vmem:[%s217_s4 + $0x20] sm:$0xff] %v448_v0  ;;  %v451_v4 = vmul.f32 %v652_v1, %v395_v29 }
 0x10b   : > { %v656_v5 = vpop.eup %655  ;;  %455 = vst [vmem:[%s217_s4 + $0x18] sm:$0xff] %v447_v2  ;;  %v445_v6 = vmul.f32 %v654_v3, %v389_v34 }
 0x10c   : > { %459 = vst [vmem:[%s217_s4 + $0x38] sm:$0xff] %v451_v4  ;;  %v449_v7 = vmul.f32 %v656_v5, %v393_v35 }
 0x10d   : > { %453 = vst [vmem:[%s217_s4 + $0x8] sm:$0xff] %v445_v6 }
 0x10e   : > { %457 = vst [vmem:[%s217_s4 + $0x28] sm:$0xff] %v449_v7 }
 0x10f PF: > { %s13_s14 = sadd.s32 1, %s679_s14   ;;  %s761_s12 = smov %s675_s13 }
 0x110   : > { %p10_p5 = scmp.ge.s32.totalorder %s13_s14, 4   ;;  %s762_s13 = smov %s764_s15 }
 0x112   :  { %12 = sbr.rel (!%p10_p5) target bundleno = 2 (0x2), region = 73 }

// kernel: forward.19
= control target key start
LH: loop header
LB: loop body
LE: loop exit
PB: predicated region body
PF: predicated region fallthrough
CT: control target
= control target key end

     0   :  { %s663_s12 = smov 0   ;;  %s665_s13 = smov 0   ;;  %s740_s0 = inlined_call_operand.vmem [shape: f32[128,128], index: 0, kind: input, shape index: {}]   ;;  %s741_s1 = inlined_call_operand.vmem [shape: bf16[128,128], index: 1, kind: input, shape index: {}]   ;;  %s742_s2 = inlined_call_operand.vmem [shape: f32[1,128], index: 2, kind: input, shape index: {}]   ;;  %s743_s3 = inlined_call_operand.vmem [shape: f32[128,128], index: 3, kind: output, shape index: {}]  }
   0x1   :  { %s667_s14 = smov 0  }
   0x2 LB: > { %s25_s15 = sadd.s32 1, %s637_s13  ;;  %p519_p0 = scmp.ge.s32.totalorder %s641_s14, 1  ;;  %s641_s14 = sphi %s667_s14, %s13_s14   ;;  %s637_s13 = sphi %s665_s13, %s745_s13   ;;  %s633_s12 = sphi %s663_s12, %s744_s12  }
   0x3   : > { %p27_p1 = scmp.ge.s32.totalorder %s25_s15, 2  ;;  %p166_p2 = scmp.lt.s32.totalorder %s641_s14, 3 }
   0x5   : > { %s747_s15 = smov (%p27_p1, %s25_s15), 0  ;;  %p167_p3 = pnand %p519_p0, %p166_p2 }
   0x6   : > { %v611_v0 = vld [vmem:[%s741_s1] sm:$0xff] (!%p167_p3)   ;;  %s520_s18 = sshll.u32 (!%p167_p3), %s633_s12, 3  ;;  %v612_v1 = vld [vmem:[%s741_s1 + $0x8] sm:$0xff] (!%p167_p3)   ;;  %v613_v2 = vld [vmem:[%s741_s1 + $0x10] sm:$0xff] (!%p167_p3)  }
   0x7   : > { %170 = sbr.rel (%p167_p3) target bundleno = 258 (0x102), region = 32  ;;  %p199_p4 = scmp.lt.s32.totalorder (!%p167_p3), %s520_s18, 15  ;;  %547 = vmatprep.subr.bf16.mxu0 (!%p167_p3), %v611_v0  ;;  %571 = vmatprep.subr.bf16.mxu1 (!%p167_p3), %v611_v0  ;;  %v614_v3 = vld [vmem:[%s741_s1 + $0x18] sm:$0xff] (!%p167_p3)   ;;  %v615_v10 = vld [vmem:[%s741_s1 + $0x20] sm:$0xff] (!%p167_p3)   ;;  %v616_v11 = vld [vmem:[%s741_s1 + $0x28] sm:$0xff] (!%p167_p3)  }
   0x8   : > { %548 = vmatpush3.bf16.msra.mxu0 (!%p167_p3), %v611_v0  ;;  %579 = vmatpush3.bf16.msra.mxu1 (!%p167_p3), %v611_v0  ;;  %v617_v12 = vld [vmem:[%s741_s1 + $0x30] sm:$0xff] (!%p167_p3)   ;;  %v618_v13 = vld [vmem:[%s741_s1 + $0x38] sm:$0xff] (!%p167_p3)   ;;  %v532_v20 = vld [vmem:[%s742_s2] ss:$0 sm:$0xff] (!%p167_p3) }
   0x9   : > { %549 = vmatprep.subr.bf16.mxu0 (!%p167_p3), %v612_v1  ;;  %572 = vmatprep.subr.bf16.mxu1 (!%p167_p3), %v612_v1 }
   0xc   : > { %550 = vmatpush3.bf16.msra.mxu0 (!%p167_p3), %v612_v1  ;;  %580 = vmatpush3.bf16.msra.mxu1 (!%p167_p3), %v612_v1 }
   0xd   : > { %551 = vmatprep.subr.bf16.mxu0 (!%p167_p3), %v613_v2  ;;  %573 = vmatprep.subr.bf16.mxu1 (!%p167_p3), %v613_v2 }
   0xe   : > { %s749_s18 = smov (!%p199_p4, %s520_s18), 15 }
   0xf   : > { %s521_s23 = sshll.u32 %s749_s18, 3 }
  0x10   : > { %s698_s26 = scalar_lea.vmem %s740_s0, %s521_s23  ;;  %552 = vmatpush3.bf16.msra.mxu0 %v613_v2  ;;  %581 = vmatpush3.bf16.msra.mxu1 %v613_v2  ;;  %s217_s17 = scalar_lea.vmem %s743_s3, %s521_s23 }
  0x11   : > { %v232_v4 = vld [vmem:[%s698_s26] sm:$0xff]  ;;  %v233_v5 = vld [vmem:[%s698_s26 + $0x8] sm:$0xff]  ;;  %553 = vmatprep.subr.bf16.mxu0 %v614_v3  ;;  %574 = vmatprep.subr.bf16.mxu1 %v614_v3  ;;  %v234_v14 = vld [vmem:[%s698_s26 + $0x10] sm:$0xff] }
  0x12   : > { %v236_v6 = vld [vmem:[%s698_s26 + $0x20] sm:$0xff]  ;;  %v248_v7 = vpack.c.bf16 %v233_v5, %v232_v4  ;;  %v237_v8 = vld [vmem:[%s698_s26 + $0x28] sm:$0xff]  ;;  %v235_v15 = vld [vmem:[%s698_s26 + $0x18] sm:$0xff] }
  0x13   : > { %v250_v9 = vpack.c.bf16 %v237_v8, %v236_v6  ;;  %v238_v16 = vld [vmem:[%s698_s26 + $0x30] sm:$0xff]  ;;  %v239_v17 = vld [vmem:[%s698_s26 + $0x38] sm:$0xff]  ;;  %v249_v18 = vpack.c.bf16 %v235_v15, %v234_v14 }
  0x14   : > { %563 = vmatprep.mubr.bf16.mxu0 %v248_v7  ;;  %554 = vmatpush3.bf16.msra.mxu0 %v614_v3  ;;  %v251_v19 = vpack.c.bf16 %v239_v17, %v238_v16 }
  0x15   : > { %567 = vmatprep.mubr.bf16.mxu1 %v250_v9  ;;  %582 = vmatpush3.bf16.msra.mxu1 %v614_v3 }
  0x16   : > { %555 = vmatprep.subr.bf16.mxu0 %v615_v10  ;;  %575 = vmatprep.subr.bf16.mxu1 %v615_v10 }
  0x18   : > { %556 = vmatpush3.bf16.msra.mxu0 %v615_v10 }
  0x19   : > { %583 = vmatpush3.bf16.msra.mxu1 %v615_v10  ;;  %557 = vmatprep.subr.bf16.mxu0 %v616_v11 }
  0x1a   : > { %576 = vmatprep.subr.bf16.mxu1 %v616_v11 }
  0x1c   : > { %558 = vmatpush3.bf16.msra.mxu0 %v616_v11 }
  0x1d   : > { %584 = vmatpush3.bf16.msra.mxu1 %v616_v11  ;;  %559 = vmatprep.subr.bf16.mxu0 %v617_v12 }
  0x1e   : > { %577 = vmatprep.subr.bf16.mxu1 %v617_v12 }
  0x20   : > { %560 = vmatpush3.bf16.msra.mxu0 %v617_v12 }
  0x21   : > { %585 = vmatpush3.bf16.msra.mxu1 %v617_v12  ;;  %561 = vmatprep.subr.bf16.mxu0 %v618_v13 }
  0x22   : > { %578 = vmatprep.subr.bf16.mxu1 %v618_v13 }
  0x24   : > { %562 = vmatpush3.bf16.msra.mxu0 %v618_v13 }
  0x25   : > { %586 = vmatpush3.bf16.msra.mxu1 %v618_v13 }
  0x27   : > { %564 = vmatmul.mubr.bf16.vlgmr.msra.gmra.mrb[0].mxu0 %v249_v18 }
  0x28   : > { %568 = vmatmul.mubr.bf16.vlgmr.msra.gmra.mrb[0].mxu1 %v251_v19 }
  0xfa   : > { %v565_v21 = vpop.f32.mrb[0].mxu0 }
  0xfb   : > { %v569_v22 = vpop.f32.mrb[0].mxu1  ;;  %v417_v23 = vadd.f32 %v565_v21, %v532_v20  ;;  %v350_v25 = vpop.f32.mrb[1].mxu0 }
  0xfc   : > { %v421_v24 = vadd.f32 %v569_v22, %v532_v20  ;;  %v366_v26 = vpop.f32.mrb[1].mxu1  ;;  %v415_v27 = vadd.f32 %v532_v20, %v350_v25  ;;  %v566_v29 = vpop.f32.mrb[2].mxu0 }
  0xfd   : > { %v419_v28 = vadd.f32 %v532_v20, %v366_v26  ;;  %v570_v30 = vpop.f32.mrb[2].mxu1  ;;  %425 = vst [vmem:[%s217_s17 + $0x10] sm:$0xff] %v417_v23  ;;  %v418_v31 = vadd.f32 %v566_v29, %v532_v20  ;;  %v353_v33 = vpop.f32.mrb[3].mxu0 }
  0xfe   : > { %429 = vst [vmem:[%s217_s17 + $0x30] sm:$0xff] %v421_v24  ;;  %v422_v32 = vadd.f32 %v570_v30, %v532_v20  ;;  %v369_v34 = vpop.f32.mrb[3].mxu1  ;;  %423 = vst [vmem:[%s217_s17] sm:$0xff] %v415_v27  ;;  %v416_v35 = vadd.f32 %v532_v20, %v353_v33 }
  0xff   : > { %427 = vst [vmem:[%s217_s17 + $0x20] sm:$0xff] %v419_v28  ;;  %v420_v36 = vadd.f32 %v532_v20, %v369_v34  ;;  %426 = vst [vmem:[%s217_s17 + $0x18] sm:$0xff] %v418_v31 }
 0x100   : > { %430 = vst [vmem:[%s217_s17 + $0x38] sm:$0xff] %v422_v32  ;;  %424 = vst [vmem:[%s217_s17 + $0x8] sm:$0xff] %v416_v35 }
 0x101   : > { %428 = vst [vmem:[%s217_s17 + $0x28] sm:$0xff] %v420_v36 }
 0x102 PF: > { %s13_s14 = sadd.s32 1, %s641_s14   ;;  %s744_s12 = smov %s637_s13 }
 0x103   : > { %p10_p5 = scmp.ge.s32.totalorder %s13_s14, 4   ;;  %s745_s13 = smov %s747_s15 }
 0x105   :  { %12 = sbr.rel (!%p10_p5) target bundleno = 2 (0x2), region = 73 }

// kernel: forward.20
= control target key start
LH: loop header
LB: loop body
LE: loop exit
PB: predicated region body
PF: predicated region fallthrough
CT: control target
= control target key end

     0   :  { %v98_v0 = vmov 0   ;;  %v99_v10 = vmov 1983009808   ;;  %v44_v12 = vlaneseq  ;;  %s156_s4 = inlined_call_operand.vmem [shape: f32[2,1], index: 4, kind: input, shape index: {}]   ;;  %s157_s5 = inlined_call_operand.vmem [shape: f32[2,1], index: 5, kind: input, shape index: {}]   ;;  %s158_s1 = inlined_call_operand.vmem [shape: f32[2,256], index: 1, kind: input, shape index: {}]   ;;  %s159_s2 = inlined_call_operand.vmem [shape: f32[2,256], index: 2, kind: input, shape index: {}]   ;;  %s160_s0 = inlined_call_operand.vmem [shape: f32[2,256], index: 0, kind: input, shape index: {}]   ;;  %s161_s3 = inlined_call_operand.vmem [shape: f32[2,256], index: 3, kind: input, shape index: {}]   ;;  %s162_s6 = inlined_call_operand.vmem [shape: f32[2,256], index: 6, kind: output, shape index: {}]  }
   0x1   :  { %95 = vset.pattern.permute.xlu0 %v98_v0  ;;  %v34_v1 = vld [vmem:[%s156_s4] sm:$0x3]  ;;  %v42_v11 = vunpack.c.l.s4 %v99_v10 }
   0x2   :  { %37 = vperm.xlu0 %95, %v34_v1   ;;  %v53_v2 = vld [vmem:[%s157_s5] sm:$0x3]  ;;  %v45_v16 = vshrl.u32 %v44_v12, 7 }
   0x3   :  { %v23_v3 = vld [vmem:[%s158_s1] sm:$0xf]  ;;  %v43_v15 = vunpack.c.0.s8 %v42_v11 }
   0x4   :  { %v24_v4 = vmax.f32 %v23_v3, -30.0  ;;  %v30_v9 = vld [vmem:[%s159_s2] sm:$0xf] }
   0x5   :  { %v29_v14 = vld [vmem:[%s160_s0] sm:$0xf]  ;;  %v46_v18 = vsub.s32 %v43_v15, %v45_v16 }
   0x6   :  { %57 = vperm.xlu0 %95, %v53_v2   ;;  %v25_v5 = vmin.f32 %v24_v4, 20.0  ;;  %v91_v21 = vld.sshfl [vmem:[%s161_s3] sm:$0x33 pattern:$0x76325410] }
   0x7   :  { %v68_v24 = vcombine.high %v91_v21, %v91_v21 }
   0x8   :  { %v26_v6 = vmul.f32 0.5, %v25_v5 }
   0xa   :  { %v27_v7 = vmul.f32 1.442695, %v26_v6 }
   0xc   :  { %96 = vpow2.f32 %v27_v7 }
  0x16   :  { %v97_v8 = vpop.eup %96 }
  0x17   :  { %v31_v13 = vmul.f32 %v97_v8, %v30_v9 }
  0x19   :  { %v32_v17 = vadd.f32 %v31_v13, %v29_v14 }
  0x1b   :  { %v33_v19 = vmul.f32 0.18215, %v32_v17 }
  0x1d   :  { %v47_v20 = vrot.slane %v33_v19, %v46_v18 }
  0x1f   :  { %v48_v23 = vcombine.high %v47_v20, %v47_v20 }
  0x81   :  { %v38_v22 = vpop.permute.xlu0 %37 }
  0x82   :  { %v51_v26 = vmul.f32 %v47_v20, %v38_v22  ;;  %v52_v27 = vmul.f32 %v48_v23, %v38_v22 }
  0x85   :  { %v58_v25 = vpop.permute.xlu0 %57 }
  0x86   :  { %v71_v28 = vmul.f32 %v91_v21, %v58_v25  ;;  %v72_v29 = vmul.f32 %v68_v24, %v58_v25 }
  0x88   :  { %v73_v30 = vadd.f32 %v71_v28, %v51_v26  ;;  %v74_v31 = vadd.f32 %v72_v29, %v52_v27 }
  0x8a   :  { %v77_v32 = vcombine.low %v73_v30, %v74_v31 }
  0x8c   :  { %92 = vst.sshfl [vmem:[%s162_s6] sm:$0x33 pattern:$0x76325410] %v77_v32 }

// kernel: forward.21
= control target key start
LH: loop header
LB: loop body
LE: loop exit
PB: predicated region body
PF: predicated region fallthrough
CT: control target
= control target key end

     0   :  { %v357_v0 = vmov 0.0   ;;  %vm358_vm0 = vmmov 0   ;;  %s449_s1 = inlined_call_operand.vmem [shape: bf16[128,128], index: 1, kind: input, shape index: {}]   ;;  %s450_s0 = inlined_call_operand.vmem [shape: f32[2,128], index: 0, kind: input, shape index: {}]   ;;  %s451_s3 = inlined_call_operand.vmem [shape: bf16[128,128], index: 3, kind: input, shape index: {}]   ;;  %s452_s2 = inlined_call_operand.vmem [shape: f32[1,128], index: 2, kind: input, shape index: {}]   ;;  %s453_s4 = inlined_call_operand.vmem [shape: f32[1,128], index: 4, kind: input, shape index: {}]   ;;  %s454_s5 = inlined_call_operand.vmem [shape: f32[2,128], index: 5, kind: output, shape index: {}]  }
   0x1   :  { %295 = vmatprep.subr.bf16.mxu0 %v357_v0  ;;  %v337_v1 = vld [vmem:[%s449_s1] sm:$0xff]   ;;  %311 = vmatprep.mubr.msk.bf16.mxu0 %vm358_vm0, %v357_v0  ;;  %v338_v2 = vld [vmem:[%s449_s1 + $0x8] sm:$0xff]   ;;  %v339_v3 = vld [vmem:[%s449_s1 + $0x10] sm:$0xff]  }
   0x2   :  { %315 = vmatprep.subr.bf16.mxu1 %v357_v0  ;;  %331 = vmatprep.mubr.msk.bf16.mxu1 %vm358_vm0, %v357_v0  ;;  %v340_v4 = vld [vmem:[%s449_s1 + $0x18] sm:$0xff]   ;;  %v341_v5 = vld [vmem:[%s449_s1 + $0x20] sm:$0xff]   ;;  %v342_v6 = vld [vmem:[%s449_s1 + $0x28] sm:$0xff]  }
   0x3   :  { %296 = vmatpush3.bf16.msra.mxu0 %v337_v1  ;;  %v343_v7 = vld [vmem:[%s449_s1 + $0x30] sm:$0xff]   ;;  %v344_v8 = vld [vmem:[%s449_s1 + $0x38] sm:$0xff]   ;;  %v21_v9 = vld [vmem:[%s450_s0] sm:$0x3] }
   0x4   :  { %297 = vmatprep.subr.bf16.mxu0 %v357_v0  ;;  %v22_v10 = vpack.c.bf16 %v21_v9, %v21_v9  ;;  %v345_v11 = vld [vmem:[%s451_s3] sm:$0xff]   ;;  %v346_v12 = vld [vmem:[%s451_s3 + $0x8] sm:$0xff]   ;;  %v347_v13 = vld [vmem:[%s451_s3 + $0x10] sm:$0xff]  }
   0x5   :  { %316 = vmatpush3.bf16.msra.mxu1 %v345_v11  ;;  %v348_v14 = vld [vmem:[%s451_s3 + $0x18] sm:$0xff]   ;;  %v349_v15 = vld [vmem:[%s451_s3 + $0x20] sm:$0xff]   ;;  %v350_v16 = vld [vmem:[%s451_s3 + $0x28] sm:$0xff]  }
   0x6   :  { %317 = vmatprep.subr.bf16.mxu1 %v357_v0  ;;  %v351_v17 = vld [vmem:[%s451_s3 + $0x30] sm:$0xff]   ;;  %v352_v18 = vld [vmem:[%s451_s3 + $0x38] sm:$0xff]   ;;  %v258_v19 = vld [vmem:[%s452_s2] ss:$0 sm:$0xff] }
   0x7   :  { %298 = vmatpush3.bf16.msra.mxu0 %v338_v2  ;;  %v268_v31 = vld [vmem:[%s453_s4] ss:$0 sm:$0xff] }
   0x8   :  { %299 = vmatprep.subr.bf16.mxu0 %v357_v0 }
   0x9   :  { %318 = vmatpush3.bf16.msra.mxu1 %v346_v12 }
   0xa   :  { %319 = vmatprep.subr.bf16.mxu1 %v357_v0 }
   0xb   :  { %300 = vmatpush3.bf16.msra.mxu0 %v339_v3 }
   0xc   :  { %301 = vmatprep.subr.bf16.mxu0 %v357_v0 }
   0xd   :  { %320 = vmatpush3.bf16.msra.mxu1 %v347_v13 }
   0xe   :  { %321 = vmatprep.subr.bf16.mxu1 %v357_v0 }
   0xf   :  { %302 = vmatpush3.bf16.msra.mxu0 %v340_v4 }
  0x10   :  { %303 = vmatprep.subr.bf16.mxu0 %v357_v0 }
  0x11   :  { %322 = vmatpush3.bf16.msra.mxu1 %v348_v14 }
  0x12   :  { %323 = vmatprep.subr.bf16.mxu1 %v357_v0 }
  0x13   :  { %304 = vmatpush3.bf16.msra.mxu0 %v341_v5 }
  0x14   :  { %305 = vmatprep.subr.bf16.mxu0 %v357_v0 }
  0x15   :  { %324 = vmatpush3.bf16.msra.mxu1 %v349_v15 }
  0x16   :  { %325 = vmatprep.subr.bf16.mxu1 %v357_v0 }
  0x17   :  { %306 = vmatpush3.bf16.msra.mxu0 %v342_v6 }
  0x18   :  { %307 = vmatprep.subr.bf16.mxu0 %v357_v0 }
  0x19   :  { %326 = vmatpush3.bf16.msra.mxu1 %v350_v16 }
  0x1a   :  { %327 = vmatprep.subr.bf16.mxu1 %v357_v0 }
  0x1b   :  { %308 = vmatpush3.bf16.msra.mxu0 %v343_v7 }
  0x1c   :  { %309 = vmatprep.subr.bf16.mxu0 %v357_v0 }
  0x1d   :  { %328 = vmatpush3.bf16.msra.mxu1 %v351_v17 }
  0x1e   :  { %329 = vmatprep.subr.bf16.mxu1 %v357_v0 }
  0x1f   :  { %310 = vmatpush3.bf16.msra.mxu0 %v344_v8 }
  0x21   :  { %330 = vmatpush3.bf16.msra.mxu1 %v352_v18 }
  0x22   :  { %312 = vmatmul.mubr.bf16.vlgmr.msra.gmra.mrb[0].mxu0 %v22_v10 }
  0xf5   :  { %v128_v20 = vpop.f32.mrb[0].mxu0 }
  0xf6   :  { %v129_v21 = vadd.f32 %v258_v19, %v128_v20  ;;  %v313_v22 = vpop.f32.mrb[1].mxu0 }
  0xf7   :  { %v131_v23 = vpop.f32.mrb[2].mxu0 }
  0xf8   :  { %v267_v24 = vmul.f32 -1.442695, %v129_v21  ;;  %v314_v25 = vpop.f32.mrb[3].mxu0 }
  0xfa   :  { %353 = vpow2.f32 %v267_v24 }
 0x104   :  { %v354_v26 = vpop.eup %353 }
 0x105   :  { %v137_v27 = vadd.f32 1.0, %v354_v26 }
 0x107   :  { %355 = vrcp.f32 %v137_v27 }
 0x111   :  { %v356_v28 = vpop.eup %355 }
 0x112   :  { %v140_v29 = vmul.f32 %v356_v28, %v129_v21 }
 0x114   :  { %v141_v30 = vpack.c.bf16 %v140_v29, %v140_v29 }
 0x116   :  { %332 = vmatmul.mubr.bf16.vlgmr.msra.gmra.mrb[0].mxu1 %v141_v30 }
 0x1e9   :  { %v247_v32 = vpop.f32.mrb[0].mxu1 }
 0x1ea   :  { %v248_v33 = vadd.f32 %v268_v31, %v247_v32  ;;  %v333_v34 = vpop.f32.mrb[1].mxu1 }
 0x1eb   :  { %v250_v35 = vpop.f32.mrb[2].mxu1 }
 0x1ec   :  { %253 = vst [vmem:[%s454_s5] sm:$0x3] %v248_v33  ;;  %v334_v36 = vpop.f32.mrb[3].mxu1 }

// kernel: forward.24
= control target key start
LH: loop header
LB: loop body
LE: loop exit
PB: predicated region body
PF: predicated region fallthrough
CT: control target
= control target key end

     0   :  { %v477_v2 = vmov 0.0   ;;  %v478_v24 = vmov 0   ;;  %vm479_vm0 = vmmov 0   ;;  %v352_v57 = vlaneseq  ;;  %s636_s0 = inlined_call_operand.vmem [shape: f32[16,128], index: 0, kind: input, shape index: {}]   ;;  %s637_s1 = inlined_call_operand.vmem [shape: bf16[128,384], index: 1, kind: input, shape index: {}]   ;;  %s638_s3 = inlined_call_operand.vmem [shape: f32[1,128], index: 3, kind: input, shape index: {}]   ;;  %s639_s4 = inlined_call_operand.vmem [shape: f32[1,128], index: 4, kind: input, shape index: {}]   ;;  %s640_s2 = inlined_call_operand.vmem [shape: f32[1,384], index: 2, kind: input, shape index: {}]   ;;  %s641_s5 = inlined_call_operand.vmem [shape: f32[16,384], index: 5, kind: output, shape index: {}]  }
   0x1   :  { %v513_v0 = vld [vmem:[%s636_s0] sm:$0xff]  ;;  %v518_v1 = vld [vmem:[%s636_s0 + $0x8] sm:$0xff]  ;;  %418 = vmatprep.subr.bf16.mxu1 %v477_v2  ;;  %v451_v12 = vld [vmem:[%s637_s1 + $0x30] ss:$12 sps:$4 sm:$0xff]   ;;  %277 = vmatprep.mubr.bf16.mxu0 %v478_v24 }
   0x2   :  { %33 = vadd.xlane.f32.xlu0 %v513_v0  ;;  %v40_v3 = vmul.f32 %v513_v0, %v513_v0  ;;  %v441_v4 = vld [vmem:[%s637_s1 + $0x4] ss:$12 sps:$4 sm:$0xff]   ;;  %v41_v5 = vmul.f32 %v518_v1, %v518_v1  ;;  %v443_v6 = vld [vmem:[%s637_s1] ss:$12 sps:$4 sm:$0xff]   ;;  %v444_v7 = vld [vmem:[%s637_s1 + $0x8] ss:$12 sps:$4 sm:$0xff]   ;;  %434 = vmatprep.mubr.msk.bf16.mxu1 %vm479_vm0, %v477_v2 }
   0x3   :  { %245 = vmatprep.subr.bf16.mxu0 %v441_v4  ;;  %419 = vmatpush3.bf16.msra.mxu1 %v444_v7  ;;  %v445_v8 = vld [vmem:[%s637_s1 + $0x1c] ss:$12 sps:$4 sm:$0xff]   ;;  %v447_v9 = vld [vmem:[%s637_s1 + $0x18] ss:$12 sps:$4 sm:$0xff]   ;;  %v448_v10 = vld [vmem:[%s637_s1 + $0x20] ss:$12 sps:$4 sm:$0xff]  }
   0x4   :  { %42 = vadd.xlane.f32.xlu1 %v40_v3  ;;  %246 = vmatpush1.bf16.msra.mxu0 %v443_v6  ;;  %v449_v11 = vld [vmem:[%s637_s1 + $0x34] ss:$12 sps:$4 sm:$0xff]   ;;  %v452_v13 = vld [vmem:[%s637_s1 + $0x38] ss:$12 sps:$4 sm:$0xff]   ;;  %v456_v16 = vld [vmem:[%s637_s1 + $0x50] ss:$12 sps:$4 sm:$0xff]  }
   0x5   :  { %420 = vmatprep.subr.bf16.mxu1 %v477_v2  ;;  %247 = vmatprep.subr.bf16.mxu0 %v445_v8  ;;  %v453_v14 = vld [vmem:[%s637_s1 + $0x4c] ss:$12 sps:$4 sm:$0xff]   ;;  %v455_v15 = vld [vmem:[%s637_s1 + $0x48] ss:$12 sps:$4 sm:$0xff]   ;;  %v457_v17 = vld [vmem:[%s637_s1 + $0x64] ss:$12 sps:$4 sm:$0xff]  }
   0x6   :  { %35 = vadd.xlane.f32.xlu0 %v518_v1  ;;  %v459_v18 = vld [vmem:[%s637_s1 + $0x60] ss:$12 sps:$4 sm:$0xff]   ;;  %v460_v19 = vld [vmem:[%s637_s1 + $0x68] ss:$12 sps:$4 sm:$0xff]   ;;  %v463_v21 = vld [vmem:[%s637_s1 + $0x78] ss:$12 sps:$4 sm:$0xff]  }
   0x7   :  { %421 = vmatpush3.bf16.msra.mxu1 %v448_v10  ;;  %v461_v20 = vld [vmem:[%s637_s1 + $0x7c] ss:$12 sps:$4 sm:$0xff]   ;;  %v464_v22 = vld [vmem:[%s637_s1 + $0x80] ss:$12 sps:$4 sm:$0xff]   ;;  %v468_v26 = vld [vmem:[%s637_s1 + $0x98] ss:$12 sps:$4 sm:$0xff]  }
   0x8   :  { %44 = vadd.xlane.f32.xlu1 %v41_v5  ;;  %248 = vmatpush1.bf16.msra.mxu0 %v447_v9  ;;  %v465_v23 = vld [vmem:[%s637_s1 + $0x94] ss:$12 sps:$4 sm:$0xff]   ;;  %v467_v25 = vld [vmem:[%s637_s1 + $0x90] ss:$12 sps:$4 sm:$0xff]   ;;  %v469_v27 = vld [vmem:[%s637_s1 + $0xac] ss:$12 sps:$4 sm:$0xff]  }
   0x9   :  { %422 = vmatprep.subr.bf16.mxu1 %v477_v2  ;;  %249 = vmatprep.subr.bf16.mxu0 %v449_v11  ;;  %v471_v28 = vld [vmem:[%s637_s1 + $0xa8] ss:$12 sps:$4 sm:$0xff]   ;;  %v472_v29 = vld [vmem:[%s637_s1 + $0xb0] ss:$12 sps:$4 sm:$0xff]   ;;  %v383_v47 = vld [vmem:[%s638_s3] ss:$0 sm:$0xff] }
   0xa   :  { %v384_v52 = vld [vmem:[%s639_s4] ss:$0 sm:$0xff]  ;;  %v353_v58 = vshrl.u32 %v352_v57, 7 }
   0xb   :  { %423 = vmatpush3.bf16.msra.mxu1 %v452_v13  ;;  %v350_v61 = vld [vmem:[%s640_s2] sm:$0x7] }
   0xc   :  { %250 = vmatpush1.bf16.msra.mxu0 %v451_v12  ;;  %424 = vmatprep.subr.bf16.mxu1 %v477_v2  ;;  %v354_v59 = vsub.s32 0, %v353_v58  ;;  %v362_v60 = vsub.s32 2, %v353_v58  ;;  %v358_v62 = vsub.s32 1, %v353_v58 }
   0xd   :  { %251 = vmatprep.subr.bf16.mxu0 %v453_v14 }
   0xe   :  { %v355_v63 = vrot.slane %v350_v61, %v354_v59 }
   0xf   :  { %425 = vmatpush3.bf16.msra.mxu1 %v456_v16 }
  0x10   :  { %252 = vmatpush1.bf16.msra.mxu0 %v455_v15  ;;  %426 = vmatprep.subr.bf16.mxu1 %v477_v2 }
  0x11   :  { %253 = vmatprep.subr.bf16.mxu0 %v457_v17 }
  0x13   :  { %427 = vmatpush3.bf16.msra.mxu1 %v460_v19 }
  0x14   :  { %254 = vmatpush1.bf16.msra.mxu0 %v459_v18  ;;  %428 = vmatprep.subr.bf16.mxu1 %v477_v2 }
  0x15   :  { %255 = vmatprep.subr.bf16.mxu0 %v461_v20 }
  0x17   :  { %429 = vmatpush3.bf16.msra.mxu1 %v464_v22 }
  0x18   :  { %256 = vmatpush1.bf16.msra.mxu0 %v463_v21  ;;  %430 = vmatprep.subr.bf16.mxu1 %v477_v2 }
  0x19   :  { %257 = vmatprep.subr.bf16.mxu0 %v465_v23 }
  0x1b   :  { %431 = vmatpush3.bf16.msra.mxu1 %v468_v26 }
  0x1c   :  { %258 = vmatpush1.bf16.msra.mxu0 %v467_v25  ;;  %432 = vmatprep.subr.bf16.mxu1 %v477_v2 }
  0x1d   :  { %259 = vmatprep.subr.bf16.mxu0 %v469_v27 }
  0x1f   :  { %433 = vmatpush3.bf16.msra.mxu1 %v472_v29 }
  0x20   :  { %260 = vmatpush1.bf16.msra.mxu0 %v471_v28 }
  0x8f   :  { %v34_v30 = vpop.xlane.xlu0 %33 }
  0x90   :  { %v38_v31 = vmul.f32 0.03125, %v34_v30 }
  0x91   :  { %v43_v32 = vpop.xlane.xlu1 %42 }
  0x92   :  { %v48_v33 = vmul.f32 %v38_v31, %v38_v31  ;;  %v46_v34 = vmul.f32 0.03125, %v43_v32  ;;  %v52_v44 = vsub.f32 %v513_v0, %v38_v31  ;;  %v363_v0 = vrot.slane %v350_v61, %v362_v60 }
  0x93   :  { %v36_v35 = vpop.xlane.xlu0 %35 }
  0x94   :  { %v50_v36 = vsub.f32 %v46_v34, %v48_v33  ;;  %v39_v37 = vmul.f32 0.03125, %v36_v35 }
  0x95   :  { %v45_v38 = vpop.xlane.xlu1 %44 }
  0x96   :  { %v54_v39 = vadd.f32 1e-05, %v50_v36  ;;  %v49_v40 = vmul.f32 %v39_v37, %v39_v37  ;;  %v47_v41 = vmul.f32 0.03125, %v45_v38  ;;  %v53_v48 = vsub.f32 %v518_v1, %v39_v37 }
  0x97   :  { %v359_v1 = vrot.slane %v350_v61, %v358_v62 }
  0x98   :  { %473 = vrsqrt.f32 %v54_v39  ;;  %v51_v42 = vsub.f32 %v47_v41, %v49_v40 }
  0x9a   :  { %v55_v43 = vadd.f32 1e-05, %v51_v42 }
  0x9c   :  { %475 = vrsqrt.f32 %v55_v43 }
  0xa2   :  { %v474_v45 = vpop.eup %473 }
  0xa3   :  { %v58_v46 = vmul.f32 %v474_v45, %v52_v44 }
  0xa5   :  { %v67_v51 = vmul.f32 %v383_v47, %v58_v46 }
  0xa6   :  { %v476_v49 = vpop.eup %475 }
  0xa7   :  { %v59_v50 = vmul.f32 %v476_v49, %v53_v48  ;;  %v76_v54 = vadd.f32 %v384_v52, %v67_v51 }
  0xa9   :  { %v68_v53 = vmul.f32 %v383_v47, %v59_v50 }
  0xab   :  { %v77_v55 = vadd.f32 %v384_v52, %v68_v53 }
  0xad   :  { %v84_v56 = vpack.c.bf16 %v77_v55, %v76_v54 }
  0xaf   :  { %278 = vmatmul.mubr.bf16.vlgmr.msra.gmra.mrb[0].mxu0 %v84_v56  ;;  %435 = vmatmul.mubr.bf16.vlgmr.msra.gmra.mrb[0].mxu1 %v84_v56 }
 0x182   :  { %v279_v2 = vpop.f32.mrb[0].mxu0  ;;  %v322_v3 = vpop.f32.mrb[0].mxu1 }
 0x183   :  { %v367_v4 = vadd.f32 %v355_v63, %v279_v2  ;;  %v369_v5 = vadd.f32 %v363_v0, %v322_v3  ;;  %v281_v6 = vpop.f32.mrb[1].mxu0  ;;  %v436_v7 = vpop.f32.mrb[1].mxu1 }
 0x184   :  { %v368_v8 = vadd.f32 %v359_v1, %v281_v6  ;;  %v283_v9 = vpop.f32.mrb[2].mxu0  ;;  %v325_v10 = vpop.f32.mrb[2].mxu1 }
 0x185   :  { %373 = vst [vmem:[%s641_s5] sm:$0xff] %v367_v4  ;;  %375 = vst [vmem:[%s641_s5 + $0x10] sm:$0xff] %v369_v5  ;;  %v370_v11 = vadd.f32 %v355_v63, %v283_v9  ;;  %v372_v12 = vadd.f32 %v363_v0, %v325_v10  ;;  %v285_v13 = vpop.f32.mrb[3].mxu0  ;;  %v437_v14 = vpop.f32.mrb[3].mxu1 }
 0x186   :  { %374 = vst [vmem:[%s641_s5 + $0x8] sm:$0xff] %v368_v8  ;;  %v371_v15 = vadd.f32 %v359_v1, %v285_v13 }
 0x187   :  { %376 = vst [vmem:[%s641_s5 + $0x18] sm:$0xff] %v370_v11  ;;  %378 = vst [vmem:[%s641_s5 + $0x28] sm:$0xff] %v372_v12 }
 0x188   :  { %377 = vst [vmem:[%s641_s5 + $0x20] sm:$0xff] %v371_v15 }

// kernel: forward.25
= control target key start
LH: loop header
LB: loop body
LE: loop exit
PB: predicated region body
PF: predicated region fallthrough
CT: control target
= control target key end

     0   :  { %s344_s6 = smov 0   ;;  %s368_s0 = inlined_call_operand.vmem [shape: f32[2,8,384], index: 0, kind: input, shape index: {}]   ;;  %s369_s1 = inlined_call_operand.vmem [shape: f32[2,8,128], index: 1, kind: output, shape index: {}]  }
   0x1 LB: > { %s283_s7 = sadd.s32 4294967295, %s330_s6   ;;  %p287_p0 = scmp.ge.s32.totalorder %s330_s6, 1  ;;  %s330_s6 = sphi %s344_s6, %s11_s6  }
   0x2   : > { %p87_p1 = scmp.lt.s32.totalorder %s330_s6, 3 }
   0x4   : > { %p88_p2 = pnand %p287_p0, %p87_p1 }
   0x5   : > { %p106_p3 = scmp.lt.s32.totalorder (!%p88_p2), %s283_s7, 1  ;;  %v332_v0 = vmov (!%p88_p2), 0.0   ;;  %vm333_vm0 = vmmov (!%p88_p2), 0   ;;  %v162_v6 = vlaneseq (!%p88_p2)  ;;  %vm168_vm2 = vcmask (!%p88_p2), 64512  }
   0x6   : > { %91 = sbr.rel (%p88_p2) target bundleno = 771 (0x303), region = 24  ;;  %297 = vmatprep.subr.bf16.mxu0 (!%p88_p2), %v332_v0  ;;  %299 = vmatprep.mubr.msk.bf16.mxu0 (!%p88_p2), %vm333_vm0, %v332_v0  ;;  %vm185_vm3 = vcmask (!%p88_p2), 1043456  }
   0x7   : > { %303 = vmatprep.subr.bf16.mxu1 (!%p88_p2), %v332_v0  ;;  %305 = vmatprep.mubr.msk.bf16.mxu1 (!%p88_p2), %vm333_vm0, %v332_v0  ;;  %v163_v7 = vshrl.u32 (!%p88_p2), %v162_v6, 7  ;;  %v165_v8 = vand.u32 (!%p88_p2), 127, %v162_v6 }
   0x9   : > { %vm166_vm1 = vcmp.le.s32.totalorder (!%p88_p2), %v165_v8, %v163_v7 }
   0xd   : > { %s371_s7 = smov (!%p106_p3, %s283_s7), 1 }
   0xe   : > { %s309_s8 = smul.u32 24, %s371_s7  ;;  %s289_s12 = sshll.u32 %s371_s7, 3 }
   0xf   : > { %s114_s15 = scalar_lea.vmem %s369_s1, %s289_s12 }
  0x10   : > { %s110_s11 = scalar_lea.vmem %s368_s0, %s309_s8 }
  0x11   : > { %v117_v1 = vld [vmem:[%s110_s11 + $0x8] sm:$0xff]  ;;  %v116_v2 = vld [vmem:[%s110_s11] sm:$0xff]  ;;  %v118_v20 = vld [vmem:[%s110_s11 + $0x10] sm:$0xff] }
  0x12   : > { %v121_v3 = vpack.c.bf16 %v117_v1, %v117_v1  ;;  %v119_v4 = vmul.f32 0.17677669, %v116_v2  ;;  %v181_v21 = vpack.c.bf16 %v118_v20, %v118_v20 }
  0x14   : > { %298 = vmatpush3.bf16.xpose.msra.mxu0 %v121_v3  ;;  %v120_v5 = vpack.c.bf16 %v119_v4, %v119_v4  ;;  %v187_v22 = vsel %vm185_vm3, %v181_v21, 0 }
  0x15   : > { %304 = vmatpush3.bf16.msra.mxu1 %v187_v22 }
  0x1b   : > { %300 = vmatmul.mubr.bf16.vlgmr.msra.gmra.mrb[0].mxu0 %v120_v5 }
  0xee   : > { %v156_v9 = vpop.f32.mrb[0].mxu0 }
  0xef   : > { %v167_v10 = vsel %vm166_vm1, %v156_v9, -1e+09  ;;  %v301_v11 = vpop.f32.mrb[1].mxu0 }
  0xf0   : > { %v159_v12 = vpop.f32.mrb[2].mxu0  ;;  %v169_v13 = vsel %vm168_vm2, %v167_v10, -inf }
  0xf1   : > { %170 = vmax.xlane.f32.xlu0 %v169_v13  ;;  %v302_v14 = vpop.f32.mrb[3].mxu0 }
 0x17e   : > { %v171_v15 = vpop.xlane.xlu0 %170 }
 0x17f   : > { %v172_v16 = vsub.f32 %v167_v10, %v171_v15 }
 0x181   : > { %v173_v17 = vmul.f32 1.442695, %v172_v16 }
 0x183   : > { %320 = vpow2.f32 %v173_v17 }
 0x18d   : > { %v321_v18 = vpop.eup %320 }
 0x18e   : > { %v175_v19 = vsel %vm168_vm2, %v321_v18, 0.0 }
 0x18f   : > { %176 = vadd.xlane.f32.xlu0 %v175_v19 }
 0x21c   : > { %v177_v23 = vpop.xlane.xlu0 %176 }
 0x21d   : > { %322 = vrcp.f32 %v177_v23 }
 0x227   : > { %v323_v24 = vpop.eup %322 }
 0x228   : > { %v179_v25 = vmul.f32 %v323_v24, %v321_v18 }
 0x22a   : > { %v180_v26 = vpack.c.bf16 %v179_v25, %v179_v25 }
 0x22c   : > { %306 = vmatmul.mubr.msk.bf16.vlgmr.msra.gmra.mrb[0].mxu1 %vm168_vm2, %v180_v26 }
 0x2ff   : > { %v223_v27 = vpop.f32.mrb[0].mxu1 }
 0x300   : > { %229 = vst [vmem:[%s114_s15] sm:$0xff] %v223_v27  ;;  %v307_v28 = vpop.f32.mrb[1].mxu1 }
 0x301   : > { %v226_v29 = vpop.f32.mrb[2].mxu1 }
 0x302   : > { %v308_v30 = vpop.f32.mrb[3].mxu1 }
 0x303 PF: > { %s11_s6 = sadd.s32 1, %s330_s6  }
 0x304   : > { %p8_p4 = scmp.ge.s32.totalorder %s11_s6, 4  }
 0x306   :  { %10 = sbr.rel (!%p8_p4) target bundleno = 1 (0x1), region = 54 }

// kernel: forward.26
= control target key start
LH: loop header
LB: loop body
LE: loop exit
PB: predicated region body
PF: predicated region fallthrough
CT: control target
= control target key end

     0   :  { %v210_v0 = vmov 0.0   ;;  %vm211_vm0 = vmmov 0   ;;  %s282_s2 = inlined_call_operand.vmem [shape: bf16[128,128], index: 2, kind: input, shape index: {}]   ;;  %s283_s0 = inlined_call_operand.vmem [shape: f32[16,128], index: 0, kind: input, shape index: {}]   ;;  %s284_s3 = inlined_call_operand.vmem [shape: f32[1,128], index: 3, kind: input, shape index: {}]   ;;  %s285_s1 = inlined_call_operand.vmem [shape: f32[16,128], index: 1, kind: input, shape index: {}]   ;;  %s286_s4 = inlined_call_operand.vmem [shape: f32[16,128], index: 4, kind: output, shape index: {}]  }
   0x1   :  { %180 = vmatprep.subr.bf16.mxu0 %v210_v0  ;;  %v202_v1 = vld [vmem:[%s282_s2] sm:$0xff]   ;;  %196 = vmatprep.mubr.msk.bf16.mxu0 %vm211_vm0, %v210_v0  ;;  %v203_v2 = vld [vmem:[%s282_s2 + $0x8] sm:$0xff]   ;;  %v204_v3 = vld [vmem:[%s282_s2 + $0x10] sm:$0xff]  }
   0x2   :  { %181 = vmatpush3.bf16.msra.mxu0 %v202_v1  ;;  %v205_v4 = vld [vmem:[%s282_s2 + $0x18] sm:$0xff]   ;;  %v206_v5 = vld [vmem:[%s282_s2 + $0x20] sm:$0xff]   ;;  %v207_v6 = vld [vmem:[%s282_s2 + $0x28] sm:$0xff]  }
   0x3   :  { %182 = vmatprep.subr.bf16.mxu0 %v210_v0  ;;  %v208_v7 = vld [vmem:[%s282_s2 + $0x30] sm:$0xff]   ;;  %v209_v8 = vld [vmem:[%s282_s2 + $0x38] sm:$0xff]   ;;  %v24_v9 = vld [vmem:[%s283_s0] sm:$0xff] }
   0x4   :  { %v25_v10 = vld [vmem:[%s283_s0 + $0x8] sm:$0xff]  ;;  %v170_v12 = vld [vmem:[%s284_s3] ss:$0 sm:$0xff] }
   0x5   :  { %v28_v11 = vpack.c.bf16 %v25_v10, %v24_v9  ;;  %v152_v14 = vld [vmem:[%s285_s1] sm:$0xff]  ;;  %v153_v18 = vld [vmem:[%s285_s1 + $0x8] sm:$0xff] }
   0x6   :  { %183 = vmatpush3.bf16.msra.mxu0 %v203_v2 }
   0x7   :  { %184 = vmatprep.subr.bf16.mxu0 %v210_v0 }
   0xa   :  { %185 = vmatpush3.bf16.msra.mxu0 %v204_v3 }
   0xb   :  { %186 = vmatprep.subr.bf16.mxu0 %v210_v0 }
   0xe   :  { %187 = vmatpush3.bf16.msra.mxu0 %v205_v4 }
   0xf   :  { %188 = vmatprep.subr.bf16.mxu0 %v210_v0 }
  0x12   :  { %189 = vmatpush3.bf16.msra.mxu0 %v206_v5 }
  0x13   :  { %190 = vmatprep.subr.bf16.mxu0 %v210_v0 }
  0x16   :  { %191 = vmatpush3.bf16.msra.mxu0 %v207_v6 }
  0x17   :  { %192 = vmatprep.subr.bf16.mxu0 %v210_v0 }
  0x1a   :  { %193 = vmatpush3.bf16.msra.mxu0 %v208_v7 }
  0x1b   :  { %194 = vmatprep.subr.bf16.mxu0 %v210_v0 }
  0x1e   :  { %195 = vmatpush3.bf16.msra.mxu0 %v209_v8 }
  0x21   :  { %197 = vmatmul.mubr.bf16.vlgmr.msra.gmra.mrb[0].mxu0 %v28_v11 }
  0xf4   :  { %v127_v13 = vpop.f32.mrb[0].mxu0 }
  0xf5   :  { %v150_v15 = vadd.f32 %v170_v12, %v127_v13  ;;  %v198_v16 = vpop.f32.mrb[1].mxu0 }
  0xf6   :  { %v130_v17 = vpop.f32.mrb[2].mxu0 }
  0xf7   :  { %v154_v19 = vadd.f32 %v152_v14, %v150_v15  ;;  %v151_v20 = vadd.f32 %v170_v12, %v130_v17  ;;  %v199_v21 = vpop.f32.mrb[3].mxu0 }
  0xf9   :  { %156 = vst [vmem:[%s286_s4] sm:$0xff] %v154_v19  ;;  %v155_v22 = vadd.f32 %v153_v18, %v151_v20 }
  0xfb   :  { %157 = vst [vmem:[%s286_s4 + $0x8] sm:$0xff] %v155_v22 }

// kernel: forward.22
= control target key start
LH: loop header
LB: loop body
LE: loop exit
PB: predicated region body
PF: predicated region fallthrough
CT: control target
= control target key end

     0   :  { %s2525_s15 = smov 0   ;;  %s2897_s0 = inlined_call_operand.vmem [shape: f32[2,10,10,128], index: 0, kind: input, shape index: {}]   ;;  %s2898_s1 = inlined_call_operand.vmem [shape: bf16[9,128,128], index: 1, kind: input, shape index: {}]   ;;  %s2899_s2 = inlined_call_operand.vmem [shape: f32[1,128], index: 2, kind: input, shape index: {}]   ;;  %s2900_s3 = inlined_call_operand.vmem [shape: f32[2,1,128], index: 3, kind: input, shape index: {}]   ;;  %s2901_s4 = inlined_call_operand.vmem [shape: f32[2,64,128], index: 4, kind: output, shape index: {}]  }
   0x1 LB: > { %s1706_s16 = sadd.s32 4294967295, %s2498_s15   ;;  %p1710_p0 = scmp.ge.s32.totalorder %s2498_s15, 1  ;;  %s2498_s15 = sphi %s2525_s15, %s14_s15  }
   0x2   : > { %p170_p1 = scmp.lt.s32.totalorder %s2498_s15, 3 }
   0x4   : > { %p171_p2 = pnand %p1710_p0, %p170_p1 }
   0x5   : > { %v2388_v0 = vld [vmem:[%s2898_s1 + $0x40] sm:$0xff] (!%p171_p2)   ;;  %p199_p3 = scmp.lt.s32.totalorder (!%p171_p2), %s1706_s16, 1  ;;  %v2390_v2 = vld [vmem:[%s2898_s1 + $0x48] sm:$0xff] (!%p171_p2)   ;;  %v2392_v4 = vld [vmem:[%s2898_s1 + $0x50] sm:$0xff] (!%p171_p2)  }
   0x6   : > { %174 = sbr.rel (%p171_p2) target bundleno = 420 (0x1a4), region = 36  ;;  %v2389_v1 = vld [vmem:[%s2898_s1 + $0x100] sm:$0xff] (!%p171_p2)   ;;  %2083 = vmatprep.subr.bf16.mxu1 (!%p171_p2), %v2388_v0  ;;  %v2391_v3 = vld [vmem:[%s2898_s1 + $0x108] sm:$0xff] (!%p171_p2)   ;;  %v2393_v5 = vld [vmem:[%s2898_s1 + $0x110] sm:$0xff] (!%p171_p2)  }
   0x7   : > { %2179 = vmatprep.subr.bf16.mxu0 (!%p171_p2), %v2389_v1  ;;  %2084 = vmatpush3.bf16.msra.mxu1 (!%p171_p2), %v2388_v0  ;;  %v2394_v6 = vld [vmem:[%s2898_s1 + $0x58] sm:$0xff] (!%p171_p2)   ;;  %v2396_v8 = vld [vmem:[%s2898_s1 + $0x60] sm:$0xff] (!%p171_p2)   ;;  %v2398_v10 = vld [vmem:[%s2898_s1 + $0x68] sm:$0xff] (!%p171_p2)  }
   0x8   : > { %2180 = vmatpush3.bf16.msra.mxu0 (!%p171_p2), %v2389_v1  ;;  %2085 = vmatprep.subr.bf16.mxu1 (!%p171_p2), %v2390_v2  ;;  %v2395_v7 = vld [vmem:[%s2898_s1 + $0x118] sm:$0xff] (!%p171_p2)   ;;  %v2397_v9 = vld [vmem:[%s2898_s1 + $0x120] sm:$0xff] (!%p171_p2)   ;;  %v2399_v13 = vld [vmem:[%s2898_s1 + $0x128] sm:$0xff] (!%p171_p2)  }
   0x9   : > { %2181 = vmatprep.subr.bf16.mxu0 (!%p171_p2), %v2391_v3  ;;  %v2400_v17 = vld [vmem:[%s2898_s1 + $0x70] sm:$0xff] (!%p171_p2)   ;;  %v2402_v19 = vld [vmem:[%s2898_s1 + $0x78] sm:$0xff] (!%p171_p2)   ;;  %v2404_v21 = vld [vmem:[%s2898_s1] sm:$0xff] (!%p171_p2)  }
   0xa   : > { %v2401_v18 = vld [vmem:[%s2898_s1 + $0x130] sm:$0xff] (!%p171_p2)   ;;  %v2403_v20 = vld [vmem:[%s2898_s1 + $0x138] sm:$0xff] (!%p171_p2)   ;;  %v2405_v24 = vld [vmem:[%s2898_s1 + $0x140] sm:$0xff] (!%p171_p2)  }
   0xb   : > { %2086 = vmatpush3.bf16.msra.mxu1 (!%p171_p2), %v2390_v2  ;;  %v2406_v29 = vld [vmem:[%s2898_s1 + $0x8] sm:$0xff] (!%p171_p2)   ;;  %v2408_v34 = vld [vmem:[%s2898_s1 + $0x10] sm:$0xff] (!%p171_p2)   ;;  %v2410_v43 = vld [vmem:[%s2898_s1 + $0x18] sm:$0xff] (!%p171_p2)  }
   0xc   : > { %2182 = vmatpush3.bf16.msra.mxu0 (!%p171_p2), %v2391_v3  ;;  %2087 = vmatprep.subr.bf16.mxu1 (!%p171_p2), %v2392_v4  ;;  %v2407_v30 = vld [vmem:[%s2898_s1 + $0x148] sm:$0xff] (!%p171_p2)   ;;  %v2409_v36 = vld [vmem:[%s2898_s1 + $0x150] sm:$0xff] (!%p171_p2)   ;;  %v2411_v44 = vld [vmem:[%s2898_s1 + $0x158] sm:$0xff] (!%p171_p2)  }
   0xd   : > { %s2903_s16 = smov (!%p199_p3, %s1706_s16), 1  ;;  %2183 = vmatprep.subr.bf16.mxu0 %v2393_v5  ;;  %v2412_v47 = vld [vmem:[%s2898_s1 + $0x20] sm:$0xff]   ;;  %v2414_v49 = vld [vmem:[%s2898_s1 + $0x28] sm:$0xff]   ;;  %v2416_v51 = vld [vmem:[%s2898_s1 + $0x30] sm:$0xff]  }
   0xe   : > { %s2379_s7 = smul.u32 160, %s2903_s16  ;;  %v2413_v48 = vld [vmem:[%s2898_s1 + $0x160] sm:$0xff]   ;;  %v2415_v50 = vld [vmem:[%s2898_s1 + $0x168] sm:$0xff]   ;;  %v2417_v52 = vld [vmem:[%s2898_s1 + $0x170] sm:$0xff]   ;;  %s206_s27 = scalar_lea.vmem %s2900_s3, %s2903_s16 }
   0xf   : > { %2088 = vmatpush3.bf16.msra.mxu1 %v2392_v4  ;;  %v2418_v53 = vld [vmem:[%s2898_s1 + $0x38] sm:$0xff]   ;;  %v2420_v57 = vld [vmem:[%s2898_s1 + $0x80] sm:$0xff]   ;;  %v2422_v0 = vld [vmem:[%s2898_s1 + $0x88] sm:$0xff]   ;;  %s1974_s30 = sshll.u32 %s2903_s16, 6 }
  0x10   : > { %2184 = vmatpush3.bf16.msra.mxu0 %v2393_v5  ;;  %2089 = vmatprep.subr.bf16.mxu1 %v2394_v6  ;;  %s2569_s14 = scalar_lea.vmem %s2897_s0, %s2379_s7  ;;  %v2419_v54 = vld [vmem:[%s2898_s1 + $0x178] sm:$0xff]   ;;  %v2421_v59 = vld [vmem:[%s2898_s1 + $0x180] sm:$0xff]   ;;  %v2423_v4 = vld [vmem:[%s2898_s1 + $0x188] sm:$0xff]   ;;  %s211_s7 = scalar_lea.vmem %s2901_s4, %s1974_s30 }
  0x11   : > { %2185 = vmatprep.subr.bf16.mxu0 %v2395_v7  ;;  %v241_v11 = vld [vmem:[%s2569_s14 + $0x1] sm:$0xff]  ;;  %v242_v12 = vld [vmem:[%s2569_s14 + $0x11] sm:$0xff] }
  0x12   : > { %v249_v14 = vpack.c.bf16 %v242_v12, %v241_v11  ;;  %v1803_v15 = vld [vmem:[%s2569_s14 + $0x21] sm:$0xff]  ;;  %v244_v22 = vld [vmem:[%s2569_s14 + $0x31] sm:$0xff] }
  0x13   : > { %2090 = vmatpush3.bf16.msra.mxu1 %v2394_v6  ;;  %v805_v16 = vpack.c.bf16 %v1803_v15, %v242_v12  ;;  %v1805_v23 = vld [vmem:[%s2569_s14 + $0x41] sm:$0xff]  ;;  %v2600_v25 = vpack.c.bf16 %v244_v22, %v1803_v15  ;;  %v246_v26 = vld [vmem:[%s2569_s14 + $0x51] sm:$0xff] }
  0x14   : > { %2186 = vmatpush3.bf16.msra.mxu0 %v2395_v7  ;;  %2091 = vmatprep.subr.bf16.mxu1 %v2396_v8  ;;  %v806_v27 = vpack.c.bf16 %v1805_v23, %v244_v22  ;;  %v1807_v28 = vld [vmem:[%s2569_s14 + $0x61] sm:$0xff]  ;;  %v2610_v31 = vpack.c.bf16 %v246_v26, %v1805_v23  ;;  %v248_v33 = vld [vmem:[%s2569_s14 + $0x71] sm:$0xff] }
  0x15   : > { %2187 = vmatprep.subr.bf16.mxu0 %v2397_v9  ;;  %2099 = vmatprep.mubr.bf16.mxu1 %v249_v14  ;;  %v807_v32 = vpack.c.bf16 %v1807_v28, %v246_v26  ;;  %v2618_v35 = vld [vmem:[%s2569_s14 + $0x81] sm:$0xff]  ;;  %v2624_v37 = vpack.c.bf16 %v248_v33, %v1807_v28  ;;  %v2628_v39 = vld [vmem:[%s2569_s14 + $0x10] sm:$0xff]  ;;  %v2434_v26 = vld [vmem:[%s2898_s1 + $0xb8] sm:$0xff]  }
  0x16   : > { %2195 = vmatprep.mubr.bf16.mxu0 %v805_v16  ;;  %v213_v38 = vld [vmem:[%s2569_s14] sm:$0xff]  ;;  %v808_v40 = vpack.c.bf16 %v2618_v35, %v248_v33  ;;  %v2632_v41 = vld [vmem:[%s2569_s14 + $0x12] sm:$0xff]  ;;  %v2431_v22 = vld [vmem:[%s2898_s1 + $0x1a8] sm:$0xff]  }
  0x17   : > { %2092 = vmatpush3.bf16.msra.mxu1 %v2396_v8  ;;  %v2635_v42 = vld [vmem:[%s2569_s14 + $0x22] sm:$0xff]  ;;  %v221_v45 = vpack.c.bf16 %v2628_v39, %v213_v38  ;;  %v2675_v56 = vld [vmem:[%s2569_s14 + $0x30] sm:$0xff]  ;;  %v2426_v16 = vld [vmem:[%s2898_s1 + $0x98] sm:$0xff]  }
  0x18   : > { %2188 = vmatpush3.bf16.msra.mxu0 %v2397_v9  ;;  %2093 = vmatprep.subr.bf16.mxu1 %v2398_v10  ;;  %v955_v46 = vpack.c.bf16 %v2635_v42, %v2632_v41  ;;  %v2672_v55 = vld [vmem:[%s2569_s14 + $0x20] sm:$0xff]  ;;  %v2681_v58 = vld [vmem:[%s2569_s14 + $0x32] sm:$0xff]  ;;  %v2439_v33 = vld [vmem:[%s2898_s1 + $0x1c8] sm:$0xff]  }
  0x19   : > { %2189 = vmatprep.subr.bf16.mxu0 %v2399_v13  ;;  %v2687_v60 = vld [vmem:[%s2569_s14 + $0x42] sm:$0xff]  ;;  %v2693_v62 = vld [vmem:[%s2569_s14 + $0x50] sm:$0xff]  ;;  %v222_v63 = vpack.c.bf16 %v2675_v56, %v2672_v55 }
  0x1a   : > { %v2690_v61 = vld [vmem:[%s2569_s14 + $0x40] sm:$0xff]  ;;  %v2701_v1 = vld [vmem:[%s2569_s14 + $0x52] sm:$0xff]  ;;  %v956_v2 = vpack.c.bf16 %v2687_v60, %v2681_v58 }
  0x1b   : > { %2094 = vmatpush3.bf16.msra.mxu1 %v2398_v10  ;;  %v2706_v3 = vld [vmem:[%s2569_s14 + $0x62] sm:$0xff]  ;;  %v2713_v5 = vpack.c.bf16 %v2693_v62, %v2690_v61  ;;  %v2424_v7 = vld [vmem:[%s2898_s1 + $0x90] sm:$0xff]  }
  0x1c   : > { %2190 = vmatpush3.bf16.msra.mxu0 %v2399_v13  ;;  %2095 = vmatprep.subr.bf16.mxu1 %v2400_v17  ;;  %v2716_v6 = vld [vmem:[%s2569_s14 + $0x60] sm:$0xff]  ;;  %v957_v8 = vpack.c.bf16 %v2706_v3, %v2701_v1  ;;  %v2724_v9 = vld [vmem:[%s2569_s14 + $0x70] sm:$0xff] }
  0x1d   : > { %2191 = vmatprep.subr.bf16.mxu0 %v2401_v18  ;;  %v2727_v10 = vld [vmem:[%s2569_s14 + $0x72] sm:$0xff]  ;;  %v2730_v11 = vld [vmem:[%s2569_s14 + $0x82] sm:$0xff]  ;;  %v224_v13 = vpack.c.bf16 %v2724_v9, %v2716_v6 }
  0x1e   : > { %v2425_v12 = vld [vmem:[%s2898_s1 + $0x190] sm:$0xff]   ;;  %v496_v14 = vld [vmem:[%s2569_s14 + $0x2] sm:$0xff]  ;;  %v958_v15 = vpack.c.bf16 %v2730_v11, %v2727_v10 }
  0x1f   : > { %2096 = vmatpush3.bf16.msra.mxu1 %v2400_v17  ;;  %v2427_v17 = vld [vmem:[%s2898_s1 + $0x198] sm:$0xff]   ;;  %v2432_v23 = vld [vmem:[%s2898_s1 + $0xb0] sm:$0xff]   ;;  %v2436_v28 = vld [vmem:[%s2898_s1 + $0xc0] sm:$0xff]  }
  0x20   : > { %2192 = vmatpush3.bf16.msra.mxu0 %v2401_v18  ;;  %2097 = vmatprep.subr.bf16.mxu1 %v2402_v19  ;;  %v504_v18 = vpack.c.bf16 %v2632_v41, %v496_v14  ;;  %v2798_v38 = vld [vmem:[%s2569_s14 + $0x80] sm:$0xff]  ;;  %v2441_v41 = vld [vmem:[%s2898_s1 + $0x1d0] sm:$0xff]  }
  0x21   : > { %2193 = vmatprep.subr.bf16.mxu0 %v2403_v20 }
  0x23   : > { %2098 = vmatpush3.bf16.msra.mxu1 %v2402_v19  ;;  %v2428_v19 = vld [vmem:[%s2898_s1 + $0xa0] sm:$0xff]  }
  0x24   : > { %2194 = vmatpush3.bf16.msra.mxu0 %v2403_v20  ;;  %2107 = vmatprep.subr.bf16.mxu1 %v2404_v21  ;;  %v2429_v20 = vld [vmem:[%s2898_s1 + $0x1a0] sm:$0xff]  }
  0x25   : > { %2203 = vmatprep.subr.bf16.mxu0 %v2405_v24 }
  0x26   : > { %2100 = vmatmul.mubr.bf16.vlgmr.msra.gmra.mrb[0].mxu1 %v2600_v25 }
  0x27   : > { %2108 = vmatpush3.bf16.msra.mxu1 %v2404_v21  ;;  %2196 = vmatmul.mubr.bf16.vlgmr.msra.gmra.mrb[0].mxu0 %v806_v27  ;;  %v2430_v21 = vld [vmem:[%s2898_s1 + $0xa8] sm:$0xff]   ;;  %v2435_v27 = vld [vmem:[%s2898_s1 + $0x1b8] sm:$0xff]  }
  0x28   : > { %2204 = vmatpush3.bf16.msra.mxu0 %v2405_v24  ;;  %2109 = vmatprep.subr.bf16.mxu1 %v2406_v29  ;;  %v2433_v24 = vld [vmem:[%s2898_s1 + $0x1b0] sm:$0xff]  }
  0x29   : > { %2205 = vmatprep.subr.bf16.mxu0 %v2407_v30  ;;  %2103 = vmatprep.mubr.bf16.mxu1 %v2610_v31 }
  0x2a   : > { %2199 = vmatprep.mubr.bf16.mxu0 %v807_v32  ;;  %v2438_v32 = vld [vmem:[%s2898_s1 + $0xc8] sm:$0xff]  }
  0x2b   : > { %2110 = vmatpush3.bf16.msra.mxu1 %v2406_v29  ;;  %v2437_v29 = vld [vmem:[%s2898_s1 + $0x1c0] sm:$0xff]  }
  0x2c   : > { %2206 = vmatpush3.bf16.msra.mxu0 %v2407_v30  ;;  %2111 = vmatprep.subr.bf16.mxu1 %v2408_v34  ;;  %v2780_v30 = vpack.c.bf16 %v2681_v58, %v2635_v42  ;;  %v2807_v42 = vpack.c.bf16 %v2727_v10, %v2706_v3  ;;  %v1905_v58 = vld [vmem:[%s2569_s14 + $0x91] sm:$0xff] }
  0x2d   : > { %2207 = vmatprep.subr.bf16.mxu0 %v2409_v36 }
  0x2e   : > { %2104 = vmatmul.mubr.bf16.gmra.mrb[4].mxu1 %v2624_v37 }
  0x2f   : > { %2112 = vmatpush3.bf16.msra.mxu1 %v2408_v34  ;;  %2200 = vmatmul.mubr.bf16.gmra.mrb[4].mxu0 %v808_v40  ;;  %v2790_v34 = vpack.c.bf16 %v2701_v1, %v2687_v60  ;;  %v1873_v40 = vld [vmem:[%s2569_s14 + $0x90] sm:$0xff]  ;;  %v1259_v60 = vpack.c.bf16 %v1905_v58, %v2618_v35  ;;  %v2457_v35 = vld [vmem:[%s2898_s1 + $0x228] sm:$0xff]  }
  0x30   : > { %2208 = vmatpush3.bf16.msra.mxu0 %v2409_v36  ;;  %2113 = vmatprep.subr.bf16.mxu1 %v2410_v43  ;;  %v2440_v36 = vld [vmem:[%s2898_s1 + $0xd0] sm:$0xff]  }
  0x31   : > { %2209 = vmatprep.subr.bf16.mxu0 %v2411_v44  ;;  %2123 = vmatprep.mubr.bf16.mxu1 %v221_v45  ;;  %v2443_v45 = vld [vmem:[%s2898_s1 + $0x1d8] sm:$0xff]  }
  0x32   : > { %2219 = vmatprep.mubr.bf16.mxu0 %v955_v46  ;;  %v655_v46 = vpack.c.bf16 %v2672_v55, %v2628_v39  ;;  %v2446_v39 = vld [vmem:[%s2898_s1 + $0xe8] sm:$0xff]  }
  0x33   : > { %2114 = vmatpush3.bf16.msra.mxu1 %v2410_v43  ;;  %v1109_v43 = vpack.c.bf16 %v1873_v40, %v2798_v38  ;;  %v2453_v55 = vld [vmem:[%s2898_s1 + $0x208] sm:$0xff]  }
  0x34   : > { %2210 = vmatpush3.bf16.msra.mxu0 %v2411_v44  ;;  %2115 = vmatprep.subr.bf16.mxu1 %v2412_v47  ;;  %v2442_v44 = vld [vmem:[%s2898_s1 + $0xd8] sm:$0xff]  }
  0x35   : > { %2211 = vmatprep.subr.bf16.mxu0 %v2413_v48 }
  0x37   : > { %2116 = vmatpush3.bf16.msra.mxu1 %v2412_v47  ;;  %v2444_v47 = vld [vmem:[%s2898_s1 + $0xe0] sm:$0xff]  }
  0x38   : > { %2212 = vmatpush3.bf16.msra.mxu0 %v2413_v48  ;;  %2117 = vmatprep.subr.bf16.mxu1 %v2414_v49  ;;  %v2445_v48 = vld [vmem:[%s2898_s1 + $0x1e0] sm:$0xff]  }
  0x39   : > { %2213 = vmatprep.subr.bf16.mxu0 %v2415_v50 }
  0x3b   : > { %2118 = vmatpush3.bf16.msra.mxu1 %v2414_v49  ;;  %v2447_v49 = vld [vmem:[%s2898_s1 + $0x1e8] sm:$0xff]  }
  0x3c   : > { %2214 = vmatpush3.bf16.msra.mxu0 %v2415_v50  ;;  %2119 = vmatprep.subr.bf16.mxu1 %v2416_v51  ;;  %v2448_v50 = vld [vmem:[%s2898_s1 + $0xf0] sm:$0xff]  }
  0x3d   : > { %2215 = vmatprep.subr.bf16.mxu0 %v2417_v52 }
  0x3f   : > { %2120 = vmatpush3.bf16.msra.mxu1 %v2416_v51  ;;  %v2450_v51 = vld [vmem:[%s2898_s1 + $0xf8] sm:$0xff]  }
  0x40   : > { %2216 = vmatpush3.bf16.msra.mxu0 %v2417_v52  ;;  %2121 = vmatprep.subr.bf16.mxu1 %v2418_v53  ;;  %v2451_v52 = vld [vmem:[%s2898_s1 + $0x1f8] sm:$0xff]  }
  0x41   : > { %2217 = vmatprep.subr.bf16.mxu0 %v2419_v54 }
  0x43   : > { %2122 = vmatpush3.bf16.msra.mxu1 %v2418_v53  ;;  %v2452_v53 = vld [vmem:[%s2898_s1 + $0x200] sm:$0xff]  }
  0x44   : > { %2218 = vmatpush3.bf16.msra.mxu0 %v2419_v54  ;;  %2131 = vmatprep.subr.bf16.mxu1 %v2420_v57  ;;  %v656_v54 = vpack.c.bf16 %v2690_v61, %v2675_v56  ;;  %v2454_v56 = vld [vmem:[%s2898_s1 + $0x210] sm:$0xff]  }
  0x45   : > { %2227 = vmatprep.subr.bf16.mxu0 %v2421_v59  ;;  %v2458_v61 = vld [vmem:[%s2898_s1 + $0x230] sm:$0xff]  }
  0x46   : > { %2124 = vmatmul.mubr.bf16.vlgmr.msra.gmra.mrb[0].mxu1 %v222_v63 }
  0x47   : > { %2132 = vmatpush3.bf16.msra.mxu1 %v2420_v57  ;;  %2220 = vmatmul.mubr.bf16.vlgmr.msra.gmra.mrb[0].mxu0 %v956_v2  ;;  %v657_v57 = vpack.c.bf16 %v2716_v6, %v2693_v62  ;;  %v2459_v62 = vld [vmem:[%s2898_s1 + $0x238] sm:$0xff]  }
  0x48   : > { %2228 = vmatpush3.bf16.msra.mxu0 %v2421_v59  ;;  %2133 = vmatprep.subr.bf16.mxu1 %v2422_v0  ;;  %v658_v59 = vpack.c.bf16 %v2798_v38, %v2724_v9 }
  0x49   : > { %2229 = vmatprep.subr.bf16.mxu0 %v2423_v4  ;;  %2127 = vmatprep.mubr.bf16.mxu1 %v2713_v5 }
  0x4a   : > { %2223 = vmatprep.mubr.bf16.mxu0 %v957_v8 }
  0x4b   : > { %2134 = vmatpush3.bf16.msra.mxu1 %v2422_v0 }
  0x4c   : > { %2230 = vmatpush3.bf16.msra.mxu0 %v2423_v4  ;;  %2135 = vmatprep.subr.bf16.mxu1 %v2424_v7 }
  0x4d   : > { %2231 = vmatprep.subr.bf16.mxu0 %v2425_v12 }
  0x4e   : > { %2128 = vmatmul.mubr.bf16.gmra.mrb[4].mxu1 %v224_v13 }
  0x4f   : > { %2136 = vmatpush3.bf16.msra.mxu1 %v2424_v7  ;;  %2224 = vmatmul.mubr.bf16.gmra.mrb[4].mxu0 %v958_v15 }
  0x50   : > { %2232 = vmatpush3.bf16.msra.mxu0 %v2425_v12  ;;  %2137 = vmatprep.subr.bf16.mxu1 %v2426_v16 }
  0x51   : > { %2233 = vmatprep.subr.bf16.mxu0 %v2427_v17  ;;  %2147 = vmatprep.mubr.bf16.mxu1 %v504_v18 }
  0x52   : > { %2243 = vmatprep.mubr.bf16.mxu0 %v222_v63  ;;  %v1937_v63 = vld [vmem:[%s2569_s14 + $0x92] sm:$0xff] }
  0x53   : > { %2138 = vmatpush3.bf16.msra.mxu1 %v2426_v16  ;;  %v1409_v0 = vpack.c.bf16 %v1937_v63, %v2730_v11 }
  0x54   : > { %2234 = vmatpush3.bf16.msra.mxu0 %v2427_v17  ;;  %2139 = vmatprep.subr.bf16.mxu1 %v2428_v19  ;;  %v1962_v17 = vld [vmem:[%s2899_s2] ss:$0 sm:$0xff] }
  0x55   : > { %2235 = vmatprep.subr.bf16.mxu0 %v2429_v20 }
  0x57   : > { %2140 = vmatpush3.bf16.msra.mxu1 %v2428_v19 }
  0x58   : > { %2236 = vmatpush3.bf16.msra.mxu0 %v2429_v20  ;;  %2141 = vmatprep.subr.bf16.mxu1 %v2430_v21 }
  0x59   : > { %2237 = vmatprep.subr.bf16.mxu0 %v2431_v22 }
  0x5b   : > { %2142 = vmatpush3.bf16.msra.mxu1 %v2430_v21 }
  0x5c   : > { %2238 = vmatpush3.bf16.msra.mxu0 %v2431_v22  ;;  %2143 = vmatprep.subr.bf16.mxu1 %v2432_v23 }
  0x5d   : > { %2239 = vmatprep.subr.bf16.mxu0 %v2433_v24 }
  0x5f   : > { %2144 = vmatpush3.bf16.msra.mxu1 %v2432_v23  ;;  %v1963_v23 = vld [vmem:[%s206_s27] ss:$0 sm:$0xff] }
  0x60   : > { %2240 = vmatpush3.bf16.msra.mxu0 %v2433_v24  ;;  %2145 = vmatprep.subr.bf16.mxu1 %v2434_v26 }
  0x61   : > { %2241 = vmatprep.subr.bf16.mxu0 %v2435_v27 }
  0x63   : > { %2146 = vmatpush3.bf16.msra.mxu1 %v2434_v26 }
  0x64   : > { %2242 = vmatpush3.bf16.msra.mxu0 %v2435_v27  ;;  %2155 = vmatprep.subr.bf16.mxu1 %v2436_v28 }
  0x65   : > { %2251 = vmatprep.subr.bf16.mxu0 %v2437_v29 }
  0x66   : > { %2148 = vmatmul.mubr.bf16.vlgmr.msra.gmra.mrb[0].mxu1 %v2780_v30 }
  0x67   : > { %2156 = vmatpush3.bf16.msra.mxu1 %v2436_v28  ;;  %2244 = vmatmul.mubr.bf16.vlgmr.msra.gmra.mrb[0].mxu0 %v2713_v5 }
  0x68   : > { %2252 = vmatpush3.bf16.msra.mxu0 %v2437_v29  ;;  %2157 = vmatprep.subr.bf16.mxu1 %v2438_v32 }
  0x69   : > { %2253 = vmatprep.subr.bf16.mxu0 %v2439_v33  ;;  %2151 = vmatprep.mubr.bf16.mxu1 %v2790_v34 }
  0x6a   : > { %2247 = vmatprep.mubr.bf16.mxu0 %v224_v13 }
  0x6b   : > { %2158 = vmatpush3.bf16.msra.mxu1 %v2438_v32 }
  0x6c   : > { %2254 = vmatpush3.bf16.msra.mxu0 %v2439_v33  ;;  %2159 = vmatprep.subr.bf16.mxu1 %v2440_v36 }
  0x6d   : > { %2255 = vmatprep.subr.bf16.mxu0 %v2441_v41 }
  0x6e   : > { %2152 = vmatmul.mubr.bf16.gmra.mrb[4].mxu1 %v2807_v42 }
  0x6f   : > { %2160 = vmatpush3.bf16.msra.mxu1 %v2440_v36  ;;  %2248 = vmatmul.mubr.bf16.gmra.mrb[4].mxu0 %v1109_v43 }
  0x70   : > { %2256 = vmatpush3.bf16.msra.mxu0 %v2441_v41  ;;  %2161 = vmatprep.subr.bf16.mxu1 %v2442_v44 }
  0x71   : > { %2257 = vmatprep.subr.bf16.mxu0 %v2443_v45  ;;  %2171 = vmatprep.mubr.bf16.mxu1 %v655_v46 }
  0x72   : > { %2267 = vmatprep.mubr.bf16.mxu0 %v2600_v25  ;;  %v2449_v25 = vld [vmem:[%s2898_s1 + $0x1f0] sm:$0xff]  }
  0x73   : > { %2162 = vmatpush3.bf16.msra.mxu1 %v2442_v44 }
  0x74   : > { %2258 = vmatpush3.bf16.msra.mxu0 %v2443_v45  ;;  %2163 = vmatprep.subr.bf16.mxu1 %v2444_v47 }
  0x75   : > { %2259 = vmatprep.subr.bf16.mxu0 %v2445_v48 }
  0x77   : > { %2164 = vmatpush3.bf16.msra.mxu1 %v2444_v47 }
  0x78   : > { %2260 = vmatpush3.bf16.msra.mxu0 %v2445_v48  ;;  %2165 = vmatprep.subr.bf16.mxu1 %v2446_v39 }
  0x79   : > { %2261 = vmatprep.subr.bf16.mxu0 %v2447_v49 }
  0x7b   : > { %2166 = vmatpush3.bf16.msra.mxu1 %v2446_v39 }
  0x7c   : > { %2262 = vmatpush3.bf16.msra.mxu0 %v2447_v49  ;;  %2167 = vmatprep.subr.bf16.mxu1 %v2448_v50 }
  0x7d   : > { %2263 = vmatprep.subr.bf16.mxu0 %v2449_v25 }
  0x7f   : > { %2168 = vmatpush3.bf16.msra.mxu1 %v2448_v50 }
  0x80   : > { %2264 = vmatpush3.bf16.msra.mxu0 %v2449_v25  ;;  %2169 = vmatprep.subr.bf16.mxu1 %v2450_v51 }
  0x81   : > { %2265 = vmatprep.subr.bf16.mxu0 %v2451_v52 }
  0x83   : > { %2170 = vmatpush3.bf16.msra.mxu1 %v2450_v51 }
  0x84   : > { %2266 = vmatpush3.bf16.msra.mxu0 %v2451_v52  ;;  %2299 = vmatprep.subr.bf16.mxu1 %v2452_v53 }
  0x85   : > { %2275 = vmatprep.subr.bf16.mxu0 %v2452_v53 }
  0x86   : > { %2172 = vmatmul.mubr.bf16.vlgmr.msra.gmra.mrb[0].mxu1 %v656_v54 }
  0x87   : > { %2268 = vmatmul.mubr.bf16.vlgmr.msra.gmra.mrb[0].mxu0 %v2610_v31  ;;  %2307 = vmatpush3.bf16.msra.mxu1 %v2452_v53  ;;  %v2455_v31 = vld [vmem:[%s2898_s1 + $0x218] sm:$0xff]  }
  0x88   : > { %2276 = vmatpush3.bf16.msra.mxu0 %v2452_v53  ;;  %2300 = vmatprep.subr.bf16.mxu1 %v2453_v55 }
  0x89   : > { %2277 = vmatprep.subr.bf16.mxu0 %v2453_v55  ;;  %2175 = vmatprep.mubr.bf16.mxu1 %v657_v57 }
  0x8a   : > { %2271 = vmatprep.mubr.bf16.mxu0 %v2624_v37  ;;  %v2456_v37 = vld [vmem:[%s2898_s1 + $0x220] sm:$0xff]  }
  0x8b   : > { %2308 = vmatpush3.bf16.msra.mxu1 %v2453_v55 }
  0x8c   : > { %2278 = vmatpush3.bf16.msra.mxu0 %v2453_v55  ;;  %2301 = vmatprep.subr.bf16.mxu1 %v2454_v56 }
  0x8d   : > { %2279 = vmatprep.subr.bf16.mxu0 %v2454_v56 }
  0x8e   : > { %2176 = vmatmul.mubr.bf16.gmra.mrb[4].mxu1 %v658_v59 }
  0x8f   : > { %2272 = vmatmul.mubr.bf16.gmra.mrb[4].mxu0 %v1259_v60  ;;  %2309 = vmatpush3.bf16.msra.mxu1 %v2454_v56 }
  0x90   : > { %2280 = vmatpush3.bf16.msra.mxu0 %v2454_v56  ;;  %2302 = vmatprep.subr.bf16.mxu1 %v2455_v31 }
  0x91   : > { %2281 = vmatprep.subr.bf16.mxu0 %v2455_v31  ;;  %2291 = vmatprep.mubr.bf16.mxu0 %v2780_v30 }
  0x92   : > { %2295 = vmatprep.mubr.bf16.mxu1 %v2807_v42 }
  0x93   : > { %2310 = vmatpush3.bf16.msra.mxu1 %v2455_v31 }
  0x94   : > { %2282 = vmatpush3.bf16.msra.mxu0 %v2455_v31  ;;  %2303 = vmatprep.subr.bf16.mxu1 %v2456_v37 }
  0x95   : > { %2283 = vmatprep.subr.bf16.mxu0 %v2456_v37 }
  0x97   : > { %2311 = vmatpush3.bf16.msra.mxu1 %v2456_v37 }
  0x98   : > { %2284 = vmatpush3.bf16.msra.mxu0 %v2456_v37  ;;  %2304 = vmatprep.subr.bf16.mxu1 %v2457_v35 }
  0x99   : > { %2285 = vmatprep.subr.bf16.mxu0 %v2457_v35 }
  0x9b   : > { %2312 = vmatpush3.bf16.msra.mxu1 %v2457_v35 }
  0x9c   : > { %2286 = vmatpush3.bf16.msra.mxu0 %v2457_v35  ;;  %2305 = vmatprep.subr.bf16.mxu1 %v2458_v61 }
  0x9d   : > { %2287 = vmatprep.subr.bf16.mxu0 %v2458_v61 }
  0x9f   : > { %2313 = vmatpush3.bf16.msra.mxu1 %v2458_v61 }
  0xa0   : > { %2288 = vmatpush3.bf16.msra.mxu0 %v2458_v61  ;;  %2306 = vmatprep.subr.bf16.mxu1 %v2459_v62 }
  0xa1   : > { %2289 = vmatprep.subr.bf16.mxu0 %v2459_v62 }
  0xa3   : > { %2314 = vmatpush3.bf16.msra.mxu1 %v2459_v62 }
  0xa4   : > { %2290 = vmatpush3.bf16.msra.mxu0 %v2459_v62 }
  0xa6   : > { %2296 = vmatmul.mubr.bf16.vlgmr.msra.gmra.mrb[8].mxu1 %v1409_v0 }
  0xa7   : > { %2292 = vmatmul.mubr.bf16.vlgmr.msra.gmra.mrb[0].mxu0 %v2790_v34 }
 0x159   : > { %v2173_v1 = vpop.f32.mrb[0].mxu1 }
 0x15a   : > { %v758_v2 = vpop.f32.mrb[1].mxu1 }
 0x15b   : > { %v2174_v3 = vpop.f32.mrb[2].mxu1 }
 0x15c   : > { %v761_v4 = vpop.f32.mrb[3].mxu1 }
 0x161   : > { %v2177_v5 = vpop.f32.mrb[4].mxu1 }
 0x162   : > { %v2273_v6 = vpop.f32.mrb[4].mxu0  ;;  %v774_v7 = vpop.f32.mrb[5].mxu1 }
 0x163   : > { %v2319_v8 = vadd.f32 %v2273_v6, %v2177_v5  ;;  %v1375_v9 = vpop.f32.mrb[5].mxu0  ;;  %v2178_v10 = vpop.f32.mrb[6].mxu1 }
 0x164   : > { %v2321_v12 = vadd.f32 %v1375_v9, %v774_v7  ;;  %v2274_v13 = vpop.f32.mrb[6].mxu0  ;;  %v777_v14 = vpop.f32.mrb[7].mxu1 }
 0x165   : > { %v2323_v11 = vadd.f32 %v2274_v13, %v2178_v10  ;;  %v1378_v15 = vpop.f32.mrb[7].mxu0 }
 0x166   : > { %v2325_v16 = vadd.f32 %v1378_v15, %v777_v14 }
 0x179   : > { %v2297_v18 = vpop.f32.mrb[8].mxu1 }
 0x17a   : > { %v2293_v19 = vpop.f32.mrb[0].mxu0  ;;  %v2320_v20 = vadd.f32 %v2319_v8, %v2297_v18  ;;  %v1525_v21 = vpop.f32.mrb[9].mxu1 }
 0x17b   : > { %v2315_v22 = vadd.f32 %v2293_v19, %v2173_v1  ;;  %v1509_v24 = vpop.f32.mrb[1].mxu0  ;;  %v2322_v26 = vadd.f32 %v2321_v12, %v1525_v21  ;;  %v2298_v27 = vpop.f32.mrb[10].mxu1 }
 0x17c   : > { %v1561_v28 = vadd.f32 %v2320_v20, %v1962_v17  ;;  %v2316_v29 = vadd.f32 %v1509_v24, %v758_v2  ;;  %v2294_v30 = vpop.f32.mrb[2].mxu0  ;;  %v2324_v32 = vadd.f32 %v2323_v11, %v2298_v27  ;;  %v1528_v33 = vpop.f32.mrb[11].mxu1 }
 0x17d   : > { %v1557_v34 = vadd.f32 %v2315_v22, %v1962_v17  ;;  %v1559_v36 = vadd.f32 %v2322_v26, %v1962_v17  ;;  %v2317_v38 = vadd.f32 %v2294_v30, %v2174_v3  ;;  %v1512_v40 = vpop.f32.mrb[3].mxu0  ;;  %v2326_v41 = vadd.f32 %v2325_v16, %v1528_v33 }
 0x17e   : > { %v1576_v42 = vadd.f32 %v1963_v23, %v1561_v28  ;;  %v1555_v43 = vadd.f32 %v2316_v29, %v1962_v17  ;;  %v1562_v44 = vadd.f32 %v2324_v32, %v1962_v17  ;;  %v2318_v45 = vadd.f32 %v1512_v40, %v761_v4 }
 0x17f   : > { %v1572_v46 = vadd.f32 %v1963_v23, %v1557_v34  ;;  %v1574_v47 = vadd.f32 %v1963_v23, %v1559_v36  ;;  %v1558_v48 = vadd.f32 %v2317_v38, %v1962_v17  ;;  %v1560_v39 = vadd.f32 %v2326_v41, %v1962_v17 }
 0x180   : > { %v1970_v49 = vmul.f32 -1.442695, %v1576_v42  ;;  %v1570_v50 = vadd.f32 %v1963_v23, %v1555_v43  ;;  %v1577_v25 = vadd.f32 %v1963_v23, %v1562_v44  ;;  %v1556_v51 = vadd.f32 %v2318_v45, %v1962_v17 }
 0x181   : > { %v1966_v52 = vmul.f32 -1.442695, %v1572_v46  ;;  %v1968_v53 = vmul.f32 -1.442695, %v1574_v47  ;;  %v1573_v54 = vadd.f32 %v1963_v23, %v1558_v48  ;;  %v1575_v55 = vadd.f32 %v1963_v23, %v1560_v39 }
 0x182   : > { %2460 = vpow2.f32 %v1970_v49  ;;  %v1964_v57 = vmul.f32 -1.442695, %v1570_v50  ;;  %v1571_v58 = vadd.f32 %v1963_v23, %v1556_v51  ;;  %v1971_v59 = vmul.f32 -1.442695, %v1577_v25 }
 0x183   : > { %2462 = vpow2.f32 %v1966_v52  ;;  %v1967_v56 = vmul.f32 -1.442695, %v1573_v54  ;;  %v1969_v31 = vmul.f32 -1.442695, %v1575_v55 }
 0x184   : > { %2464 = vpow2.f32 %v1964_v57  ;;  %v1965_v60 = vmul.f32 -1.442695, %v1571_v58 }
 0x185   : > { %2466 = vpow2.f32 %v1968_v53 }
 0x186   : > { %2468 = vpow2.f32 %v1967_v56 }
 0x187   : > { %2470 = vpow2.f32 %v1971_v59 }
 0x188   : > { %2472 = vpow2.f32 %v1965_v60 }
 0x189   : > { %2474 = vpow2.f32 %v1969_v31 }
 0x18c   : > { %v2461_v37 = vpop.eup %2460 }
 0x18d   : > { %v2463_v35 = vpop.eup %2462  ;;  %v1608_v61 = vadd.f32 1.0, %v2461_v37 }
 0x18e   : > { %v2465_v62 = vpop.eup %2464  ;;  %v1604_v63 = vadd.f32 1.0, %v2463_v35 }
 0x18f   : > { %v2467_v0 = vpop.eup %2466  ;;  %2476 = vrcp.f32 %v1608_v61  ;;  %v1602_v1 = vadd.f32 1.0, %v2465_v62 }
 0x190   : > { %v2469_v2 = vpop.eup %2468  ;;  %2478 = vrcp.f32 %v1604_v63  ;;  %v1606_v3 = vadd.f32 1.0, %v2467_v0 }
 0x191   : > { %v2471_v4 = vpop.eup %2470  ;;  %2480 = vrcp.f32 %v1602_v1  ;;  %v1605_v5 = vadd.f32 1.0, %v2469_v2 }
 0x192   : > { %v2473_v6 = vpop.eup %2472  ;;  %2482 = vrcp.f32 %v1606_v3  ;;  %v1609_v7 = vadd.f32 1.0, %v2471_v4 }
 0x193   : > { %v2475_v8 = vpop.eup %2474  ;;  %2484 = vrcp.f32 %v1605_v5  ;;  %v1603_v9 = vadd.f32 1.0, %v2473_v6 }
 0x194   : > { %2486 = vrcp.f32 %v1609_v7  ;;  %v1607_v10 = vadd.f32 1.0, %v2475_v8 }
 0x195   : > { %2488 = vrcp.f32 %v1603_v9 }
 0x196   : > { %2490 = vrcp.f32 %v1607_v10 }
 0x199   : > { %v2477_v12 = vpop.eup %2476 }
 0x19a   : > { %v2479_v13 = vpop.eup %2478  ;;  %v1632_v14 = vmul.f32 %v2477_v12, %v1576_v42 }
 0x19b   : > { %v2481_v11 = vpop.eup %2480  ;;  %v1628_v15 = vmul.f32 %v2479_v13, %v1572_v46 }
 0x19c   : > { %v2483_v16 = vpop.eup %2482  ;;  %1640 = vst [vmem:[%s211_s7 + $0x30] sm:$0xff] %v1632_v14  ;;  %v1626_v17 = vmul.f32 %v2481_v11, %v1570_v50 }
 0x19d   : > { %v2485_v18 = vpop.eup %2484  ;;  %1636 = vst [vmem:[%s211_s7 + $0x10] sm:$0xff] %v1628_v15  ;;  %v1630_v19 = vmul.f32 %v2483_v16, %v1574_v47 }
 0x19e   : > { %v2487_v20 = vpop.eup %2486  ;;  %1634 = vst [vmem:[%s211_s7] sm:$0xff] %v1626_v17  ;;  %v1629_v21 = vmul.f32 %v2485_v18, %v1573_v54 }
 0x19f   : > { %v2489_v22 = vpop.eup %2488  ;;  %1638 = vst [vmem:[%s211_s7 + $0x20] sm:$0xff] %v1630_v19  ;;  %v1633_v23 = vmul.f32 %v2487_v20, %v1577_v25 }
 0x1a0   : > { %v2491_v24 = vpop.eup %2490  ;;  %1637 = vst [vmem:[%s211_s7 + $0x18] sm:$0xff] %v1629_v21  ;;  %v1627_v26 = vmul.f32 %v2489_v22, %v1571_v58 }
 0x1a1   : > { %1641 = vst [vmem:[%s211_s7 + $0x38] sm:$0xff] %v1633_v23  ;;  %v1631_v27 = vmul.f32 %v2491_v24, %v1575_v55 }
 0x1a2   : > { %1635 = vst [vmem:[%s211_s7 + $0x8] sm:$0xff] %v1627_v26 }
 0x1a3   : > { %1639 = vst [vmem:[%s211_s7 + $0x28] sm:$0xff] %v1631_v27 }
 0x1a4 PF: > { %s14_s15 = sadd.s32 1, %s2498_s15  }
 0x1a5   : > { %p11_p4 = scmp.ge.s32.totalorder %s14_s15, 4  }
 0x1a7   :  { %13 = sbr.rel (!%p11_p4) target bundleno = 1 (0x1), region = 79 }

// kernel: forward.29
= control target key start
LH: loop header
LB: loop body
LE: loop exit
PB: predicated region body
PF: predicated region fallthrough
CT: control target
= control target key end

     0   :  { %v306_v15 = vmov 0   ;;  %v237_v48 = vlaneseq  ;;  %s418_s0 = inlined_call_operand.vmem [shape: f32[16,128], index: 0, kind: input, shape index: {}]   ;;  %s419_s1 = inlined_call_operand.vmem [shape: bf16[128,256], index: 1, kind: input, shape index: {}]   ;;  %s420_s3 = inlined_call_operand.vmem [shape: f32[1,128], index: 3, kind: input, shape index: {}]   ;;  %s421_s4 = inlined_call_operand.vmem [shape: f32[1,128], index: 4, kind: input, shape index: {}]   ;;  %s422_s2 = inlined_call_operand.vmem [shape: f32[1,256], index: 2, kind: input, shape index: {}]   ;;  %s423_s5 = inlined_call_operand.vmem [shape: f32[16,256], index: 5, kind: output, shape index: {}]  }
   0x1   :  { %v29_v0 = vld [vmem:[%s418_s0] sm:$0xff]  ;;  %v343_v1 = vld [vmem:[%s418_s0 + $0x8] sm:$0xff]  ;;  %v281_v6 = vld [vmem:[%s419_s1 + $0x14] ss:$8 sps:$4 sm:$0xff]   ;;  %209 = vmatprep.mubr.bf16.mxu0 %v306_v15 }
   0x2   :  { %31 = vadd.xlane.f32.xlu0 %v29_v0  ;;  %v38_v2 = vmul.f32 %v29_v0, %v29_v0  ;;  %v278_v3 = vld [vmem:[%s419_s1 + $0x4] ss:$8 sps:$4 sm:$0xff]   ;;  %v39_v4 = vmul.f32 %v343_v1, %v343_v1  ;;  %v280_v5 = vld [vmem:[%s419_s1] ss:$8 sps:$4 sm:$0xff]   ;;  %v283_v7 = vld [vmem:[%s419_s1 + $0x10] ss:$8 sps:$4 sm:$0xff]  }
   0x3   :  { %177 = vmatprep.subr.bf16.mxu0 %v278_v3  ;;  %v284_v8 = vld [vmem:[%s419_s1 + $0x24] ss:$8 sps:$4 sm:$0xff]   ;;  %v286_v9 = vld [vmem:[%s419_s1 + $0x20] ss:$8 sps:$4 sm:$0xff]   ;;  %v287_v10 = vld [vmem:[%s419_s1 + $0x34] ss:$8 sps:$4 sm:$0xff]  }
   0x4   :  { %40 = vadd.xlane.f32.xlu1 %v38_v2  ;;  %178 = vmatpush1.bf16.msra.mxu0 %v280_v5  ;;  %v289_v11 = vld [vmem:[%s419_s1 + $0x30] ss:$8 sps:$4 sm:$0xff]   ;;  %v290_v12 = vld [vmem:[%s419_s1 + $0x44] ss:$8 sps:$4 sm:$0xff]   ;;  %v292_v13 = vld [vmem:[%s419_s1 + $0x40] ss:$8 sps:$4 sm:$0xff]  }
   0x5   :  { %179 = vmatprep.subr.bf16.mxu0 %v281_v6  ;;  %v293_v14 = vld [vmem:[%s419_s1 + $0x54] ss:$8 sps:$4 sm:$0xff]   ;;  %v295_v16 = vld [vmem:[%s419_s1 + $0x50] ss:$8 sps:$4 sm:$0xff]   ;;  %v296_v17 = vld [vmem:[%s419_s1 + $0x64] ss:$8 sps:$4 sm:$0xff]  }
   0x6   :  { %33 = vadd.xlane.f32.xlu0 %v343_v1  ;;  %v298_v18 = vld [vmem:[%s419_s1 + $0x60] ss:$8 sps:$4 sm:$0xff]   ;;  %v299_v19 = vld [vmem:[%s419_s1 + $0x74] ss:$8 sps:$4 sm:$0xff]   ;;  %v301_v20 = vld [vmem:[%s419_s1 + $0x70] ss:$8 sps:$4 sm:$0xff]  }
   0x7   :  { %v259_v38 = vld [vmem:[%s420_s3] ss:$0 sm:$0xff]  ;;  %v238_v49 = vshrl.u32 %v237_v48, 7 }
   0x8   :  { %42 = vadd.xlane.f32.xlu1 %v39_v4  ;;  %180 = vmatpush1.bf16.msra.mxu0 %v283_v7  ;;  %v260_v43 = vld [vmem:[%s421_s4] ss:$0 sm:$0xff] }
   0x9   :  { %181 = vmatprep.subr.bf16.mxu0 %v284_v8  ;;  %v239_v50 = vsub.s32 0, %v238_v49  ;;  %v235_v51 = vld [vmem:[%s422_s2] sm:$0x3]  ;;  %v243_v52 = vsub.s32 1, %v238_v49 }
   0xb   :  { %v240_v53 = vrot.slane %v235_v51, %v239_v50  ;;  %v244_v54 = vrot.slane %v235_v51, %v243_v52 }
   0xc   :  { %182 = vmatpush1.bf16.msra.mxu0 %v286_v9 }
   0xd   :  { %183 = vmatprep.subr.bf16.mxu0 %v287_v10 }
  0x10   :  { %184 = vmatpush1.bf16.msra.mxu0 %v289_v11 }
  0x11   :  { %185 = vmatprep.subr.bf16.mxu0 %v290_v12 }
  0x14   :  { %186 = vmatpush1.bf16.msra.mxu0 %v292_v13 }
  0x15   :  { %187 = vmatprep.subr.bf16.mxu0 %v293_v14 }
  0x18   :  { %188 = vmatpush1.bf16.msra.mxu0 %v295_v16 }
  0x19   :  { %189 = vmatprep.subr.bf16.mxu0 %v296_v17 }
  0x1c   :  { %190 = vmatpush1.bf16.msra.mxu0 %v298_v18 }
  0x1d   :  { %191 = vmatprep.subr.bf16.mxu0 %v299_v19 }
  0x20   :  { %192 = vmatpush1.bf16.msra.mxu0 %v301_v20 }
  0x8f   :  { %v32_v21 = vpop.xlane.xlu0 %31 }
  0x90   :  { %v36_v22 = vmul.f32 0.03125, %v32_v21 }
  0x91   :  { %v41_v23 = vpop.xlane.xlu1 %40 }
  0x92   :  { %v46_v24 = vmul.f32 %v36_v22, %v36_v22  ;;  %v44_v25 = vmul.f32 0.03125, %v41_v23  ;;  %v50_v35 = vsub.f32 %v29_v0, %v36_v22 }
  0x93   :  { %v34_v26 = vpop.xlane.xlu0 %33 }
  0x94   :  { %v48_v27 = vsub.f32 %v44_v25, %v46_v24  ;;  %v37_v28 = vmul.f32 0.03125, %v34_v26 }
  0x95   :  { %v43_v29 = vpop.xlane.xlu1 %42 }
  0x96   :  { %v52_v30 = vadd.f32 1e-05, %v48_v27  ;;  %v47_v31 = vmul.f32 %v37_v28, %v37_v28  ;;  %v45_v32 = vmul.f32 0.03125, %v43_v29  ;;  %v51_v39 = vsub.f32 %v343_v1, %v37_v28 }
  0x98   :  { %302 = vrsqrt.f32 %v52_v30  ;;  %v49_v33 = vsub.f32 %v45_v32, %v47_v31 }
  0x9a   :  { %v53_v34 = vadd.f32 1e-05, %v49_v33 }
  0x9c   :  { %304 = vrsqrt.f32 %v53_v34 }
  0xa2   :  { %v303_v36 = vpop.eup %302 }
  0xa3   :  { %v56_v37 = vmul.f32 %v303_v36, %v50_v35 }
  0xa5   :  { %v65_v42 = vmul.f32 %v259_v38, %v56_v37 }
  0xa6   :  { %v305_v40 = vpop.eup %304 }
  0xa7   :  { %v57_v41 = vmul.f32 %v305_v40, %v51_v39  ;;  %v74_v45 = vadd.f32 %v260_v43, %v65_v42 }
  0xa9   :  { %v66_v44 = vmul.f32 %v259_v38, %v57_v41 }
  0xab   :  { %v75_v46 = vadd.f32 %v260_v43, %v66_v44 }
  0xad   :  { %v80_v47 = vpack.c.bf16 %v75_v46, %v74_v45 }
  0xaf   :  { %210 = vmatmul.mubr.bf16.vlgmr.msra.gmra.mrb[0].mxu0 %v80_v47 }
 0x182   :  { %v211_v55 = vpop.f32.mrb[0].mxu0 }
 0x183   :  { %v247_v56 = vadd.f32 %v240_v53, %v211_v55  ;;  %v213_v57 = vpop.f32.mrb[1].mxu0 }
 0x184   :  { %v248_v58 = vadd.f32 %v244_v54, %v213_v57  ;;  %v215_v59 = vpop.f32.mrb[2].mxu0 }
 0x185   :  { %251 = vst [vmem:[%s423_s5] sm:$0xff] %v247_v56  ;;  %v249_v60 = vadd.f32 %v240_v53, %v215_v59  ;;  %v217_v61 = vpop.f32.mrb[3].mxu0 }
 0x186   :  { %252 = vst [vmem:[%s423_s5 + $0x8] sm:$0xff] %v248_v58  ;;  %v250_v62 = vadd.f32 %v244_v54, %v217_v61 }
 0x187   :  { %253 = vst [vmem:[%s423_s5 + $0x10] sm:$0xff] %v249_v60 }
 0x188   :  { %254 = vst [vmem:[%s423_s5 + $0x18] sm:$0xff] %v250_v62 }

// kernel: forward.27
= control target key start
LH: loop header
LB: loop body
LE: loop exit
PB: predicated region body
PF: predicated region fallthrough
CT: control target
= control target key end

     0   :  { %v282_v2 = vmov 0.0   ;;  %vm283_vm0 = vmmov 0   ;;  %s359_s0 = inlined_call_operand.vmem [shape: f32[16,128], index: 0, kind: input, shape index: {}]   ;;  %s360_s1 = inlined_call_operand.vmem [shape: bf16[128,128], index: 1, kind: input, shape index: {}]   ;;  %s361_s3 = inlined_call_operand.vmem [shape: f32[1,128], index: 3, kind: input, shape index: {}]   ;;  %s362_s4 = inlined_call_operand.vmem [shape: f32[1,128], index: 4, kind: input, shape index: {}]   ;;  %s363_s2 = inlined_call_operand.vmem [shape: f32[1,128], index: 2, kind: input, shape index: {}]   ;;  %s364_s5 = inlined_call_operand.vmem [shape: f32[16,128], index: 5, kind: output, shape index: {}]  }
   0x1   :  { %v27_v0 = vld [vmem:[%s359_s0] sm:$0xff]  ;;  %v28_v1 = vld [vmem:[%s359_s0 + $0x8] sm:$0xff]  ;;  %244 = vmatprep.subr.bf16.mxu0 %v282_v2  ;;  %v268_v7 = vld [vmem:[%s360_s1 + $0x10] sm:$0xff]   ;;  %260 = vmatprep.mubr.msk.bf16.mxu0 %vm283_vm0, %v282_v2 }
   0x2   :  { %29 = vadd.xlane.f32.xlu0 %v27_v0  ;;  %v36_v3 = vmul.f32 %v27_v0, %v27_v0  ;;  %v37_v4 = vmul.f32 %v28_v1, %v28_v1  ;;  %v266_v5 = vld [vmem:[%s360_s1] sm:$0xff]   ;;  %v267_v6 = vld [vmem:[%s360_s1 + $0x8] sm:$0xff]   ;;  %v269_v8 = vld [vmem:[%s360_s1 + $0x18] sm:$0xff]  }
   0x3   :  { %245 = vmatpush3.bf16.msra.mxu0 %v266_v5  ;;  %v270_v9 = vld [vmem:[%s360_s1 + $0x20] sm:$0xff]   ;;  %v271_v10 = vld [vmem:[%s360_s1 + $0x28] sm:$0xff]   ;;  %v272_v11 = vld [vmem:[%s360_s1 + $0x30] sm:$0xff]  }
   0x4   :  { %38 = vadd.xlane.f32.xlu1 %v36_v3  ;;  %246 = vmatprep.subr.bf16.mxu0 %v282_v2  ;;  %v273_v12 = vld [vmem:[%s360_s1 + $0x38] sm:$0xff]   ;;  %v224_v30 = vld [vmem:[%s361_s3] ss:$0 sm:$0xff] }
   0x5   :  { %v225_v35 = vld [vmem:[%s362_s4] ss:$0 sm:$0xff] }
   0x6   :  { %31 = vadd.xlane.f32.xlu0 %v28_v1  ;;  %v234_v40 = vld [vmem:[%s363_s2] ss:$0 sm:$0xff] }
   0x7   :  { %247 = vmatpush3.bf16.msra.mxu0 %v267_v6 }
   0x8   :  { %40 = vadd.xlane.f32.xlu1 %v37_v4  ;;  %248 = vmatprep.subr.bf16.mxu0 %v282_v2 }
   0xb   :  { %249 = vmatpush3.bf16.msra.mxu0 %v268_v7 }
   0xc   :  { %250 = vmatprep.subr.bf16.mxu0 %v282_v2 }
   0xf   :  { %251 = vmatpush3.bf16.msra.mxu0 %v269_v8 }
  0x10   :  { %252 = vmatprep.subr.bf16.mxu0 %v282_v2 }
  0x13   :  { %253 = vmatpush3.bf16.msra.mxu0 %v270_v9 }
  0x14   :  { %254 = vmatprep.subr.bf16.mxu0 %v282_v2 }
  0x17   :  { %255 = vmatpush3.bf16.msra.mxu0 %v271_v10 }
  0x18   :  { %256 = vmatprep.subr.bf16.mxu0 %v282_v2 }
  0x1b   :  { %257 = vmatpush3.bf16.msra.mxu0 %v272_v11 }
  0x1c   :  { %258 = vmatprep.subr.bf16.mxu0 %v282_v2 }
  0x1f   :  { %259 = vmatpush3.bf16.msra.mxu0 %v273_v12 }
  0x8f   :  { %v30_v13 = vpop.xlane.xlu0 %29 }
  0x90   :  { %v34_v14 = vmul.f32 0.03125, %v30_v13 }
  0x91   :  { %v39_v15 = vpop.xlane.xlu1 %38 }
  0x92   :  { %v44_v16 = vmul.f32 %v34_v14, %v34_v14  ;;  %v42_v17 = vmul.f32 0.03125, %v39_v15  ;;  %v48_v27 = vsub.f32 %v27_v0, %v34_v14 }
  0x93   :  { %v32_v18 = vpop.xlane.xlu0 %31 }
  0x94   :  { %v46_v19 = vsub.f32 %v42_v17, %v44_v16  ;;  %v35_v20 = vmul.f32 0.03125, %v32_v18 }
  0x95   :  { %v41_v21 = vpop.xlane.xlu1 %40 }
  0x96   :  { %v50_v22 = vadd.f32 1e-05, %v46_v19  ;;  %v45_v23 = vmul.f32 %v35_v20, %v35_v20  ;;  %v43_v24 = vmul.f32 0.03125, %v41_v21  ;;  %v49_v31 = vsub.f32 %v28_v1, %v35_v20 }
  0x98   :  { %274 = vrsqrt.f32 %v50_v22  ;;  %v47_v25 = vsub.f32 %v43_v24, %v45_v23 }
  0x9a   :  { %v51_v26 = vadd.f32 1e-05, %v47_v25 }
  0x9c   :  { %276 = vrsqrt.f32 %v51_v26 }
  0xa2   :  { %v275_v28 = vpop.eup %274 }
  0xa3   :  { %v54_v29 = vmul.f32 %v275_v28, %v48_v27 }
  0xa5   :  { %v63_v34 = vmul.f32 %v224_v30, %v54_v29 }
  0xa6   :  { %v277_v32 = vpop.eup %276 }
  0xa7   :  { %v55_v33 = vmul.f32 %v277_v32, %v49_v31  ;;  %v72_v37 = vadd.f32 %v225_v35, %v63_v34 }
  0xa9   :  { %v64_v36 = vmul.f32 %v224_v30, %v55_v33 }
  0xab   :  { %v73_v38 = vadd.f32 %v225_v35, %v64_v36 }
  0xad   :  { %v76_v39 = vpack.c.bf16 %v73_v38, %v72_v37 }
  0xaf   :  { %261 = vmatmul.mubr.bf16.vlgmr.msra.gmra.mrb[0].mxu0 %v76_v39 }
 0x182   :  { %v175_v41 = vpop.f32.mrb[0].mxu0 }
 0x183   :  { %v198_v42 = vadd.f32 %v234_v40, %v175_v41  ;;  %v262_v43 = vpop.f32.mrb[1].mxu0 }
 0x184   :  { %v178_v44 = vpop.f32.mrb[2].mxu0 }
 0x185   :  { %v200_v45 = vmul.f32 %v198_v42, %v198_v42  ;;  %v199_v46 = vadd.f32 %v234_v40, %v178_v44  ;;  %v263_v47 = vpop.f32.mrb[3].mxu0 }
 0x187   :  { %v202_v48 = vmul.f32 %v200_v45, %v198_v42  ;;  %v201_v49 = vmul.f32 %v199_v46, %v199_v46 }
 0x189   :  { %v204_v50 = vmul.f32 0.044715, %v202_v48  ;;  %v203_v51 = vmul.f32 %v201_v49, %v199_v46 }
 0x18b   :  { %v206_v52 = vadd.f32 %v204_v50, %v198_v42  ;;  %v205_v53 = vmul.f32 0.044715, %v203_v51 }
 0x18d   :  { %v208_v54 = vmul.f32 0.7978846, %v206_v52  ;;  %v207_v55 = vadd.f32 %v205_v53, %v199_v46 }
 0x18f   :  { %278 = vtanh.f32 %v208_v54  ;;  %v209_v56 = vmul.f32 0.7978846, %v207_v55 }
 0x191   :  { %280 = vtanh.f32 %v209_v56 }
 0x199   :  { %v279_v57 = vpop.eup %278 }
 0x19a   :  { %v212_v58 = vadd.f32 1.0, %v279_v57 }
 0x19b   :  { %v281_v59 = vpop.eup %280 }
 0x19c   :  { %v214_v60 = vmul.f32 0.5, %v212_v58  ;;  %v213_v61 = vadd.f32 1.0, %v281_v59 }
 0x19e   :  { %v216_v62 = vmul.f32 %v214_v60, %v198_v42  ;;  %v215_v63 = vmul.f32 0.5, %v213_v61 }
 0x1a0   :  { %218 = vst [vmem:[%s364_s5] sm:$0xff] %v216_v62  ;;  %v217_v0 = vmul.f32 %v215_v63, %v199_v46 }
 0x1a2   :  { %219 = vst [vmem:[%s364_s5 + $0x8] sm:$0xff] %v217_v0 }

// kernel: forward.30
= control target key start
LH: loop header
LB: loop body
LE: loop exit
PB: predicated region body
PF: predicated region fallthrough
CT: control target
= control target key end

     0   :  { %s617_s9 = smov 0   ;;  %s669_s0 = inlined_call_operand.vmem [shape: f32[2,64,128], index: 0, kind: input, shape index: {}]   ;;  %s670_s1 = inlined_call_operand.vmem [shape: f32[2,8,256], index: 1, kind: input, shape index: {}]   ;;  %s671_s2 = inlined_call_operand.vmem [shape: f32[2,64,128], index: 2, kind: output, shape index: {}]  }
   0x1 LB: > { %s503_s10 = sadd.s32 4294967295, %s600_s9   ;;  %p507_p0 = scmp.ge.s32.totalorder %s600_s9, 1  ;;  %s600_s9 = sphi %s617_s9, %s12_s9  }
   0x2   : > { %p122_p1 = scmp.lt.s32.totalorder %s600_s9, 3 }
   0x4   : > { %p123_p2 = pnand %p507_p0, %p122_p1 }
   0x5   : > { %p149_p3 = scmp.lt.s32.totalorder (!%p123_p2), %s503_s10, 1  ;;  %vm253_vm0 = vcmask (!%p123_p2), 64512   ;;  %vm359_vm1 = vcmask (!%p123_p2), 1043456  }
   0x6   : > { %126 = sbr.rel (%p123_p2) target bundleno = 788 (0x314), region = 28 }
   0xd   : > { %s673_s10 = smov (!%p149_p3, %s503_s10), 1 }
   0xe   : > { %s520_s11 = sshll.u32 %s673_s10, 6  ;;  %s521_s12 = sshll.u32 %s673_s10, 4 }
   0xf   : > { %s153_s15 = scalar_lea.vmem %s669_s0, %s520_s11  ;;  %s637_s18 = scalar_lea.vmem %s670_s1, %s521_s12 }
  0x10   : > { %v173_v0 = vld [vmem:[%s637_s18] sm:$0xff]  ;;  %v166_v2 = vld [vmem:[%s153_s15 + $0x8] sm:$0xff]  ;;  %v167_v6 = vld [vmem:[%s153_s15 + $0x10] sm:$0xff]  ;;  %s163_s21 = scalar_lea.vmem %s671_s2, %s520_s11 }
  0x11   : > { %v165_v1 = vld [vmem:[%s153_s15] sm:$0xff]  ;;  %v187_v3 = vpack.c.bf16 %v173_v0, %v173_v0  ;;  %v176_v5 = vmul.f32 0.17677669, %v166_v2  ;;  %v168_v7 = vld [vmem:[%s153_s15 + $0x18] sm:$0xff]  ;;  %v170_v9 = vld [vmem:[%s153_s15 + $0x28] sm:$0xff] }
  0x12   : > { %v175_v4 = vmul.f32 0.17677669, %v165_v1  ;;  %v169_v8 = vld [vmem:[%s153_s15 + $0x20] sm:$0xff]  ;;  %v177_v11 = vmul.f32 0.17677669, %v167_v6  ;;  %v171_v17 = vld [vmem:[%s153_s15 + $0x30] sm:$0xff] }
  0x13   : > { %533 = vmatprep.subr.bf16.mxu0 %v187_v3  ;;  %v178_v12 = vmul.f32 0.17677669, %v168_v7  ;;  %v179_v13 = vmul.f32 0.17677669, %v169_v8  ;;  %v180_v14 = vmul.f32 0.17677669, %v170_v9 }
  0x14   : > { %v183_v10 = vpack.c.bf16 %v176_v5, %v175_v4  ;;  %534 = vmatpush3.bf16.xpose.msra.mxu0 %v187_v3  ;;  %v172_v18 = vld [vmem:[%s153_s15 + $0x38] sm:$0xff]  ;;  %v181_v19 = vmul.f32 0.17677669, %v171_v17 }
  0x15   : > { %v184_v15 = vpack.c.bf16 %v178_v12, %v177_v11  ;;  %v185_v16 = vpack.c.bf16 %v180_v14, %v179_v13  ;;  %v182_v20 = vmul.f32 0.17677669, %v172_v18  ;;  %v174_v14 = vld [vmem:[%s637_s18 + $0x8] sm:$0xff] }
  0x16   : > { %535 = vmatprep.mubr.bf16.mxu0 %v183_v10 }
  0x17   : > { %v186_v21 = vpack.c.bf16 %v182_v20, %v181_v19 }
  0x1b   : > { %536 = vmatmul.mubr.bf16.vlgmr.msra.gmra.mrb[0].mxu0 %v184_v15  ;;  %v346_v15 = vpack.c.bf16 %v174_v14, %v174_v14 }
  0x1c   : > { %539 = vmatprep.mubr.bf16.mxu0 %v185_v16 }
  0x1d   : > { %553 = vmatprep.subr.msk.bf16.mxu1 %vm359_vm1, %v346_v15  ;;  %v361_v16 = vsel %vm359_vm1, %v346_v15, 0 }
  0x1e   : > { %544 = vmatpush3.bf16.msra.mxu1 %v361_v16 }
  0x23   : > { %540 = vmatmul.mubr.bf16.gmra.mrb[4].mxu0 %v186_v21 }
  0xee   : > { %v537_v22 = vpop.f32.mrb[0].mxu0 }
  0xef   : > { %v222_v23 = vpop.f32.mrb[1].mxu0  ;;  %v260_v24 = vsel %vm253_vm0, %v537_v22, -inf }
  0xf0   : > { %261 = vmax.xlane.f32.xlu1 %v260_v24  ;;  %v538_v25 = vpop.f32.mrb[2].mxu0  ;;  %v254_v26 = vsel %vm253_vm0, %v222_v23, -inf }
  0xf1   : > { %255 = vmax.xlane.f32.xlu0 %v254_v26  ;;  %v225_v27 = vpop.f32.mrb[3].mxu0  ;;  %v263_v28 = vsel %vm253_vm0, %v538_v25, -inf }
  0xf2   : > { %v257_v29 = vsel %vm253_vm0, %v225_v27, -inf }
  0xf4   : > { %264 = vmax.xlane.f32.xlu1 %v263_v28 }
  0xf5   : > { %258 = vmax.xlane.f32.xlu0 %v257_v29 }
  0xf6   : > { %v541_v30 = vpop.f32.mrb[4].mxu0 }
  0xf7   : > { %v238_v31 = vpop.f32.mrb[5].mxu0  ;;  %v272_v36 = vsel %vm253_vm0, %v541_v30, -inf }
  0xf8   : > { %v542_v32 = vpop.f32.mrb[6].mxu0  ;;  %v266_v33 = vsel %vm253_vm0, %v238_v31, -inf }
  0xf9   : > { %267 = vmax.xlane.f32.xlu0 %v266_v33  ;;  %v241_v34 = vpop.f32.mrb[7].mxu0  ;;  %v275_v37 = vsel %vm253_vm0, %v542_v32, -inf }
  0xfa   : > { %v269_v35 = vsel %vm253_vm0, %v241_v34, -inf }
  0xfb   : > { %270 = vmax.xlane.f32.xlu1 %v269_v35 }
  0xfd   : > { %273 = vmax.xlane.f32.xlu0 %v272_v36 }
  0xff   : > { %276 = vmax.xlane.f32.xlu1 %v275_v37 }
 0x17d   : > { %v262_v38 = vpop.xlane.xlu1 %261 }
 0x17e   : > { %v280_v39 = vsub.f32 %v537_v22, %v262_v38  ;;  %v256_v40 = vpop.xlane.xlu0 %255 }
 0x17f   : > { %v278_v41 = vsub.f32 %v222_v23, %v256_v40 }
 0x180   : > { %v290_v42 = vmul.f32 1.442695, %v280_v39 }
 0x181   : > { %v286_v43 = vmul.f32 1.442695, %v278_v41  ;;  %v265_v44 = vpop.xlane.xlu1 %264 }
 0x182   : > { %v281_v45 = vsub.f32 %v538_v25, %v265_v44  ;;  %v259_v46 = vpop.xlane.xlu0 %258 }
 0x183   : > { %562 = vpow2.f32 %v286_v43  ;;  %v279_v47 = vsub.f32 %v225_v27, %v259_v46 }
 0x184   : > { %564 = vpow2.f32 %v290_v42  ;;  %v292_v48 = vmul.f32 1.442695, %v281_v45 }
 0x185   : > { %v288_v49 = vmul.f32 1.442695, %v279_v47 }
 0x186   : > { %v268_v50 = vpop.xlane.xlu0 %267 }
 0x187   : > { %566 = vpow2.f32 %v288_v49  ;;  %v282_v51 = vsub.f32 %v238_v31, %v268_v50 }
 0x188   : > { %v271_v52 = vpop.xlane.xlu1 %270  ;;  %568 = vpow2.f32 %v292_v48 }
 0x189   : > { %v294_v53 = vmul.f32 1.442695, %v282_v51  ;;  %v283_v54 = vsub.f32 %v241_v34, %v271_v52 }
 0x18a   : > { %v274_v55 = vpop.xlane.xlu0 %273 }
 0x18b   : > { %570 = vpow2.f32 %v294_v53  ;;  %v296_v56 = vmul.f32 1.442695, %v283_v54  ;;  %v284_v57 = vsub.f32 %v541_v30, %v274_v55 }
 0x18c   : > { %v277_v58 = vpop.xlane.xlu1 %276 }
 0x18d   : > { %v563_v59 = vpop.eup %562  ;;  %572 = vpow2.f32 %v296_v56  ;;  %v298_v60 = vmul.f32 1.442695, %v284_v57  ;;  %v285_v61 = vsub.f32 %v542_v32, %v277_v58 }
 0x18e   : > { %v302_v62 = vsel %vm253_vm0, %v563_v59, 0.0  ;;  %v565_v63 = vpop.eup %564 }
 0x18f   : > { %574 = vpow2.f32 %v298_v60  ;;  %v300_v0 = vmul.f32 1.442695, %v285_v61  ;;  %303 = vadd.xlane.f32.xlu0 %v302_v62  ;;  %v308_v2 = vsel %vm253_vm0, %v565_v63, 0.0 }
 0x191   : > { %v567_v1 = vpop.eup %566  ;;  %576 = vpow2.f32 %v300_v0 }
 0x192   : > { %v305_v3 = vsel %vm253_vm0, %v567_v1, 0.0  ;;  %v569_v4 = vpop.eup %568 }
 0x193   : > { %309 = vadd.xlane.f32.xlu0 %v308_v2  ;;  %306 = vadd.xlane.f32.xlu1 %v305_v3  ;;  %v311_v7 = vsel %vm253_vm0, %v569_v4, 0.0 }
 0x195   : > { %v571_v5 = vpop.eup %570 }
 0x196   : > { %v314_v6 = vsel %vm253_vm0, %v571_v5, 0.0 }
 0x197   : > { %v573_v8 = vpop.eup %572  ;;  %315 = vadd.xlane.f32.xlu0 %v314_v6  ;;  %312 = vadd.xlane.f32.xlu1 %v311_v7 }
 0x198   : > { %v317_v11 = vsel %vm253_vm0, %v573_v8, 0.0 }
 0x199   : > { %v575_v9 = vpop.eup %574 }
 0x19a   : > { %v320_v10 = vsel %vm253_vm0, %v575_v9, 0.0 }
 0x19b   : > { %v577_v12 = vpop.eup %576  ;;  %321 = vadd.xlane.f32.xlu0 %v320_v10  ;;  %318 = vadd.xlane.f32.xlu1 %v317_v11 }
 0x19c   : > { %v323_v13 = vsel %vm253_vm0, %v577_v12, 0.0 }
 0x19f   : > { %324 = vadd.xlane.f32.xlu1 %v323_v13 }
 0x21c   : > { %v304_v17 = vpop.xlane.xlu0 %303 }
 0x21d   : > { %578 = vrcp.f32 %v304_v17 }
 0x220   : > { %v310_v18 = vpop.xlane.xlu0 %309  ;;  %v307_v19 = vpop.xlane.xlu1 %306 }
 0x221   : > { %580 = vrcp.f32 %v307_v19 }
 0x222   : > { %582 = vrcp.f32 %v310_v18 }
 0x224   : > { %v316_v20 = vpop.xlane.xlu0 %315  ;;  %v313_v21 = vpop.xlane.xlu1 %312 }
 0x225   : > { %584 = vrcp.f32 %v313_v21 }
 0x226   : > { %586 = vrcp.f32 %v316_v20 }
 0x227   : > { %v579_v24 = vpop.eup %578 }
 0x228   : > { %v322_v22 = vpop.xlane.xlu0 %321  ;;  %v319_v23 = vpop.xlane.xlu1 %318  ;;  %v334_v27 = vmul.f32 %v579_v24, %v563_v59 }
 0x229   : > { %588 = vrcp.f32 %v319_v23 }
 0x22a   : > { %590 = vrcp.f32 %v322_v22 }
 0x22b   : > { %v581_v25 = vpop.eup %580 }
 0x22c   : > { %v325_v26 = vpop.xlane.xlu1 %324  ;;  %v335_v28 = vmul.f32 %v581_v25, %v567_v1  ;;  %v583_v29 = vpop.eup %582 }
 0x22d   : > { %592 = vrcp.f32 %v325_v26  ;;  %v336_v32 = vmul.f32 %v583_v29, %v565_v63 }
 0x22e   : > { %v342_v30 = vpack.c.bf16 %v335_v28, %v334_v27 }
 0x22f   : > { %v585_v31 = vpop.eup %584 }
 0x230   : > { %545 = vmatprep.mubr.msk.bf16.mxu1 %vm253_vm0, %v342_v30  ;;  %v337_v33 = vmul.f32 %v585_v31, %v569_v4  ;;  %v587_v34 = vpop.eup %586 }
 0x231   : > { %v338_v38 = vmul.f32 %v587_v34, %v571_v5 }
 0x232   : > { %v343_v35 = vpack.c.bf16 %v337_v33, %v336_v32 }
 0x233   : > { %v589_v36 = vpop.eup %588 }
 0x234   : > { %v591_v37 = vpop.eup %590  ;;  %546 = vmatmul.mubr.msk.bf16.vlgmr.msra.gmra.mrb[0].mxu1 %vm253_vm0, %v343_v35  ;;  %v339_v39 = vmul.f32 %v589_v36, %v573_v8 }
 0x235   : > { %v340_v42 = vmul.f32 %v591_v37, %v575_v9 }
 0x236   : > { %v344_v41 = vpack.c.bf16 %v339_v39, %v338_v38 }
 0x237   : > { %v593_v40 = vpop.eup %592 }
 0x238   : > { %v341_v43 = vmul.f32 %v593_v40, %v577_v12  ;;  %549 = vmatprep.mubr.msk.bf16.mxu1 %vm253_vm0, %v344_v41 }
 0x23a   : > { %v345_v44 = vpack.c.bf16 %v341_v43, %v340_v42 }
 0x23c   : > { %550 = vmatmul.mubr.msk.bf16.gmra.mrb[4].mxu1 %vm253_vm0, %v345_v44 }
 0x307   : > { %v547_v45 = vpop.f32.mrb[0].mxu1 }
 0x308   : > { %430 = vst [vmem:[%s163_s21 + $0x10] sm:$0xff] %v547_v45  ;;  %v397_v46 = vpop.f32.mrb[1].mxu1 }
 0x309   : > { %428 = vst [vmem:[%s163_s21] sm:$0xff] %v397_v46  ;;  %v548_v47 = vpop.f32.mrb[2].mxu1 }
 0x30a   : > { %431 = vst [vmem:[%s163_s21 + $0x18] sm:$0xff] %v548_v47  ;;  %v400_v48 = vpop.f32.mrb[3].mxu1 }
 0x30b   : > { %429 = vst [vmem:[%s163_s21 + $0x8] sm:$0xff] %v400_v48 }
 0x30f   : > { %v551_v49 = vpop.f32.mrb[4].mxu1 }
 0x310   : > { %434 = vst [vmem:[%s163_s21 + $0x30] sm:$0xff] %v551_v49  ;;  %v413_v50 = vpop.f32.mrb[5].mxu1 }
 0x311   : > { %432 = vst [vmem:[%s163_s21 + $0x20] sm:$0xff] %v413_v50  ;;  %v552_v51 = vpop.f32.mrb[6].mxu1 }
 0x312   : > { %435 = vst [vmem:[%s163_s21 + $0x38] sm:$0xff] %v552_v51  ;;  %v416_v52 = vpop.f32.mrb[7].mxu1 }
 0x313   : > { %433 = vst [vmem:[%s163_s21 + $0x28] sm:$0xff] %v416_v52 }
 0x314 PF: > { %s12_s9 = sadd.s32 1, %s600_s9  }
 0x315   : > { %p9_p4 = scmp.ge.s32.totalorder %s12_s9, 4  }
 0x317   :  { %11 = sbr.rel (!%p9_p4) target bundleno = 1 (0x1), region = 61 }

// kernel: forward.33
= control target key start
LH: loop header
LB: loop body
LE: loop exit
PB: predicated region body
PF: predicated region fallthrough
CT: control target
= control target key end

     0   :  { %v20_v2 = vlaneseq  ;;  %v72_v4 = vmov 1983009808   ;;  %s107_s0 = inlined_call_operand.vmem [shape: f32[2,256], index: 0, kind: input, shape index: {}]   ;;  %s108_s1 = inlined_call_operand.vmem [shape: f32[2,256], index: 1, kind: input, shape index: {}]   ;;  %s109_s2 = inlined_call_operand.hbm [shape: f32[1,1], index: 2, kind: output, shape index: {}]  }
   0x1   :  { %v12_v0 = vld [vmem:[%s107_s0] sm:$0xf]  ;;  %v18_v5 = vunpack.c.l.s4 %v72_v4 }
   0x2   :  { %v13_v1 = vld [vmem:[%s108_s1] sm:$0xf] }
   0x3   :  { %v14_v3 = vsub.f32 %v12_v0, %v13_v1 }
   0x4   :  { %7 = vsyncpa [#allocation3], 0  ;;  %v21_v6 = vshrl.u32 %v20_v2, 7  ;;  %v19_v8 = vunpack.c.0.s8 %v18_v5  ;;  %vm27_vm0 = vcmask 1041408   ;;  %s60_s15 = scalar_lea.hbm %s109_s2, 16 }
   0x5   :  { %v15_v7 = vmul.f32 %v14_v3, %v14_v3  ;;  %p61_p0 = scmp.ne.s32.totalorder %s109_s2, %s60_s15  ;;  %p64_p1 = scmp.lt.u32.totalorder %s60_s15, %s109_s2 }
   0x6   :  { %v22_v9 = vsub.s32 %v19_v8, %v21_v6 }
   0x7   :  { %p66_p2 = pnand %p64_p1, %p61_p0 }
   0x8   :  { %v23_v10 = vrot.slane %v15_v7, %v22_v9 }
   0xa   :  { %v24_v11 = vcombine.high %v23_v10, %v23_v10  ;;  %v28_v12 = vsel %vm27_vm0, %v23_v10, 0.0 }
   0xc   :  { %v29_v13 = vsel %vm27_vm0, %v24_v11, 0.0 }
   0xd   :  { %v30_v14 = vadd.f32 %v29_v13, %v28_v12 }
   0xf   :  { %31 = vadd.xlane.f32.xlu0 %v30_v14 }
  0x9c   :  { %v32_v15 = vpop.xlane.xlu0 %31 }
  0x9d   :  { %v33_v16 = vrot.slane %v32_v15, 4 }
  0x9f   :  { %v34_v17 = vadd.f32 %v33_v16, %v32_v15 }
  0xa1   :  { %v35_v18 = vrot.slane %v34_v17, 2 }
  0xa3   :  { %v36_v19 = vadd.f32 %v35_v18, %v34_v17 }
  0xa5   :  { %v37_v20 = vrot.slane %v36_v19, 1 }
  0xa7   :  { %v38_v21 = vadd.f32 %v37_v20, %v36_v19 }
  0xa9   :  { %56 = vpush %v38_v21 }
  0xda   :  { %s57_s0 = spop %56 }
  0xdb   :  { %s40_s1 = smul.f32 0.001953125, %s57_s0 }
  0xdd   :  { %42 = sst [smem:[#allocation2]] %s40_s1 }
  0xde   :  { %69 = shalt.err (!%p66_p2)
}
  0xdf   :  { %s73_s20 = smov [#allocation2]  }
  0xe0   :  { %50 = dma.smem_to_hbm %s73_s20, 16, %s109_s2, [#allocation3]  }
  0xe1   :  { %70 = dma.done.wait [#allocation3], 16  }
  0xe2   :  { %71 = vsyncadd [#allocation3], 4294967280 }
  0xe3   :  { %54 = sfence }
  0xe4   :  { %55 = vsyncpa [#allocation3], 1 }

// kernel: forward.31
= control target key start
LH: loop header
LB: loop body
LE: loop exit
PB: predicated region body
PF: predicated region fallthrough
CT: control target
= control target key end

     0   :  { %s843_s15 = smov 0   ;;  %s845_s16 = smov 0   ;;  %s921_s0 = inlined_call_operand.vmem [shape: f32[128,128], index: 0, kind: input, shape index: {}]   ;;  %s922_s1 = inlined_call_operand.vmem [shape: f32[128,128], index: 1, kind: input, shape index: {}]   ;;  %s923_s2 = inlined_call_operand.vmem [shape: bf16[128,128], index: 2, kind: input, shape index: {}]   ;;  %s924_s3 = inlined_call_operand.vmem [shape: f32[1,128], index: 3, kind: input, shape index: {}]   ;;  %s925_s4 = inlined_call_operand.vmem [shape: f32[128,128], index: 4, kind: output, shape index: {}]  }
   0x1   :  { %s847_s17 = smov 0  }
   0x2 LB: > { %s26_s18 = sadd.s32 1, %s812_s16  ;;  %p652_p0 = scmp.ge.s32.totalorder %s816_s17, 1  ;;  %s816_s17 = sphi %s847_s17, %s14_s17   ;;  %s812_s16 = sphi %s845_s16, %s927_s16   ;;  %s808_s15 = sphi %s843_s15, %s926_s15  }
   0x3   : > { %p28_p1 = scmp.ge.s32.totalorder %s26_s18, 2  ;;  %p202_p2 = scmp.lt.s32.totalorder %s816_s17, 3 }
   0x5   : > { %s929_s18 = smov (%p28_p1, %s26_s18), 0  ;;  %p203_p3 = pnand %p652_p0, %p202_p2 }
   0x6   : > { %v754_v0 = vld [vmem:[%s923_s2] sm:$0xff] (!%p203_p3)   ;;  %s653_s21 = sshll.u32 (!%p203_p3), %s808_s15, 3  ;;  %v755_v1 = vld [vmem:[%s923_s2 + $0x8] sm:$0xff] (!%p203_p3)   ;;  %v756_v2 = vld [vmem:[%s923_s2 + $0x10] sm:$0xff] (!%p203_p3)  }
   0x7   : > { %206 = sbr.rel (%p203_p3) target bundleno = 291 (0x123), region = 36  ;;  %p242_p4 = scmp.lt.s32.totalorder (!%p203_p3), %s653_s21, 15  ;;  %690 = vmatprep.subr.bf16.mxu0 (!%p203_p3), %v754_v0  ;;  %714 = vmatprep.subr.bf16.mxu1 (!%p203_p3), %v754_v0  ;;  %v757_v3 = vld [vmem:[%s923_s2 + $0x18] sm:$0xff] (!%p203_p3)   ;;  %v758_v10 = vld [vmem:[%s923_s2 + $0x20] sm:$0xff] (!%p203_p3)   ;;  %v759_v11 = vld [vmem:[%s923_s2 + $0x28] sm:$0xff] (!%p203_p3)  }
   0x8   : > { %691 = vmatpush3.bf16.msra.mxu0 (!%p203_p3), %v754_v0  ;;  %722 = vmatpush3.bf16.msra.mxu1 (!%p203_p3), %v754_v0  ;;  %v760_v12 = vld [vmem:[%s923_s2 + $0x30] sm:$0xff] (!%p203_p3)   ;;  %v761_v13 = vld [vmem:[%s923_s2 + $0x38] sm:$0xff] (!%p203_p3)   ;;  %v667_v20 = vld [vmem:[%s924_s3] ss:$0 sm:$0xff] (!%p203_p3) }
   0x9   : > { %692 = vmatprep.subr.bf16.mxu0 (!%p203_p3), %v755_v1  ;;  %715 = vmatprep.subr.bf16.mxu1 (!%p203_p3), %v755_v1 }
   0xc   : > { %693 = vmatpush3.bf16.msra.mxu0 (!%p203_p3), %v755_v1  ;;  %723 = vmatpush3.bf16.msra.mxu1 (!%p203_p3), %v755_v1 }
   0xd   : > { %694 = vmatprep.subr.bf16.mxu0 (!%p203_p3), %v756_v2  ;;  %716 = vmatprep.subr.bf16.mxu1 (!%p203_p3), %v756_v2 }
   0xe   : > { %s931_s21 = smov (!%p242_p4, %s653_s21), 15 }
   0xf   : > { %s870_s26 = sshll.u32 %s931_s21, 3 }
  0x10   : > { %s876_s29 = scalar_lea.vmem %s921_s0, %s870_s26  ;;  %695 = vmatpush3.bf16.msra.mxu0 %v756_v2  ;;  %724 = vmatpush3.bf16.msra.mxu1 %v756_v2  ;;  %s254_s19 = scalar_lea.vmem %s922_s1, %s870_s26 }
  0x11   : > { %v281_v4 = vld [vmem:[%s876_s29] sm:$0xff]  ;;  %v282_v5 = vld [vmem:[%s876_s29 + $0x8] sm:$0xff]  ;;  %696 = vmatprep.subr.bf16.mxu0 %v757_v3  ;;  %717 = vmatprep.subr.bf16.mxu1 %v757_v3  ;;  %v283_v14 = vld [vmem:[%s876_s29 + $0x10] sm:$0xff]  ;;  %s266_s24 = scalar_lea.vmem %s925_s4, %s870_s26 }
  0x12   : > { %v285_v6 = vld [vmem:[%s876_s29 + $0x20] sm:$0xff]  ;;  %v297_v7 = vpack.c.bf16 %v282_v5, %v281_v4  ;;  %v286_v8 = vld [vmem:[%s876_s29 + $0x28] sm:$0xff]  ;;  %v284_v15 = vld [vmem:[%s876_s29 + $0x18] sm:$0xff] }
  0x13   : > { %v299_v9 = vpack.c.bf16 %v286_v8, %v285_v6  ;;  %v287_v16 = vld [vmem:[%s876_s29 + $0x30] sm:$0xff]  ;;  %v288_v17 = vld [vmem:[%s876_s29 + $0x38] sm:$0xff]  ;;  %v298_v18 = vpack.c.bf16 %v284_v15, %v283_v14  ;;  %v472_v28 = vld [vmem:[%s254_s19] sm:$0xff] }
  0x14   : > { %706 = vmatprep.mubr.bf16.mxu0 %v297_v7  ;;  %697 = vmatpush3.bf16.msra.mxu0 %v757_v3  ;;  %v300_v19 = vpack.c.bf16 %v288_v17, %v287_v16  ;;  %v474_v22 = vld [vmem:[%s254_s19 + $0x10] sm:$0xff]  ;;  %v476_v30 = vld [vmem:[%s254_s19 + $0x20] sm:$0xff]  ;;  %v475_v34 = vld [vmem:[%s254_s19 + $0x18] sm:$0xff] }
  0x15   : > { %710 = vmatprep.mubr.bf16.mxu1 %v299_v9  ;;  %725 = vmatpush3.bf16.msra.mxu1 %v757_v3  ;;  %v478_v24 = vld [vmem:[%s254_s19 + $0x30] sm:$0xff]  ;;  %v479_v36 = vld [vmem:[%s254_s19 + $0x38] sm:$0xff]  ;;  %v473_v42 = vld [vmem:[%s254_s19 + $0x8] sm:$0xff] }
  0x16   : > { %698 = vmatprep.subr.bf16.mxu0 %v758_v10  ;;  %718 = vmatprep.subr.bf16.mxu1 %v758_v10  ;;  %v477_v44 = vld [vmem:[%s254_s19 + $0x28] sm:$0xff] }
  0x18   : > { %699 = vmatpush3.bf16.msra.mxu0 %v758_v10 }
  0x19   : > { %726 = vmatpush3.bf16.msra.mxu1 %v758_v10  ;;  %700 = vmatprep.subr.bf16.mxu0 %v759_v11 }
  0x1a   : > { %719 = vmatprep.subr.bf16.mxu1 %v759_v11 }
  0x1c   : > { %701 = vmatpush3.bf16.msra.mxu0 %v759_v11 }
  0x1d   : > { %727 = vmatpush3.bf16.msra.mxu1 %v759_v11  ;;  %702 = vmatprep.subr.bf16.mxu0 %v760_v12 }
  0x1e   : > { %720 = vmatprep.subr.bf16.mxu1 %v760_v12 }
  0x20   : > { %703 = vmatpush3.bf16.msra.mxu0 %v760_v12 }
  0x21   : > { %728 = vmatpush3.bf16.msra.mxu1 %v760_v12  ;;  %704 = vmatprep.subr.bf16.mxu0 %v761_v13 }
  0x22   : > { %721 = vmatprep.subr.bf16.mxu1 %v761_v13 }
  0x24   : > { %705 = vmatpush3.bf16.msra.mxu0 %v761_v13 }
  0x25   : > { %729 = vmatpush3.bf16.msra.mxu1 %v761_v13 }
  0x27   : > { %707 = vmatmul.mubr.bf16.vlgmr.msra.gmra.mrb[0].mxu0 %v298_v18 }
  0x28   : > { %711 = vmatmul.mubr.bf16.vlgmr.msra.gmra.mrb[0].mxu1 %v300_v19 }
  0xfa   : > { %v708_v21 = vpop.f32.mrb[0].mxu0 }
  0xfb   : > { %v712_v23 = vpop.f32.mrb[0].mxu1  ;;  %v466_v25 = vadd.f32 %v708_v21, %v667_v20  ;;  %v399_v27 = vpop.f32.mrb[1].mxu0 }
  0xfc   : > { %v470_v26 = vadd.f32 %v712_v23, %v667_v20  ;;  %v415_v29 = vpop.f32.mrb[1].mxu1  ;;  %v464_v31 = vadd.f32 %v667_v20, %v399_v27  ;;  %v709_v33 = vpop.f32.mrb[2].mxu0 }
  0xfd   : > { %v468_v32 = vadd.f32 %v667_v20, %v415_v29  ;;  %v713_v35 = vpop.f32.mrb[2].mxu1  ;;  %v482_v37 = vadd.f32 %v474_v22, %v466_v25  ;;  %v467_v39 = vadd.f32 %v709_v33, %v667_v20  ;;  %v402_v41 = vpop.f32.mrb[3].mxu0 }
  0xfe   : > { %v486_v38 = vadd.f32 %v478_v24, %v470_v26  ;;  %v471_v40 = vadd.f32 %v713_v35, %v667_v20  ;;  %v418_v43 = vpop.f32.mrb[3].mxu1  ;;  %v480_v45 = vadd.f32 %v472_v28, %v464_v31  ;;  %v465_v47 = vadd.f32 %v667_v20, %v402_v41 }
  0xff   : > { %v484_v46 = vadd.f32 %v476_v30, %v468_v32  ;;  %v469_v48 = vadd.f32 %v667_v20, %v418_v43  ;;  %v670_v49 = vmul.f32 -1.442695, %v482_v37  ;;  %v483_v51 = vadd.f32 %v475_v34, %v467_v39 }
 0x100   : > { %v674_v50 = vmul.f32 -1.442695, %v486_v38  ;;  %v487_v52 = vadd.f32 %v479_v36, %v471_v40  ;;  %v668_v53 = vmul.f32 -1.442695, %v480_v45  ;;  %v481_v55 = vadd.f32 %v473_v42, %v465_v47 }
 0x101   : > { %v672_v54 = vmul.f32 -1.442695, %v484_v46  ;;  %v485_v56 = vadd.f32 %v477_v44, %v469_v48  ;;  %762 = vpow2.f32 %v670_v49  ;;  %v671_v57 = vmul.f32 -1.442695, %v483_v51 }
 0x102   : > { %764 = vpow2.f32 %v674_v50  ;;  %v675_v58 = vmul.f32 -1.442695, %v487_v52  ;;  %v669_v59 = vmul.f32 -1.442695, %v481_v55 }
 0x103   : > { %766 = vpow2.f32 %v668_v53  ;;  %v673_v60 = vmul.f32 -1.442695, %v485_v56 }
 0x104   : > { %768 = vpow2.f32 %v672_v54 }
 0x105   : > { %770 = vpow2.f32 %v671_v57 }
 0x106   : > { %772 = vpow2.f32 %v675_v58 }
 0x107   : > { %774 = vpow2.f32 %v669_v59 }
 0x108   : > { %776 = vpow2.f32 %v673_v60 }
 0x10b   : > { %v763_v61 = vpop.eup %762 }
 0x10c   : > { %v765_v62 = vpop.eup %764  ;;  %v514_v63 = vadd.f32 1.0, %v763_v61 }
 0x10d   : > { %v767_v0 = vpop.eup %766  ;;  %v518_v1 = vadd.f32 1.0, %v765_v62 }
 0x10e   : > { %v769_v2 = vpop.eup %768  ;;  %778 = vrcp.f32 %v514_v63  ;;  %v512_v3 = vadd.f32 1.0, %v767_v0 }
 0x10f   : > { %v771_v4 = vpop.eup %770  ;;  %780 = vrcp.f32 %v518_v1  ;;  %v516_v5 = vadd.f32 1.0, %v769_v2 }
 0x110   : > { %v773_v6 = vpop.eup %772  ;;  %782 = vrcp.f32 %v512_v3  ;;  %v515_v7 = vadd.f32 1.0, %v771_v4 }
 0x111   : > { %v775_v8 = vpop.eup %774  ;;  %784 = vrcp.f32 %v516_v5  ;;  %v519_v9 = vadd.f32 1.0, %v773_v6 }
 0x112   : > { %v777_v10 = vpop.eup %776  ;;  %786 = vrcp.f32 %v515_v7  ;;  %v513_v11 = vadd.f32 1.0, %v775_v8 }
 0x113   : > { %788 = vrcp.f32 %v519_v9  ;;  %v517_v12 = vadd.f32 1.0, %v777_v10 }
 0x114   : > { %790 = vrcp.f32 %v513_v11 }
 0x115   : > { %792 = vrcp.f32 %v517_v12 }
 0x118   : > { %v779_v13 = vpop.eup %778 }
 0x119   : > { %v781_v14 = vpop.eup %780  ;;  %v538_v15 = vmul.f32 %v779_v13, %v482_v37 }
 0x11a   : > { %v783_v16 = vpop.eup %782  ;;  %v542_v17 = vmul.f32 %v781_v14, %v486_v38 }
 0x11b   : > { %v785_v18 = vpop.eup %784  ;;  %546 = vst [vmem:[%s266_s24 + $0x10] sm:$0xff] %v538_v15  ;;  %v536_v19 = vmul.f32 %v783_v16, %v480_v45 }
 0x11c   : > { %v787_v20 = vpop.eup %786  ;;  %550 = vst [vmem:[%s266_s24 + $0x30] sm:$0xff] %v542_v17  ;;  %v540_v21 = vmul.f32 %v785_v18, %v484_v46 }
 0x11d   : > { %v789_v22 = vpop.eup %788  ;;  %544 = vst [vmem:[%s266_s24] sm:$0xff] %v536_v19  ;;  %v539_v23 = vmul.f32 %v787_v20, %v483_v51 }
 0x11e   : > { %v791_v24 = vpop.eup %790  ;;  %548 = vst [vmem:[%s266_s24 + $0x20] sm:$0xff] %v540_v21  ;;  %v543_v25 = vmul.f32 %v789_v22, %v487_v52 }
 0x11f   : > { %v793_v26 = vpop.eup %792  ;;  %547 = vst [vmem:[%s266_s24 + $0x18] sm:$0xff] %v539_v23  ;;  %v537_v27 = vmul.f32 %v791_v24, %v481_v55 }
 0x120   : > { %551 = vst [vmem:[%s266_s24 + $0x38] sm:$0xff] %v543_v25  ;;  %v541_v28 = vmul.f32 %v793_v26, %v485_v56 }
 0x121   : > { %545 = vst [vmem:[%s266_s24 + $0x8] sm:$0xff] %v537_v27 }
 0x122   : > { %549 = vst [vmem:[%s266_s24 + $0x28] sm:$0xff] %v541_v28 }
 0x123 PF: > { %s14_s17 = sadd.s32 1, %s816_s17   ;;  %s926_s15 = smov %s812_s16 }
 0x124   : > { %p11_p5 = scmp.ge.s32.totalorder %s14_s17, 4   ;;  %s927_s16 = smov %s929_s18 }
 0x126   :  { %13 = sbr.rel (!%p11_p5) target bundleno = 2 (0x2), region = 80 }

// kernel: forward.32
= control target key start
LH: loop header
LB: loop body
LE: loop exit
PB: predicated region body
PF: predicated region fallthrough
CT: control target
= control target key end

     0   :  { %s2358_s12 = smov 0   ;;  %s2726_s0 = inlined_call_operand.vmem [shape: f32[2,10,10,128], index: 0, kind: input, shape index: {}]   ;;  %s2727_s1 = inlined_call_operand.vmem [shape: bf16[9,128,128], index: 1, kind: input, shape index: {}]   ;;  %s2728_s2 = inlined_call_operand.vmem [shape: f32[1,128], index: 2, kind: input, shape index: {}]   ;;  %s2729_s3 = inlined_call_operand.vmem [shape: f32[2,64,128], index: 3, kind: output, shape index: {}]  }
   0x1 LB: > { %s1585_s13 = sadd.s32 4294967295, %s2336_s12   ;;  %p1589_p0 = scmp.ge.s32.totalorder %s2336_s12, 1  ;;  %s2336_s12 = sphi %s2358_s12, %s13_s12  }
   0x2   : > { %p137_p1 = scmp.lt.s32.totalorder %s2336_s12, 3 }
   0x4   : > { %p138_p2 = pnand %p1589_p0, %p137_p1 }
   0x5   : > { %v2258_v0 = vld [vmem:[%s2727_s1 + $0x40] sm:$0xff] (!%p138_p2)   ;;  %p161_p3 = scmp.lt.s32.totalorder (!%p138_p2), %s1585_s13, 1  ;;  %v2260_v2 = vld [vmem:[%s2727_s1 + $0x48] sm:$0xff] (!%p138_p2)   ;;  %v2262_v4 = vld [vmem:[%s2727_s1 + $0x50] sm:$0xff] (!%p138_p2)  }
   0x6   : > { %141 = sbr.rel (%p138_p2) target bundleno = 387 (0x183), region = 32  ;;  %v2259_v1 = vld [vmem:[%s2727_s1 + $0x100] sm:$0xff] (!%p138_p2)   ;;  %1953 = vmatprep.subr.bf16.mxu1 (!%p138_p2), %v2258_v0  ;;  %v2261_v3 = vld [vmem:[%s2727_s1 + $0x108] sm:$0xff] (!%p138_p2)   ;;  %v2263_v5 = vld [vmem:[%s2727_s1 + $0x110] sm:$0xff] (!%p138_p2)  }
   0x7   : > { %2049 = vmatprep.subr.bf16.mxu0 (!%p138_p2), %v2259_v1  ;;  %1954 = vmatpush3.bf16.msra.mxu1 (!%p138_p2), %v2258_v0  ;;  %v2264_v6 = vld [vmem:[%s2727_s1 + $0x58] sm:$0xff] (!%p138_p2)   ;;  %v2266_v8 = vld [vmem:[%s2727_s1 + $0x60] sm:$0xff] (!%p138_p2)   ;;  %v2268_v10 = vld [vmem:[%s2727_s1 + $0x68] sm:$0xff] (!%p138_p2)  }
   0x8   : > { %2050 = vmatpush3.bf16.msra.mxu0 (!%p138_p2), %v2259_v1  ;;  %1955 = vmatprep.subr.bf16.mxu1 (!%p138_p2), %v2260_v2  ;;  %v2265_v7 = vld [vmem:[%s2727_s1 + $0x118] sm:$0xff] (!%p138_p2)   ;;  %v2267_v9 = vld [vmem:[%s2727_s1 + $0x120] sm:$0xff] (!%p138_p2)   ;;  %v2269_v13 = vld [vmem:[%s2727_s1 + $0x128] sm:$0xff] (!%p138_p2)  }
   0x9   : > { %2051 = vmatprep.subr.bf16.mxu0 (!%p138_p2), %v2261_v3  ;;  %v2270_v17 = vld [vmem:[%s2727_s1 + $0x70] sm:$0xff] (!%p138_p2)   ;;  %v2272_v19 = vld [vmem:[%s2727_s1 + $0x78] sm:$0xff] (!%p138_p2)   ;;  %v2274_v21 = vld [vmem:[%s2727_s1] sm:$0xff] (!%p138_p2)  }
   0xa   : > { %v2271_v18 = vld [vmem:[%s2727_s1 + $0x130] sm:$0xff] (!%p138_p2)   ;;  %v2273_v20 = vld [vmem:[%s2727_s1 + $0x138] sm:$0xff] (!%p138_p2)   ;;  %v2275_v24 = vld [vmem:[%s2727_s1 + $0x140] sm:$0xff] (!%p138_p2)  }
   0xb   : > { %1956 = vmatpush3.bf16.msra.mxu1 (!%p138_p2), %v2260_v2  ;;  %v2276_v29 = vld [vmem:[%s2727_s1 + $0x8] sm:$0xff] (!%p138_p2)   ;;  %v2278_v34 = vld [vmem:[%s2727_s1 + $0x10] sm:$0xff] (!%p138_p2)   ;;  %v2280_v43 = vld [vmem:[%s2727_s1 + $0x18] sm:$0xff] (!%p138_p2)  }
   0xc   : > { %2052 = vmatpush3.bf16.msra.mxu0 (!%p138_p2), %v2261_v3  ;;  %1957 = vmatprep.subr.bf16.mxu1 (!%p138_p2), %v2262_v4  ;;  %v2277_v30 = vld [vmem:[%s2727_s1 + $0x148] sm:$0xff] (!%p138_p2)   ;;  %v2279_v36 = vld [vmem:[%s2727_s1 + $0x150] sm:$0xff] (!%p138_p2)   ;;  %v2281_v44 = vld [vmem:[%s2727_s1 + $0x158] sm:$0xff] (!%p138_p2)  }
   0xd   : > { %s2731_s13 = smov (!%p161_p3, %s1585_s13), 1  ;;  %2053 = vmatprep.subr.bf16.mxu0 %v2263_v5  ;;  %v2282_v47 = vld [vmem:[%s2727_s1 + $0x20] sm:$0xff]   ;;  %v2284_v49 = vld [vmem:[%s2727_s1 + $0x28] sm:$0xff]   ;;  %v2286_v51 = vld [vmem:[%s2727_s1 + $0x30] sm:$0xff]  }
   0xe   : > { %s2249_s30 = smul.u32 160, %s2731_s13  ;;  %v2283_v48 = vld [vmem:[%s2727_s1 + $0x160] sm:$0xff]   ;;  %v2285_v50 = vld [vmem:[%s2727_s1 + $0x168] sm:$0xff]   ;;  %v2287_v52 = vld [vmem:[%s2727_s1 + $0x170] sm:$0xff]  }
   0xf   : > { %1958 = vmatpush3.bf16.msra.mxu1 %v2262_v4  ;;  %v2288_v53 = vld [vmem:[%s2727_s1 + $0x38] sm:$0xff]   ;;  %v2290_v57 = vld [vmem:[%s2727_s1 + $0x80] sm:$0xff]   ;;  %v2292_v0 = vld [vmem:[%s2727_s1 + $0x88] sm:$0xff]  }
  0x10   : > { %2054 = vmatpush3.bf16.msra.mxu0 %v2263_v5  ;;  %1959 = vmatprep.subr.bf16.mxu1 %v2264_v6  ;;  %s2402_s10 = scalar_lea.vmem %s2726_s0, %s2249_s30  ;;  %v2289_v54 = vld [vmem:[%s2727_s1 + $0x178] sm:$0xff]   ;;  %v2291_v59 = vld [vmem:[%s2727_s1 + $0x180] sm:$0xff]   ;;  %v2293_v4 = vld [vmem:[%s2727_s1 + $0x188] sm:$0xff]  }
  0x11   : > { %2055 = vmatprep.subr.bf16.mxu0 %v2265_v7  ;;  %v200_v11 = vld [vmem:[%s2402_s10 + $0x1] sm:$0xff]  ;;  %v201_v12 = vld [vmem:[%s2402_s10 + $0x11] sm:$0xff] }
  0x12   : > { %v208_v14 = vpack.c.bf16 %v201_v12, %v200_v11  ;;  %v1682_v15 = vld [vmem:[%s2402_s10 + $0x21] sm:$0xff]  ;;  %v203_v22 = vld [vmem:[%s2402_s10 + $0x31] sm:$0xff] }
  0x13   : > { %1960 = vmatpush3.bf16.msra.mxu1 %v2264_v6  ;;  %v764_v16 = vpack.c.bf16 %v1682_v15, %v201_v12  ;;  %v1684_v23 = vld [vmem:[%s2402_s10 + $0x41] sm:$0xff]  ;;  %v2433_v25 = vpack.c.bf16 %v203_v22, %v1682_v15  ;;  %v205_v26 = vld [vmem:[%s2402_s10 + $0x51] sm:$0xff] }
  0x14   : > { %2056 = vmatpush3.bf16.msra.mxu0 %v2265_v7  ;;  %1961 = vmatprep.subr.bf16.mxu1 %v2266_v8  ;;  %v765_v27 = vpack.c.bf16 %v1684_v23, %v203_v22  ;;  %v1686_v28 = vld [vmem:[%s2402_s10 + $0x61] sm:$0xff]  ;;  %v2443_v31 = vpack.c.bf16 %v205_v26, %v1684_v23  ;;  %v207_v33 = vld [vmem:[%s2402_s10 + $0x71] sm:$0xff] }
  0x15   : > { %2057 = vmatprep.subr.bf16.mxu0 %v2267_v9  ;;  %1969 = vmatprep.mubr.bf16.mxu1 %v208_v14  ;;  %v766_v32 = vpack.c.bf16 %v1686_v28, %v205_v26  ;;  %v2451_v35 = vld [vmem:[%s2402_s10 + $0x81] sm:$0xff]  ;;  %v2457_v37 = vpack.c.bf16 %v207_v33, %v1686_v28  ;;  %v2461_v39 = vld [vmem:[%s2402_s10 + $0x10] sm:$0xff]  ;;  %v2304_v26 = vld [vmem:[%s2727_s1 + $0xb8] sm:$0xff]  }
  0x16   : > { %2065 = vmatprep.mubr.bf16.mxu0 %v764_v16  ;;  %v172_v38 = vld [vmem:[%s2402_s10] sm:$0xff]  ;;  %v767_v40 = vpack.c.bf16 %v2451_v35, %v207_v33  ;;  %v2465_v41 = vld [vmem:[%s2402_s10 + $0x12] sm:$0xff]  ;;  %v2301_v22 = vld [vmem:[%s2727_s1 + $0x1a8] sm:$0xff]  }
  0x17   : > { %1962 = vmatpush3.bf16.msra.mxu1 %v2266_v8  ;;  %v2468_v42 = vld [vmem:[%s2402_s10 + $0x22] sm:$0xff]  ;;  %v180_v45 = vpack.c.bf16 %v2461_v39, %v172_v38  ;;  %v2508_v56 = vld [vmem:[%s2402_s10 + $0x30] sm:$0xff]  ;;  %v2296_v16 = vld [vmem:[%s2727_s1 + $0x98] sm:$0xff]  }
  0x18   : > { %2058 = vmatpush3.bf16.msra.mxu0 %v2267_v9  ;;  %1963 = vmatprep.subr.bf16.mxu1 %v2268_v10  ;;  %v914_v46 = vpack.c.bf16 %v2468_v42, %v2465_v41  ;;  %v2505_v55 = vld [vmem:[%s2402_s10 + $0x20] sm:$0xff]  ;;  %v2514_v58 = vld [vmem:[%s2402_s10 + $0x32] sm:$0xff]  ;;  %v2309_v33 = vld [vmem:[%s2727_s1 + $0x1c8] sm:$0xff]  }
  0x19   : > { %2059 = vmatprep.subr.bf16.mxu0 %v2269_v13  ;;  %v2520_v60 = vld [vmem:[%s2402_s10 + $0x42] sm:$0xff]  ;;  %v2526_v62 = vld [vmem:[%s2402_s10 + $0x50] sm:$0xff]  ;;  %v181_v63 = vpack.c.bf16 %v2508_v56, %v2505_v55 }
  0x1a   : > { %v2523_v61 = vld [vmem:[%s2402_s10 + $0x40] sm:$0xff]  ;;  %v2534_v1 = vld [vmem:[%s2402_s10 + $0x52] sm:$0xff]  ;;  %v915_v2 = vpack.c.bf16 %v2520_v60, %v2514_v58 }
  0x1b   : > { %1964 = vmatpush3.bf16.msra.mxu1 %v2268_v10  ;;  %v2539_v3 = vld [vmem:[%s2402_s10 + $0x62] sm:$0xff]  ;;  %v2546_v5 = vpack.c.bf16 %v2526_v62, %v2523_v61  ;;  %v2294_v7 = vld [vmem:[%s2727_s1 + $0x90] sm:$0xff]  }
  0x1c   : > { %2060 = vmatpush3.bf16.msra.mxu0 %v2269_v13  ;;  %1965 = vmatprep.subr.bf16.mxu1 %v2270_v17  ;;  %v2549_v6 = vld [vmem:[%s2402_s10 + $0x60] sm:$0xff]  ;;  %v916_v8 = vpack.c.bf16 %v2539_v3, %v2534_v1  ;;  %v2557_v9 = vld [vmem:[%s2402_s10 + $0x70] sm:$0xff] }
  0x1d   : > { %2061 = vmatprep.subr.bf16.mxu0 %v2271_v18  ;;  %v2560_v10 = vld [vmem:[%s2402_s10 + $0x72] sm:$0xff]  ;;  %v2563_v11 = vld [vmem:[%s2402_s10 + $0x82] sm:$0xff]  ;;  %v183_v13 = vpack.c.bf16 %v2557_v9, %v2549_v6 }
  0x1e   : > { %v2295_v12 = vld [vmem:[%s2727_s1 + $0x190] sm:$0xff]   ;;  %v455_v14 = vld [vmem:[%s2402_s10 + $0x2] sm:$0xff]  ;;  %v917_v15 = vpack.c.bf16 %v2563_v11, %v2560_v10 }
  0x1f   : > { %1966 = vmatpush3.bf16.msra.mxu1 %v2270_v17  ;;  %v2297_v17 = vld [vmem:[%s2727_s1 + $0x198] sm:$0xff]   ;;  %v2302_v23 = vld [vmem:[%s2727_s1 + $0xb0] sm:$0xff]   ;;  %v2306_v28 = vld [vmem:[%s2727_s1 + $0xc0] sm:$0xff]  }
  0x20   : > { %2062 = vmatpush3.bf16.msra.mxu0 %v2271_v18  ;;  %1967 = vmatprep.subr.bf16.mxu1 %v2272_v19  ;;  %v463_v18 = vpack.c.bf16 %v2465_v41, %v455_v14  ;;  %v2631_v38 = vld [vmem:[%s2402_s10 + $0x80] sm:$0xff]  ;;  %v2311_v41 = vld [vmem:[%s2727_s1 + $0x1d0] sm:$0xff]  }
  0x21   : > { %2063 = vmatprep.subr.bf16.mxu0 %v2273_v20 }
  0x23   : > { %1968 = vmatpush3.bf16.msra.mxu1 %v2272_v19  ;;  %v2298_v19 = vld [vmem:[%s2727_s1 + $0xa0] sm:$0xff]  }
  0x24   : > { %2064 = vmatpush3.bf16.msra.mxu0 %v2273_v20  ;;  %1977 = vmatprep.subr.bf16.mxu1 %v2274_v21  ;;  %v2299_v20 = vld [vmem:[%s2727_s1 + $0x1a0] sm:$0xff]  }
  0x25   : > { %2073 = vmatprep.subr.bf16.mxu0 %v2275_v24 }
  0x26   : > { %1970 = vmatmul.mubr.bf16.vlgmr.msra.gmra.mrb[0].mxu1 %v2433_v25 }
  0x27   : > { %1978 = vmatpush3.bf16.msra.mxu1 %v2274_v21  ;;  %2066 = vmatmul.mubr.bf16.vlgmr.msra.gmra.mrb[0].mxu0 %v765_v27  ;;  %v2300_v21 = vld [vmem:[%s2727_s1 + $0xa8] sm:$0xff]   ;;  %v2305_v27 = vld [vmem:[%s2727_s1 + $0x1b8] sm:$0xff]  }
  0x28   : > { %2074 = vmatpush3.bf16.msra.mxu0 %v2275_v24  ;;  %1979 = vmatprep.subr.bf16.mxu1 %v2276_v29  ;;  %v2303_v24 = vld [vmem:[%s2727_s1 + $0x1b0] sm:$0xff]  }
  0x29   : > { %2075 = vmatprep.subr.bf16.mxu0 %v2277_v30  ;;  %1973 = vmatprep.mubr.bf16.mxu1 %v2443_v31 }
  0x2a   : > { %2069 = vmatprep.mubr.bf16.mxu0 %v766_v32  ;;  %v2308_v32 = vld [vmem:[%s2727_s1 + $0xc8] sm:$0xff]  }
  0x2b   : > { %1980 = vmatpush3.bf16.msra.mxu1 %v2276_v29  ;;  %v2307_v29 = vld [vmem:[%s2727_s1 + $0x1c0] sm:$0xff]  }
  0x2c   : > { %2076 = vmatpush3.bf16.msra.mxu0 %v2277_v30  ;;  %1981 = vmatprep.subr.bf16.mxu1 %v2278_v34  ;;  %v2613_v30 = vpack.c.bf16 %v2514_v58, %v2468_v42  ;;  %v2640_v42 = vpack.c.bf16 %v2560_v10, %v2539_v3  ;;  %v1784_v58 = vld [vmem:[%s2402_s10 + $0x91] sm:$0xff] }
  0x2d   : > { %2077 = vmatprep.subr.bf16.mxu0 %v2279_v36 }
  0x2e   : > { %1974 = vmatmul.mubr.bf16.gmra.mrb[4].mxu1 %v2457_v37 }
  0x2f   : > { %1982 = vmatpush3.bf16.msra.mxu1 %v2278_v34  ;;  %2070 = vmatmul.mubr.bf16.gmra.mrb[4].mxu0 %v767_v40  ;;  %v2623_v34 = vpack.c.bf16 %v2534_v1, %v2520_v60  ;;  %v1752_v40 = vld [vmem:[%s2402_s10 + $0x90] sm:$0xff]  ;;  %v1218_v60 = vpack.c.bf16 %v1784_v58, %v2451_v35  ;;  %v2327_v35 = vld [vmem:[%s2727_s1 + $0x228] sm:$0xff]  }
  0x30   : > { %2078 = vmatpush3.bf16.msra.mxu0 %v2279_v36  ;;  %1983 = vmatprep.subr.bf16.mxu1 %v2280_v43  ;;  %v2310_v36 = vld [vmem:[%s2727_s1 + $0xd0] sm:$0xff]  }
  0x31   : > { %2079 = vmatprep.subr.bf16.mxu0 %v2281_v44  ;;  %1993 = vmatprep.mubr.bf16.mxu1 %v180_v45  ;;  %v2313_v45 = vld [vmem:[%s2727_s1 + $0x1d8] sm:$0xff]  }
  0x32   : > { %2089 = vmatprep.mubr.bf16.mxu0 %v914_v46  ;;  %v614_v46 = vpack.c.bf16 %v2505_v55, %v2461_v39  ;;  %v2316_v39 = vld [vmem:[%s2727_s1 + $0xe8] sm:$0xff]  }
  0x33   : > { %1984 = vmatpush3.bf16.msra.mxu1 %v2280_v43  ;;  %v1068_v43 = vpack.c.bf16 %v1752_v40, %v2631_v38  ;;  %v2323_v55 = vld [vmem:[%s2727_s1 + $0x208] sm:$0xff]  }
  0x34   : > { %2080 = vmatpush3.bf16.msra.mxu0 %v2281_v44  ;;  %1985 = vmatprep.subr.bf16.mxu1 %v2282_v47  ;;  %v2312_v44 = vld [vmem:[%s2727_s1 + $0xd8] sm:$0xff]  }
  0x35   : > { %2081 = vmatprep.subr.bf16.mxu0 %v2283_v48 }
  0x37   : > { %1986 = vmatpush3.bf16.msra.mxu1 %v2282_v47  ;;  %v2314_v47 = vld [vmem:[%s2727_s1 + $0xe0] sm:$0xff]  }
  0x38   : > { %2082 = vmatpush3.bf16.msra.mxu0 %v2283_v48  ;;  %1987 = vmatprep.subr.bf16.mxu1 %v2284_v49  ;;  %v2315_v48 = vld [vmem:[%s2727_s1 + $0x1e0] sm:$0xff]  }
  0x39   : > { %2083 = vmatprep.subr.bf16.mxu0 %v2285_v50 }
  0x3b   : > { %1988 = vmatpush3.bf16.msra.mxu1 %v2284_v49  ;;  %v2317_v49 = vld [vmem:[%s2727_s1 + $0x1e8] sm:$0xff]  }
  0x3c   : > { %2084 = vmatpush3.bf16.msra.mxu0 %v2285_v50  ;;  %1989 = vmatprep.subr.bf16.mxu1 %v2286_v51  ;;  %v2318_v50 = vld [vmem:[%s2727_s1 + $0xf0] sm:$0xff]  }
  0x3d   : > { %2085 = vmatprep.subr.bf16.mxu0 %v2287_v52 }
  0x3f   : > { %1990 = vmatpush3.bf16.msra.mxu1 %v2286_v51  ;;  %v2320_v51 = vld [vmem:[%s2727_s1 + $0xf8] sm:$0xff]  }
  0x40   : > { %2086 = vmatpush3.bf16.msra.mxu0 %v2287_v52  ;;  %1991 = vmatprep.subr.bf16.mxu1 %v2288_v53  ;;  %v2321_v52 = vld [vmem:[%s2727_s1 + $0x1f8] sm:$0xff]  }
  0x41   : > { %2087 = vmatprep.subr.bf16.mxu0 %v2289_v54 }
  0x43   : > { %1992 = vmatpush3.bf16.msra.mxu1 %v2288_v53  ;;  %v2322_v53 = vld [vmem:[%s2727_s1 + $0x200] sm:$0xff]  }
  0x44   : > { %2088 = vmatpush3.bf16.msra.mxu0 %v2289_v54  ;;  %2001 = vmatprep.subr.bf16.mxu1 %v2290_v57  ;;  %v615_v54 = vpack.c.bf16 %v2523_v61, %v2508_v56  ;;  %v2324_v56 = vld [vmem:[%s2727_s1 + $0x210] sm:$0xff]  }
  0x45   : > { %2097 = vmatprep.subr.bf16.mxu0 %v2291_v59  ;;  %v2328_v61 = vld [vmem:[%s2727_s1 + $0x230] sm:$0xff]  }
  0x46   : > { %1994 = vmatmul.mubr.bf16.vlgmr.msra.gmra.mrb[0].mxu1 %v181_v63 }
  0x47   : > { %2002 = vmatpush3.bf16.msra.mxu1 %v2290_v57  ;;  %2090 = vmatmul.mubr.bf16.vlgmr.msra.gmra.mrb[0].mxu0 %v915_v2  ;;  %v616_v57 = vpack.c.bf16 %v2549_v6, %v2526_v62  ;;  %v2329_v62 = vld [vmem:[%s2727_s1 + $0x238] sm:$0xff]  }
  0x48   : > { %2098 = vmatpush3.bf16.msra.mxu0 %v2291_v59  ;;  %2003 = vmatprep.subr.bf16.mxu1 %v2292_v0  ;;  %v617_v59 = vpack.c.bf16 %v2631_v38, %v2557_v9 }
  0x49   : > { %2099 = vmatprep.subr.bf16.mxu0 %v2293_v4  ;;  %1997 = vmatprep.mubr.bf16.mxu1 %v2546_v5 }
  0x4a   : > { %2093 = vmatprep.mubr.bf16.mxu0 %v916_v8 }
  0x4b   : > { %2004 = vmatpush3.bf16.msra.mxu1 %v2292_v0 }
  0x4c   : > { %2100 = vmatpush3.bf16.msra.mxu0 %v2293_v4  ;;  %2005 = vmatprep.subr.bf16.mxu1 %v2294_v7 }
  0x4d   : > { %2101 = vmatprep.subr.bf16.mxu0 %v2295_v12 }
  0x4e   : > { %1998 = vmatmul.mubr.bf16.gmra.mrb[4].mxu1 %v183_v13 }
  0x4f   : > { %2006 = vmatpush3.bf16.msra.mxu1 %v2294_v7  ;;  %2094 = vmatmul.mubr.bf16.gmra.mrb[4].mxu0 %v917_v15 }
  0x50   : > { %2102 = vmatpush3.bf16.msra.mxu0 %v2295_v12  ;;  %2007 = vmatprep.subr.bf16.mxu1 %v2296_v16 }
  0x51   : > { %2103 = vmatprep.subr.bf16.mxu0 %v2297_v17  ;;  %2017 = vmatprep.mubr.bf16.mxu1 %v463_v18 }
  0x52   : > { %2113 = vmatprep.mubr.bf16.mxu0 %v181_v63  ;;  %v1816_v63 = vld [vmem:[%s2402_s10 + $0x92] sm:$0xff]  ;;  %s1844_s10 = sshll.u32 %s2731_s13, 6 }
  0x53   : > { %2008 = vmatpush3.bf16.msra.mxu1 %v2296_v16  ;;  %v1368_v0 = vpack.c.bf16 %v1816_v63, %v2563_v11  ;;  %s170_s21 = scalar_lea.vmem %s2729_s3, %s1844_s10 }
  0x54   : > { %2104 = vmatpush3.bf16.msra.mxu0 %v2297_v17  ;;  %2009 = vmatprep.subr.bf16.mxu1 %v2298_v19  ;;  %v1841_v17 = vld [vmem:[%s2728_s2] ss:$0 sm:$0xff] }
  0x55   : > { %2105 = vmatprep.subr.bf16.mxu0 %v2299_v20 }
  0x57   : > { %2010 = vmatpush3.bf16.msra.mxu1 %v2298_v19 }
  0x58   : > { %2106 = vmatpush3.bf16.msra.mxu0 %v2299_v20  ;;  %2011 = vmatprep.subr.bf16.mxu1 %v2300_v21 }
  0x59   : > { %2107 = vmatprep.subr.bf16.mxu0 %v2301_v22 }
  0x5b   : > { %2012 = vmatpush3.bf16.msra.mxu1 %v2300_v21 }
  0x5c   : > { %2108 = vmatpush3.bf16.msra.mxu0 %v2301_v22  ;;  %2013 = vmatprep.subr.bf16.mxu1 %v2302_v23 }
  0x5d   : > { %2109 = vmatprep.subr.bf16.mxu0 %v2303_v24 }
  0x5f   : > { %2014 = vmatpush3.bf16.msra.mxu1 %v2302_v23 }
  0x60   : > { %2110 = vmatpush3.bf16.msra.mxu0 %v2303_v24  ;;  %2015 = vmatprep.subr.bf16.mxu1 %v2304_v26 }
  0x61   : > { %2111 = vmatprep.subr.bf16.mxu0 %v2305_v27 }
  0x63   : > { %2016 = vmatpush3.bf16.msra.mxu1 %v2304_v26 }
  0x64   : > { %2112 = vmatpush3.bf16.msra.mxu0 %v2305_v27  ;;  %2025 = vmatprep.subr.bf16.mxu1 %v2306_v28 }
  0x65   : > { %2121 = vmatprep.subr.bf16.mxu0 %v2307_v29 }
  0x66   : > { %2018 = vmatmul.mubr.bf16.vlgmr.msra.gmra.mrb[0].mxu1 %v2613_v30 }
  0x67   : > { %2026 = vmatpush3.bf16.msra.mxu1 %v2306_v28  ;;  %2114 = vmatmul.mubr.bf16.vlgmr.msra.gmra.mrb[0].mxu0 %v2546_v5 }
  0x68   : > { %2122 = vmatpush3.bf16.msra.mxu0 %v2307_v29  ;;  %2027 = vmatprep.subr.bf16.mxu1 %v2308_v32 }
  0x69   : > { %2123 = vmatprep.subr.bf16.mxu0 %v2309_v33  ;;  %2021 = vmatprep.mubr.bf16.mxu1 %v2623_v34 }
  0x6a   : > { %2117 = vmatprep.mubr.bf16.mxu0 %v183_v13 }
  0x6b   : > { %2028 = vmatpush3.bf16.msra.mxu1 %v2308_v32 }
  0x6c   : > { %2124 = vmatpush3.bf16.msra.mxu0 %v2309_v33  ;;  %2029 = vmatprep.subr.bf16.mxu1 %v2310_v36 }
  0x6d   : > { %2125 = vmatprep.subr.bf16.mxu0 %v2311_v41 }
  0x6e   : > { %2022 = vmatmul.mubr.bf16.gmra.mrb[4].mxu1 %v2640_v42 }
  0x6f   : > { %2030 = vmatpush3.bf16.msra.mxu1 %v2310_v36  ;;  %2118 = vmatmul.mubr.bf16.gmra.mrb[4].mxu0 %v1068_v43 }
  0x70   : > { %2126 = vmatpush3.bf16.msra.mxu0 %v2311_v41  ;;  %2031 = vmatprep.subr.bf16.mxu1 %v2312_v44 }
  0x71   : > { %2127 = vmatprep.subr.bf16.mxu0 %v2313_v45  ;;  %2041 = vmatprep.mubr.bf16.mxu1 %v614_v46 }
  0x72   : > { %2137 = vmatprep.mubr.bf16.mxu0 %v2433_v25  ;;  %v2319_v25 = vld [vmem:[%s2727_s1 + $0x1f0] sm:$0xff]  }
  0x73   : > { %2032 = vmatpush3.bf16.msra.mxu1 %v2312_v44 }
  0x74   : > { %2128 = vmatpush3.bf16.msra.mxu0 %v2313_v45  ;;  %2033 = vmatprep.subr.bf16.mxu1 %v2314_v47 }
  0x75   : > { %2129 = vmatprep.subr.bf16.mxu0 %v2315_v48 }
  0x77   : > { %2034 = vmatpush3.bf16.msra.mxu1 %v2314_v47 }
  0x78   : > { %2130 = vmatpush3.bf16.msra.mxu0 %v2315_v48  ;;  %2035 = vmatprep.subr.bf16.mxu1 %v2316_v39 }
  0x79   : > { %2131 = vmatprep.subr.bf16.mxu0 %v2317_v49 }
  0x7b   : > { %2036 = vmatpush3.bf16.msra.mxu1 %v2316_v39 }
  0x7c   : > { %2132 = vmatpush3.bf16.msra.mxu0 %v2317_v49  ;;  %2037 = vmatprep.subr.bf16.mxu1 %v2318_v50 }
  0x7d   : > { %2133 = vmatprep.subr.bf16.mxu0 %v2319_v25 }
  0x7f   : > { %2038 = vmatpush3.bf16.msra.mxu1 %v2318_v50 }
  0x80   : > { %2134 = vmatpush3.bf16.msra.mxu0 %v2319_v25  ;;  %2039 = vmatprep.subr.bf16.mxu1 %v2320_v51 }
  0x81   : > { %2135 = vmatprep.subr.bf16.mxu0 %v2321_v52 }
  0x83   : > { %2040 = vmatpush3.bf16.msra.mxu1 %v2320_v51 }
  0x84   : > { %2136 = vmatpush3.bf16.msra.mxu0 %v2321_v52  ;;  %2169 = vmatprep.subr.bf16.mxu1 %v2322_v53 }
  0x85   : > { %2145 = vmatprep.subr.bf16.mxu0 %v2322_v53 }
  0x86   : > { %2042 = vmatmul.mubr.bf16.vlgmr.msra.gmra.mrb[0].mxu1 %v615_v54 }
  0x87   : > { %2138 = vmatmul.mubr.bf16.vlgmr.msra.gmra.mrb[0].mxu0 %v2443_v31  ;;  %2177 = vmatpush3.bf16.msra.mxu1 %v2322_v53  ;;  %v2325_v31 = vld [vmem:[%s2727_s1 + $0x218] sm:$0xff]  }
  0x88   : > { %2146 = vmatpush3.bf16.msra.mxu0 %v2322_v53  ;;  %2170 = vmatprep.subr.bf16.mxu1 %v2323_v55 }
  0x89   : > { %2147 = vmatprep.subr.bf16.mxu0 %v2323_v55  ;;  %2045 = vmatprep.mubr.bf16.mxu1 %v616_v57 }
  0x8a   : > { %2141 = vmatprep.mubr.bf16.mxu0 %v2457_v37  ;;  %v2326_v37 = vld [vmem:[%s2727_s1 + $0x220] sm:$0xff]  }
  0x8b   : > { %2178 = vmatpush3.bf16.msra.mxu1 %v2323_v55 }
  0x8c   : > { %2148 = vmatpush3.bf16.msra.mxu0 %v2323_v55  ;;  %2171 = vmatprep.subr.bf16.mxu1 %v2324_v56 }
  0x8d   : > { %2149 = vmatprep.subr.bf16.mxu0 %v2324_v56 }
  0x8e   : > { %2046 = vmatmul.mubr.bf16.gmra.mrb[4].mxu1 %v617_v59 }
  0x8f   : > { %2142 = vmatmul.mubr.bf16.gmra.mrb[4].mxu0 %v1218_v60  ;;  %2179 = vmatpush3.bf16.msra.mxu1 %v2324_v56 }
  0x90   : > { %2150 = vmatpush3.bf16.msra.mxu0 %v2324_v56  ;;  %2172 = vmatprep.subr.bf16.mxu1 %v2325_v31 }
  0x91   : > { %2151 = vmatprep.subr.bf16.mxu0 %v2325_v31  ;;  %2161 = vmatprep.mubr.bf16.mxu0 %v2613_v30 }
  0x92   : > { %2165 = vmatprep.mubr.bf16.mxu1 %v2640_v42 }
  0x93   : > { %2180 = vmatpush3.bf16.msra.mxu1 %v2325_v31 }
  0x94   : > { %2152 = vmatpush3.bf16.msra.mxu0 %v2325_v31  ;;  %2173 = vmatprep.subr.bf16.mxu1 %v2326_v37 }
  0x95   : > { %2153 = vmatprep.subr.bf16.mxu0 %v2326_v37 }
  0x97   : > { %2181 = vmatpush3.bf16.msra.mxu1 %v2326_v37 }
  0x98   : > { %2154 = vmatpush3.bf16.msra.mxu0 %v2326_v37  ;;  %2174 = vmatprep.subr.bf16.mxu1 %v2327_v35 }
  0x99   : > { %2155 = vmatprep.subr.bf16.mxu0 %v2327_v35 }
  0x9b   : > { %2182 = vmatpush3.bf16.msra.mxu1 %v2327_v35 }
  0x9c   : > { %2156 = vmatpush3.bf16.msra.mxu0 %v2327_v35  ;;  %2175 = vmatprep.subr.bf16.mxu1 %v2328_v61 }
  0x9d   : > { %2157 = vmatprep.subr.bf16.mxu0 %v2328_v61 }
  0x9f   : > { %2183 = vmatpush3.bf16.msra.mxu1 %v2328_v61 }
  0xa0   : > { %2158 = vmatpush3.bf16.msra.mxu0 %v2328_v61  ;;  %2176 = vmatprep.subr.bf16.mxu1 %v2329_v62 }
  0xa1   : > { %2159 = vmatprep.subr.bf16.mxu0 %v2329_v62 }
  0xa3   : > { %2184 = vmatpush3.bf16.msra.mxu1 %v2329_v62 }
  0xa4   : > { %2160 = vmatpush3.bf16.msra.mxu0 %v2329_v62 }
  0xa6   : > { %2166 = vmatmul.mubr.bf16.vlgmr.msra.gmra.mrb[8].mxu1 %v1368_v0 }
  0xa7   : > { %2162 = vmatmul.mubr.bf16.vlgmr.msra.gmra.mrb[0].mxu0 %v2623_v34 }
 0x159   : > { %v2043_v1 = vpop.f32.mrb[0].mxu1 }
 0x15a   : > { %v717_v2 = vpop.f32.mrb[1].mxu1 }
 0x15b   : > { %v2044_v3 = vpop.f32.mrb[2].mxu1 }
 0x15c   : > { %v720_v4 = vpop.f32.mrb[3].mxu1 }
 0x161   : > { %v2047_v5 = vpop.f32.mrb[4].mxu1 }
 0x162   : > { %v2143_v6 = vpop.f32.mrb[4].mxu0  ;;  %v733_v7 = vpop.f32.mrb[5].mxu1 }
 0x163   : > { %v2189_v8 = vadd.f32 %v2143_v6, %v2047_v5  ;;  %v1334_v9 = vpop.f32.mrb[5].mxu0  ;;  %v2048_v10 = vpop.f32.mrb[6].mxu1 }
 0x164   : > { %v2191_v12 = vadd.f32 %v1334_v9, %v733_v7  ;;  %v2144_v13 = vpop.f32.mrb[6].mxu0  ;;  %v736_v14 = vpop.f32.mrb[7].mxu1 }
 0x165   : > { %v2193_v11 = vadd.f32 %v2144_v13, %v2048_v10  ;;  %v1337_v15 = vpop.f32.mrb[7].mxu0 }
 0x166   : > { %v2195_v16 = vadd.f32 %v1337_v15, %v736_v14 }
 0x179   : > { %v2167_v18 = vpop.f32.mrb[8].mxu1 }
 0x17a   : > { %v2163_v19 = vpop.f32.mrb[0].mxu0  ;;  %v2190_v20 = vadd.f32 %v2189_v8, %v2167_v18  ;;  %v1484_v21 = vpop.f32.mrb[9].mxu1 }
 0x17b   : > { %v2185_v22 = vadd.f32 %v2163_v19, %v2043_v1  ;;  %v1468_v23 = vpop.f32.mrb[1].mxu0  ;;  %v2192_v24 = vadd.f32 %v2191_v12, %v1484_v21  ;;  %v2168_v26 = vpop.f32.mrb[10].mxu1 }
 0x17c   : > { %v1520_v27 = vadd.f32 %v2190_v20, %v1841_v17  ;;  %v2186_v28 = vadd.f32 %v1468_v23, %v717_v2  ;;  %v2164_v29 = vpop.f32.mrb[2].mxu0  ;;  %v2194_v30 = vadd.f32 %v2193_v11, %v2168_v26  ;;  %v1487_v32 = vpop.f32.mrb[11].mxu1 }
 0x17d   : > { %v1516_v33 = vadd.f32 %v2185_v22, %v1841_v17  ;;  %v1518_v34 = vadd.f32 %v2192_v24, %v1841_v17  ;;  %v2187_v36 = vadd.f32 %v2164_v29, %v2044_v3  ;;  %v1471_v38 = vpop.f32.mrb[3].mxu0  ;;  %v2196_v40 = vadd.f32 %v2195_v16, %v1487_v32 }
 0x17e   : > { %1528 = vst [vmem:[%s170_s21 + $0x30] sm:$0xff] %v1520_v27  ;;  %v1514_v41 = vadd.f32 %v2186_v28, %v1841_v17  ;;  %v1521_v42 = vadd.f32 %v2194_v30, %v1841_v17  ;;  %v2188_v43 = vadd.f32 %v1471_v38, %v720_v4 }
 0x17f   : > { %1524 = vst [vmem:[%s170_s21 + $0x10] sm:$0xff] %v1516_v33  ;;  %1526 = vst [vmem:[%s170_s21 + $0x20] sm:$0xff] %v1518_v34  ;;  %v1517_v44 = vadd.f32 %v2187_v36, %v1841_v17  ;;  %v1519_v45 = vadd.f32 %v2196_v40, %v1841_v17 }
 0x180   : > { %1522 = vst [vmem:[%s170_s21] sm:$0xff] %v1514_v41  ;;  %1529 = vst [vmem:[%s170_s21 + $0x38] sm:$0xff] %v1521_v42  ;;  %v1515_v46 = vadd.f32 %v2188_v43, %v1841_v17 }
 0x181   : > { %1525 = vst [vmem:[%s170_s21 + $0x18] sm:$0xff] %v1517_v44  ;;  %1527 = vst [vmem:[%s170_s21 + $0x28] sm:$0xff] %v1519_v45 }
 0x182   : > { %1523 = vst [vmem:[%s170_s21 + $0x8] sm:$0xff] %v1515_v46 }
 0x183 PF: > { %s13_s12 = sadd.s32 1, %s2336_s12  }
 0x184   : > { %p10_p4 = scmp.ge.s32.totalorder %s13_s12, 4  }
 0x186   :  { %12 = sbr.rel (!%p10_p4) target bundleno = 1 (0x1), region = 72 }

</bundles_post_ra>
